<compile_context>
chip_gen: v5e
topology: v5e:2x2
jax: 0.10.0
libtpu: 0.0.40
codegen_flags: <defaults>
</compile_context>

<pallas_src>
import functools

import jax
import jax.numpy as jnp
from jax.experimental import pallas as pl
from jax.experimental.pallas import tpu as pltpu


def _round_up(v, m):
    return (v + m - 1) // m * m


# ---------------------------------------------------------------------------
# In-kernel helpers
# ---------------------------------------------------------------------------
def _conv1_rows(x_ref, w1_ref, b1_ref, y1s_ref, *, stride, cinp, wo,
                gstart, lstart, nrows):
    """Compute `nrows` rows of y1 = relu(conv3x3(x)*s1 + b1) starting at global
    output row `gstart`, into scratch rows [lstart, lstart+nrows), cols 1..wo
    (cols 0 / wo+1 stay zero: they are conv2's spatial padding).

    Wide-K formulation: per kernel row dh the three column taps are
    concatenated on the lane axis into one (nrows*wo, 3*Cin_pad) slab, so the
    conv is 3 matmuls with K = 3*Cin_pad instead of 9 with K = Cin_pad.
    """
    acc = None
    for dh in range(3):
        parts = []
        for dw in range(3):
            if stride == 1:
                xs = x_ref[0, 0, pl.ds(gstart + dh, nrows), dw:dw + wo, :]
            else:  # stride 2: read the (dh%2, dw%2) phase plane (contiguous)
                ph = (dh % 2) * 2 + (dw % 2)
                xs = x_ref[ph, 0, pl.ds(gstart + dh // 2, nrows),
                           dw // 2:dw // 2 + wo, :]
            parts.append(xs)
        slab = jnp.concatenate(parts, axis=-1).reshape(nrows * wo, 3 * cinp)
        part = jnp.dot(slab, w1_ref[dh], preferred_element_type=jnp.float32)
        acc = part if acc is None else acc + part
    y = jnp.maximum(acc + b1_ref[...], 0.0)
    y1s_ref[lstart:lstart + nrows, 1:wo + 1, :] = (
        y.reshape(nrows, wo, -1).astype(y1s_ref.dtype))


def _conv2_acc(y1s_ref, w2_ref, *, coutp, th, wo):
    """conv3x3 (stride 1) over the y1 scratch; same wide-K formulation."""
    acc = None
    for dh in range(3):
        wide = y1s_ref[dh:dh + th, :, :]                      # (th, wo+2, Coutp)
        slab = jnp.concatenate([wide[:, dw:dw + wo, :] for dw in range(3)],
                               axis=-1).reshape(th * wo, 3 * coutp)
        part = jnp.dot(slab, w2_ref[dh], preferred_element_type=jnp.float32)
        acc = part if acc is None else acc + part
    return acc


def _block_body(x_ref, w1_ref, b1_ref, w2_ref, b2_ref, o_ref, y1s_ref,
                residual_fn, *, stride, th, wo, cinp, coutp):
    t = pl.program_id(1)
    nt = pl.num_programs(1)
    row0 = t * th

    # Zeroing the scratch provides conv2's zero padding: left/right columns
    # always, top/bottom halo rows on the first/last tile.
    y1s_ref[...] = jnp.zeros_like(y1s_ref)

    conv1 = functools.partial(_conv1_rows, x_ref, w1_ref, b1_ref, y1s_ref,
                              stride=stride, cinp=cinp, wo=wo)
    conv1(gstart=row0, lstart=1, nrows=th)           # tile-interior rows

    @pl.when(t > 0)                                  # top halo row (recompute)
    def _():
        conv1(gstart=row0 - 1, lstart=0, nrows=1)

    @pl.when(t < nt - 1)                             # bottom halo row
    def _():
        conv1(gstart=row0 + th, lstart=th + 1, nrows=1)

    acc = _conv2_acc(y1s_ref, w2_ref, coutp=coutp, th=th, wo=wo)
    y = acc + b2_ref[...] + residual_fn(row0)
    o_ref[...] = jnp.maximum(y, 0.0).reshape(o_ref.shape).astype(o_ref.dtype)


def _block_identity_kernel(x_ref, w1_ref, b1_ref, w2_ref, b2_ref, o_ref,
                           y1s_ref, *, th, wo, cinp, coutp):
    def residual(row0):   # identity shortcut, read from the VMEM-resident image
        r = x_ref[0, 0, pl.ds(row0 + 1, th), 1:wo + 1, :]
        return r.reshape(th * wo, cinp).astype(jnp.float32)

    _block_body(x_ref, w1_ref, b1_ref, w2_ref, b2_ref, o_ref, y1s_ref,
                residual, stride=1, th=th, wo=wo, cinp=cinp, coutp=coutp)


def _block_projection_kernel(x_ref, w1_ref, b1_ref, w2_ref, b2_ref,
                             ws_ref, bs_ref, o_ref, y1s_ref,
                             *, th, wo, cinp, coutp):
    def residual(row0):   # fused 1x1 stride-2 conv + BN; x[2i,2j] == phase 3
        r = x_ref[3, 0, pl.ds(row0, th), 0:wo, :].reshape(th * wo, cinp)
        return (jnp.dot(r, ws_ref[...], preferred_element_type=jnp.float32)
                + bs_ref[...])

    _block_body(x_ref, w1_ref, b1_ref, w2_ref, b2_ref, o_ref, y1s_ref,
                residual, stride=2, th=th, wo=wo, cinp=cinp, coutp=coutp)


# ---------------------------------------------------------------------------
# Host-side glue: BN folding, weight/layout prep
# ---------------------------------------------------------------------------
def _fold_bn(gamma, beta, mean, var, eps=1e-5):
    scale = gamma / jnp.sqrt(var + eps)
    return scale, beta - mean * scale


def _pad_row(v, cpad):
    return jnp.zeros((1, cpad), jnp.float32).at[0, :v.shape[0]].set(v)


def _prep_w3x3(w, scale, cinp, coutp):
    """(Cout,Cin,3,3) OIHW -> (3, 3*Cin_pad, Cout_pad) bf16, BN scale folded.

    Row-dh slab layout: index [dh, dw*Cin_pad + ci, co]."""
    cout, cin = w.shape[:2]
    wt = jnp.transpose(w, (2, 3, 1, 0)) * scale[None, None, None, :]
    wt = jnp.zeros((3, 3, cinp, coutp), jnp.float32).at[:, :, :cin, :cout].set(wt)
    return wt.reshape(3, 3 * cinp, coutp).astype(jnp.bfloat16)


def _prep_w1x1(w, scale, cinp, coutp):
    cout, cin = w.shape[:2]
    wm = w.reshape(cout, cin).T * scale[None, :]
    return (jnp.zeros((cinp, coutp), jnp.float32).at[:cin, :cout].set(wm)
            .astype(jnp.bfloat16))


def _phase_split(xpad, stride):
    """(N,Hp,Wp,C) spatially padded NHWC -> (n_phase, N, Hp', Wp', C)."""
    if stride == 1:
        return xpad[None]
    return jnp.stack([xpad[:, a::2, b::2, :] for a in (0, 1) for b in (0, 1)],
                     axis=0)


def _pick_row_tile(ho, wo, target=1024):
    """Output rows per tile: divides Ho; th*Wo % 8 == 0 unless th == Ho
    (a full-extent output block is always layout-legal); ~`target` flat rows."""
    best = None
    for th in range(1, ho + 1):
        if ho % th:
            continue
        if (th * wo) % 8 and th != ho:
            continue
        score = abs(th * wo - target)
        if best is None or score < best[1]:
            best = (th, score)
    return best[0]


def residual_block_forward(x, params, downsample):
    """x: (N, Cin, H, W) f32 -> (N, Cout, Ho, Wo) f32 (eval-mode BatchNorm)."""
    stride = 2 if downsample else 1
    n, cin, h, w = x.shape
    cout = params["w1"].shape[0]
    assert h % stride == 0 and w % stride == 0
    ho, wo = h // stride, w // stride
    cinp, coutp = _round_up(cin, 128), _round_up(cout, 128)

    # Fold BN (eval-mode running stats); the scale goes into the bf16 weights.
    s1, b1 = _fold_bn(params["g1"], params["be1"], params["m1"], params["v1"])
    s2, b2 = _fold_bn(params["g2"], params["be2"], params["m2"], params["v2"])
    w1 = _prep_w3x3(params["w1"], s1, cinp, coutp)
    w2 = _prep_w3x3(params["w2"], s2, coutp, coutp)
    b1p, b2p = _pad_row(b1, coutp), _pad_row(b2, coutp)

    # NHWC lane-dense bf16 input, +1 spatial zero pad, channels padded to 128;
    # stride-2 blocks are 4-phase split so all in-kernel reads are contiguous.
    x_nhwc = jnp.transpose(x, (0, 2, 3, 1))
    x_nhwc = jnp.pad(x_nhwc, ((0, 0), (1, 1), (1, 1), (0, cinp - cin)))
    x_phases = _phase_split(x_nhwc.astype(jnp.bfloat16), stride)
    n_phase, _, hp, wp, _ = x_phases.shape

    th = _pick_row_tile(ho, wo)
    nt = ho // th
    tm = th * wo
    m = n * ho * wo

    x_spec = pl.BlockSpec((n_phase, 1, hp, wp, cinp), lambda b, t: (0, b, 0, 0, 0))
    w1_spec = pl.BlockSpec((3, 3 * cinp, coutp), lambda b, t: (0, 0, 0))
    w2_spec = pl.BlockSpec((3, 3 * coutp, coutp), lambda b, t: (0, 0, 0))
    vec_spec = pl.BlockSpec((1, coutp), lambda b, t: (0, 0))
    out_spec = pl.BlockSpec((1, tm, coutp), lambda b, t: (b, t, 0))

    args = [x_phases, w1, b1p, w2, b2p]
    in_specs = [x_spec, w1_spec, vec_spec, w2_spec, vec_spec]
    proj_flops = 0
    if downsample:
        ss, bs = _fold_bn(params["gs"], params["bes"], params["ms"], params["vs"])
        ws = _prep_w1x1(params["ws"], ss, cinp, coutp)
        args += [ws, _pad_row(bs, coutp)]
        in_specs += [pl.BlockSpec((cinp, coutp), lambda b, t: (0, 0)), vec_spec]
        kernel = functools.partial(_block_projection_kernel,
                                   th=th, wo=wo, cinp=cinp, coutp=coutp)
        proj_flops = 2 * m * cinp * coutp
    else:
        assert cin == cout, "identity shortcut requires in_channels == out_channels"
        kernel = functools.partial(_block_identity_kernel,
                                   th=th, wo=wo, cinp=cinp, coutp=coutp)

    cost = pl.CostEstimate(
        flops=2 * m * 9 * (cinp + coutp) * coutp + proj_flops,
        transcendentals=0,
        bytes_accessed=sum(int(a.size) * a.dtype.itemsize for a in args)
        + m * coutp * 2)

    # VMEM budget (blocks x2 for double-buffering) -> [32 MiB, 64 MiB].
    blk_b = (n_phase * hp * wp * cinp + 9 * cinp * coutp + 9 * coutp * coutp) * 2
    blk_b += 2 * coutp * 4
    if downsample:
        blk_b += cinp * coutp * 2 + coutp * 4
    est = (2 * (blk_b + tm * coutp * 2)
           + (th + 2) * (wo + 2) * coutp * 2          # y1 scratch
           + 8 * tm * 3 * max(cinp, coutp) * 4)       # in-kernel temporaries
    vmem_limit = int(min(max(32 << 20, 2 * est), 64 << 20))

    out = pl.pallas_call(
        kernel,
        grid=(n, nt),
        in_specs=in_specs,
        out_specs=out_spec,
        out_shape=jax.ShapeDtypeStruct((n, ho * wo, coutp), jnp.bfloat16),
        scratch_shapes=[pltpu.VMEM((th + 2, wo + 2, coutp), jnp.bfloat16)],
        compiler_params=pltpu.CompilerParams(
            dimension_semantics=("parallel", "parallel"),
            vmem_limit_bytes=vmem_limit),
        cost_estimate=cost,
    )(*args)

    # bf16 tail: channel un-pad + NCHW transpose; single f32 cast at the end.
    out = out.reshape(n, ho, wo, coutp)[..., :cout]
    return jnp.transpose(out, (0, 3, 1, 2)).astype(jnp.float32)


# ---------------------------------------------------------------------------
# Pure-JAX references
# ---------------------------------------------------------------------------
def _ref_conv(x, w, stride, pad):
    return jax.lax.conv_general_dilated(
        x, w, (stride, stride), ((pad, pad), (pad, pad)),
        dimension_numbers=("NCHW", "OIHW", "NCHW"),
        precision=jax.lax.Precision.HIGHEST)


def _ref_bn(x, g, b, m, v, eps=1e-5):
    sh = (1, -1, 1, 1)
    return ((x - m.reshape(sh)) / jnp.sqrt(v.reshape(sh) + eps) * g.reshape(sh)
            + b.reshape(sh))


def residual_block_reference(x, p, downsample, quantize=False):
    """quantize=False: exact f32 eval-mode semantics of the PyTorch module.
    quantize=True : mimics the kernel's bf16 data path (bf16 input / folded
    weights / intermediate / output, f32 accumulation)."""
    eps = 1e-5
    stride = 2 if downsample else 1
    q = (lambda a: a.astype(jnp.bfloat16).astype(jnp.float32)) if quantize \
        else (lambda a: a)

    def conv_bn(xin, w, g, be, m, v, s):
        pad = 1 if w.shape[-1] == 3 else 0
        if not quantize:
            return _ref_bn(_ref_conv(xin, w, s, pad), g, be, m, v, eps)
        scale = g / jnp.sqrt(v + eps)
        bias = be - m * scale
        wq = q(w * scale[:, None, None, None])
        return _ref_conv(xin, wq, s, pad) + bias.reshape(1, -1, 1, 1)

    xq = q(x)
    y = q(jax.nn.relu(conv_bn(xq, p["w1"], p["g1"], p["be1"], p["m1"], p["v1"],
                              stride)))
    y = conv_bn(y, p["w2"], p["g2"], p["be2"], p["m2"], p["v2"], 1)
    sc = (conv_bn(xq, p["ws"], p["gs"], p["bes"], p["ms"], p["vs"], 2)
          if downsample else xq)
    return q(jax.nn.relu(y + sc))


# ---------------------------------------------------------------------------
# Main
# ---------------------------------------------------------------------------
if __name__ == "__main__":
    key = jax.random.PRNGKey(0)

    def bn_params(k, c):
        k1, k2, k3, k4 = jax.random.split(k, 4)
        return (jax.random.uniform(k1, (c,), jnp.float32, 0.5, 1.5),   # gamma
                jax.random.normal(k2, (c,), jnp.float32) * 0.1,        # beta
                jax.random.normal(k3, (c,), jnp.float32) * 0.1,        # mean
                jax.random.uniform(k4, (c,), jnp.float32, 0.5, 1.5))   # var

    def make_params(k, cin, cout, downsample):
        ks = jax.random.split(k, 6)
        p = dict(w1=jax.random.normal(ks[0], (cout, cin, 3, 3), jnp.float32) * 0.1,
                 w2=jax.random.normal(ks[1], (cout, cout, 3, 3), jnp.float32) * 0.1)
        p["g1"], p["be1"], p["m1"], p["v1"] = bn_params(ks[2], cout)
        p["g2"], p["be2"], p["m2"], p["v2"] = bn_params(ks[3], cout)
        if downsample:
            p["ws"] = jax.random.normal(ks[4], (cout, cin, 1, 1), jnp.float32) * 0.1
            p["gs"], p["bes"], p["ms"], p["vs"] = bn_params(ks[5], cout)
        return p

    fwd = jax.jit(residual_block_forward, static_argnums=2)
    k1, k2, k3, k4 = jax.random.split(key, 4)

    # Test 1: downsampling block (Cin=4 -> Cout=8, stride 2, projection shortcut)
    x1 = jax.random.normal(k1, (2, 4, 16, 16), jnp.float32)
    p1 = make_params(k2, 4, 8, True)
    out1 = jax.block_until_ready(fwd(x1, p1, True))
    assert out1.shape == (2, 8, 8, 8), out1.shape
    refq1 = residual_block_reference(x1, p1, True, quantize=True)
    ref1 = residual_block_reference(x1, p1, True, quantize=False)
    assert jnp.allclose(out1, refq1, atol=2e-2, rtol=2e-2), \
        float(jnp.max(jnp.abs(out1 - refq1)))
    assert jnp.allclose(out1, ref1, atol=1.5e-1, rtol=1.5e-1), \
        float(jnp.max(jnp.abs(out1 - ref1)))

    # Test 2: identity block (Cin=Cout=8, stride 1, identity shortcut)
    x2 = jax.random.normal(k3, (2, 8, 16, 16), jnp.float32)
    p2 = make_params(k4, 8, 8, False)
    out2 = jax.block_until_ready(fwd(x2, p2, False))
    assert out2.shape == (2, 8, 16, 16), out2.shape
    refq2 = residual_block_reference(x2, p2, False, quantize=True)
    ref2 = residual_block_reference(x2, p2, False, quantize=False)
    assert jnp.allclose(out2, refq2, atol=2e-2, rtol=2e-2), \
        float(jnp.max(jnp.abs(out2 - refq2)))
    assert jnp.allclose(out2, ref2, atol=1.5e-1, rtol=1.5e-1), \
        float(jnp.max(jnp.abs(out2 - ref2)))

    print("KERNEL_OK")
</pallas_src>

<mosaic_0001>
module attributes {stable_mosaic.version = 11 : i64} {
  func.func @_block_projection_kernel(%arg0: i32, %arg1: i32, %arg2: memref<4x1x9x9x128xbf16, #tpu.memory_space<vmem>>, %arg3: memref<3x384x128xbf16, #tpu.memory_space<vmem>>, %arg4: memref<1x128xf32, #tpu.memory_space<vmem>>, %arg5: memref<3x384x128xbf16, #tpu.memory_space<vmem>>, %arg6: memref<1x128xf32, #tpu.memory_space<vmem>>, %arg7: memref<128x128xbf16, #tpu.memory_space<vmem>>, %arg8: memref<1x128xf32, #tpu.memory_space<vmem>>, %arg9: memref<1x64x128xbf16, #tpu.memory_space<vmem>>, %arg10: memref<10x10x128xbf16, #tpu.memory_space<vmem>>) attributes {dimension_semantics = [#tpu.dimension_semantics<parallel>, #tpu.dimension_semantics<parallel>], iteration_bounds = array<i64: 2, 1>, scalar_prefetch = 0 : i64, scratch_operands = 1 : i64, tpu.core_type = #tpu.core_type<tc>, window_params = [{transform_indices = @transform_0, window_bounds = array<i64: 4, 1, 9, 9, 128>}, {pipeline_mode = #tpu.pipeline_mode<synchronous>, transform_indices = @transform_1, window_bounds = array<i64: 3, 384, 128>}, {pipeline_mode = #tpu.pipeline_mode<synchronous>, transform_indices = @transform_2, window_bounds = array<i64: 1, 128>}, {pipeline_mode = #tpu.pipeline_mode<synchronous>, transform_indices = @transform_3, window_bounds = array<i64: 3, 384, 128>}, {pipeline_mode = #tpu.pipeline_mode<synchronous>, transform_indices = @transform_4, window_bounds = array<i64: 1, 128>}, {pipeline_mode = #tpu.pipeline_mode<synchronous>, transform_indices = @transform_5, window_bounds = array<i64: 128, 128>}, {pipeline_mode = #tpu.pipeline_mode<synchronous>, transform_indices = @transform_6, window_bounds = array<i64: 1, 128>}, {transform_indices = @transform_7, window_bounds = array<i64: 1, 64, 128>}]} {
    %c8_i32 = arith.constant 8 : i32
    %0 = arith.muli %arg1, %c8_i32 : i32
    %cst = arith.constant 0.000000e+00 : bf16
    %1 = vector.broadcast %cst : bf16 to vector<10x10x128xbf16>
    %c0 = arith.constant 0 : index
    %c0_0 = arith.constant 0 : index
    %c0_1 = arith.constant 0 : index
    %2 = vector.load %arg10[%c0, %c0_0, %c0_1] : memref<10x10x128xbf16, #tpu.memory_space<vmem>>, vector<10x10x128xbf16>
    tpu.vector_store %arg10[%c0, %c0_0, %c0_1], %1 {strides = array<i32>} : memref<10x10x128xbf16, #tpu.memory_space<vmem>>, vector<10x10x128xbf16>,
    %c0_i32 = arith.constant 0 : i32
    %3 = arith.addi %0, %c0_i32 : i32
    %c0_2 = arith.constant 0 : index
    %c0_3 = arith.constant 0 : index
    %4 = arith.index_cast %3 : i32 to index
    %c0_4 = arith.constant 0 : index
    %c0_5 = arith.constant 0 : index
    %5 = vector.load %arg2[%c0_2, %c0_3, %4, %c0_4, %c0_5] : memref<4x1x9x9x128xbf16, #tpu.memory_space<vmem>>, vector<1x1x8x8x128xbf16>
    %6 = vector.shape_cast %5 : vector<1x1x8x8x128xbf16> to vector<8x8x128xbf16>
    %c0_i32_6 = arith.constant 0 : i32
    %7 = arith.addi %0, %c0_i32_6 : i32
    %c1 = arith.constant 1 : index
    %c0_7 = arith.constant 0 : index
    %8 = arith.index_cast %7 : i32 to index
    %c0_8 = arith.constant 0 : index
    %c0_9 = arith.constant 0 : index
    %9 = vector.load %arg2[%c1, %c0_7, %8, %c0_8, %c0_9] : memref<4x1x9x9x128xbf16, #tpu.memory_space<vmem>>, vector<1x1x8x8x128xbf16>
    %10 = vector.shape_cast %9 : vector<1x1x8x8x128xbf16> to vector<8x8x128xbf16>
    %c0_i32_10 = arith.constant 0 : i32
    %11 = arith.addi %0, %c0_i32_10 : i32
    %c0_11 = arith.constant 0 : index
    %c0_12 = arith.constant 0 : index
    %12 = arith.index_cast %11 : i32 to index
    %c1_13 = arith.constant 1 : index
    %c0_14 = arith.constant 0 : index
    %13 = vector.load %arg2[%c0_11, %c0_12, %12, %c1_13, %c0_14] : memref<4x1x9x9x128xbf16, #tpu.memory_space<vmem>>, vector<1x1x8x8x128xbf16>
    %14 = vector.shape_cast %13 : vector<1x1x8x8x128xbf16> to vector<8x8x128xbf16>
    %15 = tpu.concatenate %6, %10, %14 in 2 : vector<8x8x128xbf16>, vector<8x8x128xbf16>, vector<8x8x128xbf16> -> vector<8x8x384xbf16>
    %16 = vector.shape_cast %15 : vector<8x8x384xbf16> to vector<64x384xbf16>
    %c0_15 = arith.constant 0 : index
    %c0_16 = arith.constant 0 : index
    %c0_17 = arith.constant 0 : index
    %17 = vector.load %arg3[%c0_15, %c0_16, %c0_17] : memref<3x384x128xbf16, #tpu.memory_space<vmem>>, vector<1x384x128xbf16>
    %18 = vector.shape_cast %17 : vector<1x384x128xbf16> to vector<384x128xbf16>
    %cst_18 = arith.constant dense<0.000000e+00> : vector<64x128xf32>
    %19 = tpu.matmul %16, %18, %cst_18 {dimension_numbers = #tpu.dot_dimension_numbers<[1], [0], [0], [1], [0, 0, 1, 1], [], []>} : vector<64x384xbf16>, vector<384x128xbf16>, vector<64x128xf32> -> vector<64x128xf32>
    %c0_i32_19 = arith.constant 0 : i32
    %20 = arith.addi %0, %c0_i32_19 : i32
    %c2 = arith.constant 2 : index
    %c0_20 = arith.constant 0 : index
    %21 = arith.index_cast %20 : i32 to index
    %c0_21 = arith.constant 0 : index
    %c0_22 = arith.constant 0 : index
    %22 = vector.load %arg2[%c2, %c0_20, %21, %c0_21, %c0_22] : memref<4x1x9x9x128xbf16, #tpu.memory_space<vmem>>, vector<1x1x8x8x128xbf16>
    %23 = vector.shape_cast %22 : vector<1x1x8x8x128xbf16> to vector<8x8x128xbf16>
    %c0_i32_23 = arith.constant 0 : i32
    %24 = arith.addi %0, %c0_i32_23 : i32
    %c3 = arith.constant 3 : index
    %c0_24 = arith.constant 0 : index
    %25 = arith.index_cast %24 : i32 to index
    %c0_25 = arith.constant 0 : index
    %c0_26 = arith.constant 0 : index
    %26 = vector.load %arg2[%c3, %c0_24, %25, %c0_25, %c0_26] : memref<4x1x9x9x128xbf16, #tpu.memory_space<vmem>>, vector<1x1x8x8x128xbf16>
    %27 = vector.shape_cast %26 : vector<1x1x8x8x128xbf16> to vector<8x8x128xbf16>
    %c0_i32_27 = arith.constant 0 : i32
    %28 = arith.addi %0, %c0_i32_27 : i32
    %c2_28 = arith.constant 2 : index
    %c0_29 = arith.constant 0 : index
    %29 = arith.index_cast %28 : i32 to index
    %c1_30 = arith.constant 1 : index
    %c0_31 = arith.constant 0 : index
    %30 = vector.load %arg2[%c2_28, %c0_29, %29, %c1_30, %c0_31] : memref<4x1x9x9x128xbf16, #tpu.memory_space<vmem>>, vector<1x1x8x8x128xbf16>
    %31 = vector.shape_cast %30 : vector<1x1x8x8x128xbf16> to vector<8x8x128xbf16>
    %32 = tpu.concatenate %23, %27, %31 in 2 : vector<8x8x128xbf16>, vector<8x8x128xbf16>, vector<8x8x128xbf16> -> vector<8x8x384xbf16>
    %33 = vector.shape_cast %32 : vector<8x8x384xbf16> to vector<64x384xbf16>
    %c1_32 = arith.constant 1 : index
    %c0_33 = arith.constant 0 : index
    %c0_34 = arith.constant 0 : index
    %34 = vector.load %arg3[%c1_32, %c0_33, %c0_34] : memref<3x384x128xbf16, #tpu.memory_space<vmem>>, vector<1x384x128xbf16>
    %35 = vector.shape_cast %34 : vector<1x384x128xbf16> to vector<384x128xbf16>
    %cst_35 = arith.constant dense<0.000000e+00> : vector<64x128xf32>
    %36 = tpu.matmul %33, %35, %cst_35 {dimension_numbers = #tpu.dot_dimension_numbers<[1], [0], [0], [1], [0, 0, 1, 1], [], []>} : vector<64x384xbf16>, vector<384x128xbf16>, vector<64x128xf32> -> vector<64x128xf32>
    %37 = arith.addf %19, %36 : vector<64x128xf32>
    %c1_i32 = arith.constant 1 : i32
    %38 = arith.addi %0, %c1_i32 : i32
    %c0_36 = arith.constant 0 : index
    %c0_37 = arith.constant 0 : index
    %39 = arith.index_cast %38 : i32 to index
    %c0_38 = arith.constant 0 : index
    %c0_39 = arith.constant 0 : index
    %40 = vector.load %arg2[%c0_36, %c0_37, %39, %c0_38, %c0_39] : memref<4x1x9x9x128xbf16, #tpu.memory_space<vmem>>, vector<1x1x8x8x128xbf16>
    %41 = vector.shape_cast %40 : vector<1x1x8x8x128xbf16> to vector<8x8x128xbf16>
    %c1_i32_40 = arith.constant 1 : i32
    %42 = arith.addi %0, %c1_i32_40 : i32
    %c1_41 = arith.constant 1 : index
    %c0_42 = arith.constant 0 : index
    %43 = arith.index_cast %42 : i32 to index
    %c0_43 = arith.constant 0 : index
    %c0_44 = arith.constant 0 : index
    %44 = vector.load %arg2[%c1_41, %c0_42, %43, %c0_43, %c0_44] : memref<4x1x9x9x128xbf16, #tpu.memory_space<vmem>>, vector<1x1x8x8x128xbf16>
    %45 = vector.shape_cast %44 : vector<1x1x8x8x128xbf16> to vector<8x8x128xbf16>
    %c1_i32_45 = arith.constant 1 : i32
    %46 = arith.addi %0, %c1_i32_45 : i32
    %c0_46 = arith.constant 0 : index
    %c0_47 = arith.constant 0 : index
    %47 = arith.index_cast %46 : i32 to index
    %c1_48 = arith.constant 1 : index
    %c0_49 = arith.constant 0 : index
    %48 = vector.load %arg2[%c0_46, %c0_47, %47, %c1_48, %c0_49] : memref<4x1x9x9x128xbf16, #tpu.memory_space<vmem>>, vector<1x1x8x8x128xbf16>
    %49 = vector.shape_cast %48 : vector<1x1x8x8x128xbf16> to vector<8x8x128xbf16>
    %50 = tpu.concatenate %41, %45, %49 in 2 : vector<8x8x128xbf16>, vector<8x8x128xbf16>, vector<8x8x128xbf16> -> vector<8x8x384xbf16>
    %51 = vector.shape_cast %50 : vector<8x8x384xbf16> to vector<64x384xbf16>
    %c2_50 = arith.constant 2 : index
    %c0_51 = arith.constant 0 : index
    %c0_52 = arith.constant 0 : index
    %52 = vector.load %arg3[%c2_50, %c0_51, %c0_52] : memref<3x384x128xbf16, #tpu.memory_space<vmem>>, vector<1x384x128xbf16>
    %53 = vector.shape_cast %52 : vector<1x384x128xbf16> to vector<384x128xbf16>
    %cst_53 = arith.constant dense<0.000000e+00> : vector<64x128xf32>
    %54 = tpu.matmul %51, %53, %cst_53 {dimension_numbers = #tpu.dot_dimension_numbers<[1], [0], [0], [1], [0, 0, 1, 1], [], []>} : vector<64x384xbf16>, vector<384x128xbf16>, vector<64x128xf32> -> vector<64x128xf32>
    %55 = arith.addf %37, %54 : vector<64x128xf32>
    %c0_54 = arith.constant 0 : index
    %c0_55 = arith.constant 0 : index
    %56 = vector.load %arg4[%c0_54, %c0_55] : memref<1x128xf32, #tpu.memory_space<vmem>>, vector<1x128xf32>
    %57 = vector.broadcast %56 : vector<1x128xf32> to vector<64x128xf32>
    %58 = arith.addf %55, %57 : vector<64x128xf32>
    %cst_56 = arith.constant 0.000000e+00 : f32
    %59 = vector.broadcast %cst_56 : f32 to vector<64x128xf32>
    %60 = arith.maximumf %58, %59 : vector<64x128xf32>
    %61 = vector.shape_cast %60 : vector<64x128xf32> to vector<8x8x128xf32>
    %62 = arith.truncf %61 : vector<8x8x128xf32> to vector<8x8x128xbf16>
    %c1_57 = arith.constant 1 : index
    %c1_58 = arith.constant 1 : index
    %c0_59 = arith.constant 0 : index
    %63 = vector.load %arg10[%c1_57, %c1_58, %c0_59] : memref<10x10x128xbf16, #tpu.memory_space<vmem>>, vector<8x8x128xbf16>
    tpu.vector_store %arg10[%c1_57, %c1_58, %c0_59], %62 {strides = array<i32>} : memref<10x10x128xbf16, #tpu.memory_space<vmem>>, vector<8x8x128xbf16>,
    %c0_i32_60 = arith.constant 0 : i32
    %64 = arith.cmpi sgt, %arg1, %c0_i32_60 : i32
    %65 = arith.extui %64 : i1 to i32
    %c0_i32_61 = arith.constant 0 : i32
    %66 = arith.cmpi ne, %65, %c0_i32_61 : i32
    scf.if %66 {
      %c1_i32_100 = arith.constant 1 : i32
      %117 = arith.subi %0, %c1_i32_100 : i32
      %c0_i32_101 = arith.constant 0 : i32
      %118 = arith.addi %117, %c0_i32_101 : i32
      %c0_102 = arith.constant 0 : index
      %c0_103 = arith.constant 0 : index
      %119 = arith.index_cast %118 : i32 to index
      %c0_104 = arith.constant 0 : index
      %c0_105 = arith.constant 0 : index
      %120 = vector.load %arg2[%c0_102, %c0_103, %119, %c0_104, %c0_105] : memref<4x1x9x9x128xbf16, #tpu.memory_space<vmem>>, vector<1x1x1x8x128xbf16>
      %121 = vector.shape_cast %120 : vector<1x1x1x8x128xbf16> to vector<1x8x128xbf16>
      %c0_i32_106 = arith.constant 0 : i32
      %122 = arith.addi %117, %c0_i32_106 : i32
      %c1_107 = arith.constant 1 : index
      %c0_108 = arith.constant 0 : index
      %123 = arith.index_cast %122 : i32 to index
      %c0_109 = arith.constant 0 : index
      %c0_110 = arith.constant 0 : index
      %124 = vector.load %arg2[%c1_107, %c0_108, %123, %c0_109, %c0_110] : memref<4x1x9x9x128xbf16, #tpu.memory_space<vmem>>, vector<1x1x1x8x128xbf16>
      %125 = vector.shape_cast %124 : vector<1x1x1x8x128xbf16> to vector<1x8x128xbf16>
      %c0_i32_111 = arith.constant 0 : i32
      %126 = arith.addi %117, %c0_i32_111 : i32
      %c0_112 = arith.constant 0 : index
      %c0_113 = arith.constant 0 : index
      %127 = arith.index_cast %126 : i32 to index
      %c1_114 = arith.constant 1 : index
      %c0_115 = arith.constant 0 : index
      %128 = vector.load %arg2[%c0_112, %c0_113, %127, %c1_114, %c0_115] : memref<4x1x9x9x128xbf16, #tpu.memory_space<vmem>>, vector<1x1x1x8x128xbf16>
      %129 = vector.shape_cast %128 : vector<1x1x1x8x128xbf16> to vector<1x8x128xbf16>
      %130 = tpu.concatenate %121, %125, %129 in 2 : vector<1x8x128xbf16>, vector<1x8x128xbf16>, vector<1x8x128xbf16> -> vector<1x8x384xbf16>
      %131 = vector.shape_cast %130 : vector<1x8x384xbf16> to vector<8x384xbf16>
      %c0_116 = arith.constant 0 : index
      %c0_117 = arith.constant 0 : index
      %c0_118 = arith.constant 0 : index
      %132 = vector.load %arg3[%c0_116, %c0_117, %c0_118] : memref<3x384x128xbf16, #tpu.memory_space<vmem>>, vector<1x384x128xbf16>
      %133 = vector.shape_cast %132 : vector<1x384x128xbf16> to vector<384x128xbf16>
      %cst_119 = arith.constant dense<0.000000e+00> : vector<8x128xf32>
      %134 = tpu.matmul %131, %133, %cst_119 {dimension_numbers = #tpu.dot_dimension_numbers<[1], [0], [0], [1], [0, 0, 1, 1], [], []>} : vector<8x384xbf16>, vector<384x128xbf16>, vector<8x128xf32> -> vector<8x128xf32>
      %c0_i32_120 = arith.constant 0 : i32
      %135 = arith.addi %117, %c0_i32_120 : i32
      %c2_121 = arith.constant 2 : index
      %c0_122 = arith.constant 0 : index
      %136 = arith.index_cast %135 : i32 to index
      %c0_123 = arith.constant 0 : index
      %c0_124 = arith.constant 0 : index
      %137 = vector.load %arg2[%c2_121, %c0_122, %136, %c0_123, %c0_124] : memref<4x1x9x9x128xbf16, #tpu.memory_space<vmem>>, vector<1x1x1x8x128xbf16>
      %138 = vector.shape_cast %137 : vector<1x1x1x8x128xbf16> to vector<1x8x128xbf16>
      %c0_i32_125 = arith.constant 0 : i32
      %139 = arith.addi %117, %c0_i32_125 : i32
      %c3_126 = arith.constant 3 : index
      %c0_127 = arith.constant 0 : index
      %140 = arith.index_cast %139 : i32 to index
      %c0_128 = arith.constant 0 : index
      %c0_129 = arith.constant 0 : index
      %141 = vector.load %arg2[%c3_126, %c0_127, %140, %c0_128, %c0_129] : memref<4x1x9x9x128xbf16, #tpu.memory_space<vmem>>, vector<1x1x1x8x128xbf16>
      %142 = vector.shape_cast %141 : vector<1x1x1x8x128xbf16> to vector<1x8x128xbf16>
      %c0_i32_130 = arith.constant 0 : i32
      %143 = arith.addi %117, %c0_i32_130 : i32
      %c2_131 = arith.constant 2 : index
      %c0_132 = arith.constant 0 : index
      %144 = arith.index_cast %143 : i32 to index
      %c1_133 = arith.constant 1 : index
      %c0_134 = arith.constant 0 : index
      %145 = vector.load %arg2[%c2_131, %c0_132, %144, %c1_133, %c0_134] : memref<4x1x9x9x128xbf16, #tpu.memory_space<vmem>>, vector<1x1x1x8x128xbf16>
      %146 = vector.shape_cast %145 : vector<1x1x1x8x128xbf16> to vector<1x8x128xbf16>
      %147 = tpu.concatenate %138, %142, %146 in 2 : vector<1x8x128xbf16>, vector<1x8x128xbf16>, vector<1x8x128xbf16> -> vector<1x8x384xbf16>
      %148 = vector.shape_cast %147 : vector<1x8x384xbf16> to vector<8x384xbf16>
      %c1_135 = arith.constant 1 : index
      %c0_136 = arith.constant 0 : index
      %c0_137 = arith.constant 0 : index
      %149 = vector.load %arg3[%c1_135, %c0_136, %c0_137] : memref<3x384x128xbf16, #tpu.memory_space<vmem>>, vector<1x384x128xbf16>
      %150 = vector.shape_cast %149 : vector<1x384x128xbf16> to vector<384x128xbf16>
      %cst_138 = arith.constant dense<0.000000e+00> : vector<8x128xf32>
      %151 = tpu.matmul %148, %150, %cst_138 {dimension_numbers = #tpu.dot_dimension_numbers<[1], [0], [0], [1], [0, 0, 1, 1], [], []>} : vector<8x384xbf16>, vector<384x128xbf16>, vector<8x128xf32> -> vector<8x128xf32>
      %152 = arith.addf %134, %151 : vector<8x128xf32>
      %c1_i32_139 = arith.constant 1 : i32
      %153 = arith.addi %117, %c1_i32_139 : i32
      %c0_140 = arith.constant 0 : index
      %c0_141 = arith.constant 0 : index
      %154 = arith.index_cast %153 : i32 to index
      %c0_142 = arith.constant 0 : index
      %c0_143 = arith.constant 0 : index
      %155 = vector.load %arg2[%c0_140, %c0_141, %154, %c0_142, %c0_143] : memref<4x1x9x9x128xbf16, #tpu.memory_space<vmem>>, vector<1x1x1x8x128xbf16>
      %156 = vector.shape_cast %155 : vector<1x1x1x8x128xbf16> to vector<1x8x128xbf16>
      %c1_i32_144 = arith.constant 1 : i32
      %157 = arith.addi %117, %c1_i32_144 : i32
      %c1_145 = arith.constant 1 : index
      %c0_146 = arith.constant 0 : index
      %158 = arith.index_cast %157 : i32 to index
      %c0_147 = arith.constant 0 : index
      %c0_148 = arith.constant 0 : index
      %159 = vector.load %arg2[%c1_145, %c0_146, %158, %c0_147, %c0_148] : memref<4x1x9x9x128xbf16, #tpu.memory_space<vmem>>, vector<1x1x1x8x128xbf16>
      %160 = vector.shape_cast %159 : vector<1x1x1x8x128xbf16> to vector<1x8x128xbf16>
      %c1_i32_149 = arith.constant 1 : i32
      %161 = arith.addi %117, %c1_i32_149 : i32
      %c0_150 = arith.constant 0 : index
      %c0_151 = arith.constant 0 : index
      %162 = arith.index_cast %161 : i32 to index
      %c1_152 = arith.constant 1 : index
      %c0_153 = arith.constant 0 : index
      %163 = vector.load %arg2[%c0_150, %c0_151, %162, %c1_152, %c0_153] : memref<4x1x9x9x128xbf16, #tpu.memory_space<vmem>>, vector<1x1x1x8x128xbf16>
      %164 = vector.shape_cast %163 : vector<1x1x1x8x128xbf16> to vector<1x8x128xbf16>
      %165 = tpu.concatenate %156, %160, %164 in 2 : vector<1x8x128xbf16>, vector<1x8x128xbf16>, vector<1x8x128xbf16> -> vector<1x8x384xbf16>
      %166 = vector.shape_cast %165 : vector<1x8x384xbf16> to vector<8x384xbf16>
      %c2_154 = arith.constant 2 : index
      %c0_155 = arith.constant 0 : index
      %c0_156 = arith.constant 0 : index
      %167 = vector.load %arg3[%c2_154, %c0_155, %c0_156] : memref<3x384x128xbf16, #tpu.memory_space<vmem>>, vector<1x384x128xbf16>
      %168 = vector.shape_cast %167 : vector<1x384x128xbf16> to vector<384x128xbf16>
      %cst_157 = arith.constant dense<0.000000e+00> : vector<8x128xf32>
      %169 = tpu.matmul %166, %168, %cst_157 {dimension_numbers = #tpu.dot_dimension_numbers<[1], [0], [0], [1], [0, 0, 1, 1], [], []>} : vector<8x384xbf16>, vector<384x128xbf16>, vector<8x128xf32> -> vector<8x128xf32>
      %170 = arith.addf %152, %169 : vector<8x128xf32>
      %c0_158 = arith.constant 0 : index
      %c0_159 = arith.constant 0 : index
      %171 = vector.load %arg4[%c0_158, %c0_159] : memref<1x128xf32, #tpu.memory_space<vmem>>, vector<1x128xf32>
      %172 = vector.broadcast %171 : vector<1x128xf32> to vector<8x128xf32>
      %173 = arith.addf %170, %172 : vector<8x128xf32>
      %cst_160 = arith.constant 0.000000e+00 : f32
      %174 = vector.broadcast %cst_160 : f32 to vector<8x128xf32>
      %175 = arith.maximumf %173, %174 : vector<8x128xf32>
      %176 = vector.shape_cast %175 : vector<8x128xf32> to vector<1x8x128xf32>
      %177 = arith.truncf %176 : vector<1x8x128xf32> to vector<1x8x128xbf16>
      %c0_161 = arith.constant 0 : index
      %c1_162 = arith.constant 1 : index
      %c0_163 = arith.constant 0 : index
      %178 = vector.load %arg10[%c0_161, %c1_162, %c0_163] : memref<10x10x128xbf16, #tpu.memory_space<vmem>>, vector<1x8x128xbf16>
      tpu.vector_store %arg10[%c0_161, %c1_162, %c0_163], %177 {strides = array<i32>} : memref<10x10x128xbf16, #tpu.memory_space<vmem>>, vector<1x8x128xbf16>,
    } else {
    }
    %c0_i32_62 = arith.constant 0 : i32
    %67 = arith.cmpi slt, %arg1, %c0_i32_62 : i32
    %68 = arith.extui %67 : i1 to i32
    %c0_i32_63 = arith.constant 0 : i32
    %69 = arith.cmpi ne, %68, %c0_i32_63 : i32
    scf.if %69 {
      %c8_i32_100 = arith.constant 8 : i32
      %117 = arith.addi %0, %c8_i32_100 : i32
      %c0_i32_101 = arith.constant 0 : i32
      %118 = arith.addi %117, %c0_i32_101 : i32
      %c0_102 = arith.constant 0 : index
      %c0_103 = arith.constant 0 : index
      %119 = arith.index_cast %118 : i32 to index
      %c0_104 = arith.constant 0 : index
      %c0_105 = arith.constant 0 : index
      %120 = vector.load %arg2[%c0_102, %c0_103, %119, %c0_104, %c0_105] : memref<4x1x9x9x128xbf16, #tpu.memory_space<vmem>>, vector<1x1x1x8x128xbf16>
      %121 = vector.shape_cast %120 : vector<1x1x1x8x128xbf16> to vector<1x8x128xbf16>
      %c0_i32_106 = arith.constant 0 : i32
      %122 = arith.addi %117, %c0_i32_106 : i32
      %c1_107 = arith.constant 1 : index
      %c0_108 = arith.constant 0 : index
      %123 = arith.index_cast %122 : i32 to index
      %c0_109 = arith.constant 0 : index
      %c0_110 = arith.constant 0 : index
      %124 = vector.load %arg2[%c1_107, %c0_108, %123, %c0_109, %c0_110] : memref<4x1x9x9x128xbf16, #tpu.memory_space<vmem>>, vector<1x1x1x8x128xbf16>
      %125 = vector.shape_cast %124 : vector<1x1x1x8x128xbf16> to vector<1x8x128xbf16>
      %c0_i32_111 = arith.constant 0 : i32
      %126 = arith.addi %117, %c0_i32_111 : i32
      %c0_112 = arith.constant 0 : index
      %c0_113 = arith.constant 0 : index
      %127 = arith.index_cast %126 : i32 to index
      %c1_114 = arith.constant 1 : index
      %c0_115 = arith.constant 0 : index
      %128 = vector.load %arg2[%c0_112, %c0_113, %127, %c1_114, %c0_115] : memref<4x1x9x9x128xbf16, #tpu.memory_space<vmem>>, vector<1x1x1x8x128xbf16>
      %129 = vector.shape_cast %128 : vector<1x1x1x8x128xbf16> to vector<1x8x128xbf16>
      %130 = tpu.concatenate %121, %125, %129 in 2 : vector<1x8x128xbf16>, vector<1x8x128xbf16>, vector<1x8x128xbf16> -> vector<1x8x384xbf16>
      %131 = vector.shape_cast %130 : vector<1x8x384xbf16> to vector<8x384xbf16>
      %c0_116 = arith.constant 0 : index
      %c0_117 = arith.constant 0 : index
      %c0_118 = arith.constant 0 : index
      %132 = vector.load %arg3[%c0_116, %c0_117, %c0_118] : memref<3x384x128xbf16, #tpu.memory_space<vmem>>, vector<1x384x128xbf16>
      %133 = vector.shape_cast %132 : vector<1x384x128xbf16> to vector<384x128xbf16>
      %cst_119 = arith.constant dense<0.000000e+00> : vector<8x128xf32>
      %134 = tpu.matmul %131, %133, %cst_119 {dimension_numbers = #tpu.dot_dimension_numbers<[1], [0], [0], [1], [0, 0, 1, 1], [], []>} : vector<8x384xbf16>, vector<384x128xbf16>, vector<8x128xf32> -> vector<8x128xf32>
      %c0_i32_120 = arith.constant 0 : i32
      %135 = arith.addi %117, %c0_i32_120 : i32
      %c2_121 = arith.constant 2 : index
      %c0_122 = arith.constant 0 : index
      %136 = arith.index_cast %135 : i32 to index
      %c0_123 = arith.constant 0 : index
      %c0_124 = arith.constant 0 : index
      %137 = vector.load %arg2[%c2_121, %c0_122, %136, %c0_123, %c0_124] : memref<4x1x9x9x128xbf16, #tpu.memory_space<vmem>>, vector<1x1x1x8x128xbf16>
      %138 = vector.shape_cast %137 : vector<1x1x1x8x128xbf16> to vector<1x8x128xbf16>
      %c0_i32_125 = arith.constant 0 : i32
      %139 = arith.addi %117, %c0_i32_125 : i32
      %c3_126 = arith.constant 3 : index
      %c0_127 = arith.constant 0 : index
      %140 = arith.index_cast %139 : i32 to index
      %c0_128 = arith.constant 0 : index
      %c0_129 = arith.constant 0 : index
      %141 = vector.load %arg2[%c3_126, %c0_127, %140, %c0_128, %c0_129] : memref<4x1x9x9x128xbf16, #tpu.memory_space<vmem>>, vector<1x1x1x8x128xbf16>
      %142 = vector.shape_cast %141 : vector<1x1x1x8x128xbf16> to vector<1x8x128xbf16>
      %c0_i32_130 = arith.constant 0 : i32
      %143 = arith.addi %117, %c0_i32_130 : i32
      %c2_131 = arith.constant 2 : index
      %c0_132 = arith.constant 0 : index
      %144 = arith.index_cast %143 : i32 to index
      %c1_133 = arith.constant 1 : index
      %c0_134 = arith.constant 0 : index
      %145 = vector.load %arg2[%c2_131, %c0_132, %144, %c1_133, %c0_134] : memref<4x1x9x9x128xbf16, #tpu.memory_space<vmem>>, vector<1x1x1x8x128xbf16>
      %146 = vector.shape_cast %145 : vector<1x1x1x8x128xbf16> to vector<1x8x128xbf16>
      %147 = tpu.concatenate %138, %142, %146 in 2 : vector<1x8x128xbf16>, vector<1x8x128xbf16>, vector<1x8x128xbf16> -> vector<1x8x384xbf16>
      %148 = vector.shape_cast %147 : vector<1x8x384xbf16> to vector<8x384xbf16>
      %c1_135 = arith.constant 1 : index
      %c0_136 = arith.constant 0 : index
      %c0_137 = arith.constant 0 : index
      %149 = vector.load %arg3[%c1_135, %c0_136, %c0_137] : memref<3x384x128xbf16, #tpu.memory_space<vmem>>, vector<1x384x128xbf16>
      %150 = vector.shape_cast %149 : vector<1x384x128xbf16> to vector<384x128xbf16>
      %cst_138 = arith.constant dense<0.000000e+00> : vector<8x128xf32>
      %151 = tpu.matmul %148, %150, %cst_138 {dimension_numbers = #tpu.dot_dimension_numbers<[1], [0], [0], [1], [0, 0, 1, 1], [], []>} : vector<8x384xbf16>, vector<384x128xbf16>, vector<8x128xf32> -> vector<8x128xf32>
      %152 = arith.addf %134, %151 : vector<8x128xf32>
      %c1_i32_139 = arith.constant 1 : i32
      %153 = arith.addi %117, %c1_i32_139 : i32
      %c0_140 = arith.constant 0 : index
      %c0_141 = arith.constant 0 : index
      %154 = arith.index_cast %153 : i32 to index
      %c0_142 = arith.constant 0 : index
      %c0_143 = arith.constant 0 : index
      %155 = vector.load %arg2[%c0_140, %c0_141, %154, %c0_142, %c0_143] : memref<4x1x9x9x128xbf16, #tpu.memory_space<vmem>>, vector<1x1x1x8x128xbf16>
      %156 = vector.shape_cast %155 : vector<1x1x1x8x128xbf16> to vector<1x8x128xbf16>
      %c1_i32_144 = arith.constant 1 : i32
      %157 = arith.addi %117, %c1_i32_144 : i32
      %c1_145 = arith.constant 1 : index
      %c0_146 = arith.constant 0 : index
      %158 = arith.index_cast %157 : i32 to index
      %c0_147 = arith.constant 0 : index
      %c0_148 = arith.constant 0 : index
      %159 = vector.load %arg2[%c1_145, %c0_146, %158, %c0_147, %c0_148] : memref<4x1x9x9x128xbf16, #tpu.memory_space<vmem>>, vector<1x1x1x8x128xbf16>
      %160 = vector.shape_cast %159 : vector<1x1x1x8x128xbf16> to vector<1x8x128xbf16>
      %c1_i32_149 = arith.constant 1 : i32
      %161 = arith.addi %117, %c1_i32_149 : i32
      %c0_150 = arith.constant 0 : index
      %c0_151 = arith.constant 0 : index
      %162 = arith.index_cast %161 : i32 to index
      %c1_152 = arith.constant 1 : index
      %c0_153 = arith.constant 0 : index
      %163 = vector.load %arg2[%c0_150, %c0_151, %162, %c1_152, %c0_153] : memref<4x1x9x9x128xbf16, #tpu.memory_space<vmem>>, vector<1x1x1x8x128xbf16>
      %164 = vector.shape_cast %163 : vector<1x1x1x8x128xbf16> to vector<1x8x128xbf16>
      %165 = tpu.concatenate %156, %160, %164 in 2 : vector<1x8x128xbf16>, vector<1x8x128xbf16>, vector<1x8x128xbf16> -> vector<1x8x384xbf16>
      %166 = vector.shape_cast %165 : vector<1x8x384xbf16> to vector<8x384xbf16>
      %c2_154 = arith.constant 2 : index
      %c0_155 = arith.constant 0 : index
      %c0_156 = arith.constant 0 : index
      %167 = vector.load %arg3[%c2_154, %c0_155, %c0_156] : memref<3x384x128xbf16, #tpu.memory_space<vmem>>, vector<1x384x128xbf16>
      %168 = vector.shape_cast %167 : vector<1x384x128xbf16> to vector<384x128xbf16>
      %cst_157 = arith.constant dense<0.000000e+00> : vector<8x128xf32>
      %169 = tpu.matmul %166, %168, %cst_157 {dimension_numbers = #tpu.dot_dimension_numbers<[1], [0], [0], [1], [0, 0, 1, 1], [], []>} : vector<8x384xbf16>, vector<384x128xbf16>, vector<8x128xf32> -> vector<8x128xf32>
      %170 = arith.addf %152, %169 : vector<8x128xf32>
      %c0_158 = arith.constant 0 : index
      %c0_159 = arith.constant 0 : index
      %171 = vector.load %arg4[%c0_158, %c0_159] : memref<1x128xf32, #tpu.memory_space<vmem>>, vector<1x128xf32>
      %172 = vector.broadcast %171 : vector<1x128xf32> to vector<8x128xf32>
      %173 = arith.addf %170, %172 : vector<8x128xf32>
      %cst_160 = arith.constant 0.000000e+00 : f32
      %174 = vector.broadcast %cst_160 : f32 to vector<8x128xf32>
      %175 = arith.maximumf %173, %174 : vector<8x128xf32>
      %176 = vector.shape_cast %175 : vector<8x128xf32> to vector<1x8x128xf32>
      %177 = arith.truncf %176 : vector<1x8x128xf32> to vector<1x8x128xbf16>
      %c9 = arith.constant 9 : index
      %c1_161 = arith.constant 1 : index
      %c0_162 = arith.constant 0 : index
      %178 = vector.load %arg10[%c9, %c1_161, %c0_162] : memref<10x10x128xbf16, #tpu.memory_space<vmem>>, vector<1x8x128xbf16>
      tpu.vector_store %arg10[%c9, %c1_161, %c0_162], %177 {strides = array<i32>} : memref<10x10x128xbf16, #tpu.memory_space<vmem>>, vector<1x8x128xbf16>,
    } else {
    }
    %c0_64 = arith.constant 0 : index
    %c0_65 = arith.constant 0 : index
    %c0_66 = arith.constant 0 : index
    %70 = vector.load %arg10[%c0_64, %c0_65, %c0_66] : memref<10x10x128xbf16, #tpu.memory_space<vmem>>, vector<8x10x128xbf16>
    %71 = vector.extract_strided_slice %70 {offsets = [0, 0, 0], sizes = [8, 8, 128], strides = [1, 1, 1]} : vector<8x10x128xbf16> to vector<8x8x128xbf16>
    %72 = vector.extract_strided_slice %70 {offsets = [0, 1, 0], sizes = [8, 8, 128], strides = [1, 1, 1]} : vector<8x10x128xbf16> to vector<8x8x128xbf16>
    %73 = vector.extract_strided_slice %70 {offsets = [0, 2, 0], sizes = [8, 8, 128], strides = [1, 1, 1]} : vector<8x10x128xbf16> to vector<8x8x128xbf16>
    %74 = tpu.concatenate %71, %72, %73 in 2 : vector<8x8x128xbf16>, vector<8x8x128xbf16>, vector<8x8x128xbf16> -> vector<8x8x384xbf16>
    %75 = vector.shape_cast %74 : vector<8x8x384xbf16> to vector<64x384xbf16>
    %c0_67 = arith.constant 0 : index
    %c0_68 = arith.constant 0 : index
    %c0_69 = arith.constant 0 : index
    %76 = vector.load %arg5[%c0_67, %c0_68, %c0_69] : memref<3x384x128xbf16, #tpu.memory_space<vmem>>, vector<1x384x128xbf16>
    %77 = vector.shape_cast %76 : vector<1x384x128xbf16> to vector<384x128xbf16>
    %cst_70 = arith.constant dense<0.000000e+00> : vector<64x128xf32>
    %78 = tpu.matmul %75, %77, %cst_70 {dimension_numbers = #tpu.dot_dimension_numbers<[1], [0], [0], [1], [0, 0, 1, 1], [], []>} : vector<64x384xbf16>, vector<384x128xbf16>, vector<64x128xf32> -> vector<64x128xf32>
    %c1_71 = arith.constant 1 : index
    %c0_72 = arith.constant 0 : index
    %c0_73 = arith.constant 0 : index
    %79 = vector.load %arg10[%c1_71, %c0_72, %c0_73] : memref<10x10x128xbf16, #tpu.memory_space<vmem>>, vector<8x10x128xbf16>
    %80 = vector.extract_strided_slice %79 {offsets = [0, 0, 0], sizes = [8, 8, 128], strides = [1, 1, 1]} : vector<8x10x128xbf16> to vector<8x8x128xbf16>
    %81 = vector.extract_strided_slice %79 {offsets = [0, 1, 0], sizes = [8, 8, 128], strides = [1, 1, 1]} : vector<8x10x128xbf16> to vector<8x8x128xbf16>
    %82 = vector.extract_strided_slice %79 {offsets = [0, 2, 0], sizes = [8, 8, 128], strides = [1, 1, 1]} : vector<8x10x128xbf16> to vector<8x8x128xbf16>
    %83 = tpu.concatenate %80, %81, %82 in 2 : vector<8x8x128xbf16>, vector<8x8x128xbf16>, vector<8x8x128xbf16> -> vector<8x8x384xbf16>
    %84 = vector.shape_cast %83 : vector<8x8x384xbf16> to vector<64x384xbf16>
    %c1_74 = arith.constant 1 : index
    %c0_75 = arith.constant 0 : index
    %c0_76 = arith.constant 0 : index
    %85 = vector.load %arg5[%c1_74, %c0_75, %c0_76] : memref<3x384x128xbf16, #tpu.memory_space<vmem>>, vector<1x384x128xbf16>
    %86 = vector.shape_cast %85 : vector<1x384x128xbf16> to vector<384x128xbf16>
    %cst_77 = arith.constant dense<0.000000e+00> : vector<64x128xf32>
    %87 = tpu.matmul %84, %86, %cst_77 {dimension_numbers = #tpu.dot_dimension_numbers<[1], [0], [0], [1], [0, 0, 1, 1], [], []>} : vector<64x384xbf16>, vector<384x128xbf16>, vector<64x128xf32> -> vector<64x128xf32>
    %88 = arith.addf %78, %87 : vector<64x128xf32>
    %c2_78 = arith.constant 2 : index
    %c0_79 = arith.constant 0 : index
    %c0_80 = arith.constant 0 : index
    %89 = vector.load %arg10[%c2_78, %c0_79, %c0_80] : memref<10x10x128xbf16, #tpu.memory_space<vmem>>, vector<8x10x128xbf16>
    %90 = vector.extract_strided_slice %89 {offsets = [0, 0, 0], sizes = [8, 8, 128], strides = [1, 1, 1]} : vector<8x10x128xbf16> to vector<8x8x128xbf16>
    %91 = vector.extract_strided_slice %89 {offsets = [0, 1, 0], sizes = [8, 8, 128], strides = [1, 1, 1]} : vector<8x10x128xbf16> to vector<8x8x128xbf16>
    %92 = vector.extract_strided_slice %89 {offsets = [0, 2, 0], sizes = [8, 8, 128], strides = [1, 1, 1]} : vector<8x10x128xbf16> to vector<8x8x128xbf16>
    %93 = tpu.concatenate %90, %91, %92 in 2 : vector<8x8x128xbf16>, vector<8x8x128xbf16>, vector<8x8x128xbf16> -> vector<8x8x384xbf16>
    %94 = vector.shape_cast %93 : vector<8x8x384xbf16> to vector<64x384xbf16>
    %c2_81 = arith.constant 2 : index
    %c0_82 = arith.constant 0 : index
    %c0_83 = arith.constant 0 : index
    %95 = vector.load %arg5[%c2_81, %c0_82, %c0_83] : memref<3x384x128xbf16, #tpu.memory_space<vmem>>, vector<1x384x128xbf16>
    %96 = vector.shape_cast %95 : vector<1x384x128xbf16> to vector<384x128xbf16>
    %cst_84 = arith.constant dense<0.000000e+00> : vector<64x128xf32>
    %97 = tpu.matmul %94, %96, %cst_84 {dimension_numbers = #tpu.dot_dimension_numbers<[1], [0], [0], [1], [0, 0, 1, 1], [], []>} : vector<64x384xbf16>, vector<384x128xbf16>, vector<64x128xf32> -> vector<64x128xf32>
    %98 = arith.addf %88, %97 : vector<64x128xf32>
    %c0_85 = arith.constant 0 : index
    %c0_86 = arith.constant 0 : index
    %99 = vector.load %arg6[%c0_85, %c0_86] : memref<1x128xf32, #tpu.memory_space<vmem>>, vector<1x128xf32>
    %100 = vector.broadcast %99 : vector<1x128xf32> to vector<64x128xf32>
    %101 = arith.addf %98, %100 : vector<64x128xf32>
    %c3_87 = arith.constant 3 : index
    %c0_88 = arith.constant 0 : index
    %102 = arith.index_cast %0 : i32 to index
    %c0_89 = arith.constant 0 : index
    %c0_90 = arith.constant 0 : index
    %103 = vector.load %arg2[%c3_87, %c0_88, %102, %c0_89, %c0_90] : memref<4x1x9x9x128xbf16, #tpu.memory_space<vmem>>, vector<1x1x8x8x128xbf16>
    %104 = vector.shape_cast %103 : vector<1x1x8x8x128xbf16> to vector<8x8x128xbf16>
    %105 = vector.shape_cast %104 : vector<8x8x128xbf16> to vector<64x128xbf16>
    %c0_91 = arith.constant 0 : index
    %c0_92 = arith.constant 0 : index
    %106 = vector.load %arg7[%c0_91, %c0_92] : memref<128x128xbf16, #tpu.memory_space<vmem>>, vector<128x128xbf16>
    %cst_93 = arith.constant dense<0.000000e+00> : vector<64x128xf32>
    %107 = tpu.matmul %105, %106, %cst_93 {dimension_numbers = #tpu.dot_dimension_numbers<[1], [0], [0], [1], [0, 0, 1, 1], [], []>} : vector<64x128xbf16>, vector<128x128xbf16>, vector<64x128xf32> -> vector<64x128xf32>
    %c0_94 = arith.constant 0 : index
    %c0_95 = arith.constant 0 : index
    %108 = vector.load %arg8[%c0_94, %c0_95] : memref<1x128xf32, #tpu.memory_space<vmem>>, vector<1x128xf32>
    %109 = vector.broadcast %108 : vector<1x128xf32> to vector<64x128xf32>
    %110 = arith.addf %107, %109 : vector<64x128xf32>
    %111 = arith.addf %101, %110 : vector<64x128xf32>
    %cst_96 = arith.constant 0.000000e+00 : f32
    %112 = vector.broadcast %cst_96 : f32 to vector<64x128xf32>
    %113 = arith.maximumf %111, %112 : vector<64x128xf32>
    %114 = vector.shape_cast %113 : vector<64x128xf32> to vector<1x64x128xf32>
    %115 = arith.truncf %114 : vector<1x64x128xf32> to vector<1x64x128xbf16>
    %c0_97 = arith.constant 0 : index
    %c0_98 = arith.constant 0 : index
    %c0_99 = arith.constant 0 : index
    %116 = vector.load %arg9[%c0_97, %c0_98, %c0_99] : memref<1x64x128xbf16, #tpu.memory_space<vmem>>, vector<1x64x128xbf16>
    tpu.vector_store %arg9[%c0_97, %c0_98, %c0_99], %115 {strides = array<i32>} : memref<1x64x128xbf16, #tpu.memory_space<vmem>>, vector<1x64x128xbf16>,
    return
  }
  func.func @transform_0(%arg0: i32, %arg1: i32) -> (i32, i32, i32, i32, i32) {
    %c0_i32 = arith.constant 0 : i32
    %c0_i32_0 = arith.constant 0 : i32
    %c0_i32_1 = arith.constant 0 : i32
    %c0_i32_2 = arith.constant 0 : i32
    %c0_i32_3 = arith.constant 0 : i32
    return %c0_i32, %arg0, %c0_i32_0, %c0_i32_1, %c0_i32_2 : i32, i32, i32, i32, i32
  }
  func.func @transform_1(%arg0: i32, %arg1: i32) -> (i32, i32, i32) {
    %c0_i32 = arith.constant 0 : i32
    %c0_i32_0 = arith.constant 0 : i32
    %c0_i32_1 = arith.constant 0 : i32
    %c0_i32_2 = arith.constant 0 : i32
    return %c0_i32, %c0_i32_0, %c0_i32_1 : i32, i32, i32
  }
  func.func @transform_2(%arg0: i32, %arg1: i32) -> (i32, i32) {
    %c0_i32 = arith.constant 0 : i32
    %c0_i32_0 = arith.constant 0 : i32
    %c0_i32_1 = arith.constant 0 : i32
    return %c0_i32, %c0_i32_0 : i32, i32
  }
  func.func @transform_3(%arg0: i32, %arg1: i32) -> (i32, i32, i32) {
    %c0_i32 = arith.constant 0 : i32
    %c0_i32_0 = arith.constant 0 : i32
    %c0_i32_1 = arith.constant 0 : i32
    %c0_i32_2 = arith.constant 0 : i32
    return %c0_i32, %c0_i32_0, %c0_i32_1 : i32, i32, i32
  }
  func.func @transform_4(%arg0: i32, %arg1: i32) -> (i32, i32) {
    %c0_i32 = arith.constant 0 : i32
    %c0_i32_0 = arith.constant 0 : i32
    %c0_i32_1 = arith.constant 0 : i32
    return %c0_i32, %c0_i32_0 : i32, i32
  }
  func.func @transform_5(%arg0: i32, %arg1: i32) -> (i32, i32) {
    %c0_i32 = arith.constant 0 : i32
    %c0_i32_0 = arith.constant 0 : i32
    %c0_i32_1 = arith.constant 0 : i32
    return %c0_i32, %c0_i32_0 : i32, i32
  }
  func.func @transform_6(%arg0: i32, %arg1: i32) -> (i32, i32) {
    %c0_i32 = arith.constant 0 : i32
    %c0_i32_0 = arith.constant 0 : i32
    %c0_i32_1 = arith.constant 0 : i32
    return %c0_i32, %c0_i32_0 : i32, i32
  }
  func.func @transform_7(%arg0: i32, %arg1: i32) -> (i32, i32, i32) {
    %c0_i32 = arith.constant 0 : i32
    %c0_i32_0 = arith.constant 0 : i32
    return %arg0, %arg1, %c0_i32 : i32, i32, i32
  }
}

</mosaic_0001>

<bundles_post_ra>
// kernel: residual_block_forward.1
= control target key start
LH: loop header
LB: loop body
LE: loop exit
PB: predicated region body
PF: predicated region fallthrough
CT: control target
= control target key end

     0   :  { %s7653_s24 = smov 0   ;;  %s7655_s25 = smov 0   ;;  %s8838_s0 = inlined_call_operand.vmem [shape: bf16[4,2,9,9,128], index: 0, kind: input, shape index: {}]   ;;  %s8839_s1 = inlined_call_operand.vmem [shape: bf16[3,384,128], index: 1, kind: input, shape index: {}]   ;;  %s8840_s2 = inlined_call_operand.vmem [shape: f32[1,128], index: 2, kind: input, shape index: {}]   ;;  %s8841_s3 = inlined_call_operand.vmem [shape: bf16[3,384,128], index: 3, kind: input, shape index: {}]   ;;  %s8842_s4 = inlined_call_operand.vmem [shape: f32[1,128], index: 4, kind: input, shape index: {}]   ;;  %s8843_s5 = inlined_call_operand.vmem [shape: bf16[128,128], index: 5, kind: input, shape index: {}]   ;;  %s8844_s6 = inlined_call_operand.vmem [shape: f32[1,128], index: 6, kind: input, shape index: {}]   ;;  %s8845_s7 = inlined_call_operand.vmem [shape: bf16[2,64,128], index: 7, kind: output, shape index: {}]  }
   0x1   :  { %s7657_s26 = smov 0   ;;  %s7659_s27 = smov 0  }
   0x2   :  { %s7661_s28 = smov 0  }
   0x3 LB: > { %s29_s29 = sadd.s32 1, %s7606_s27  ;;  %p43_p1 = scmp.ne.s32.totalorder %s7598_s25, %s7594_s24  ;;  %s7610_s28 = sphi %s7661_s28, %s17_s28   ;;  %s7606_s27 = sphi %s7659_s27, %s8853_s27   ;;  %s7602_s26 = sphi %s7657_s26, %s8852_s26   ;;  %s7598_s25 = sphi %s7655_s25, %s8851_s25   ;;  %s7594_s24 = sphi %s7653_s24, %s8850_s24  }
   0x4   : > { %p31_p0 = scmp.ge.s32.totalorder %s29_s29, 2  ;;  %p44_p2 = scmp.eq.s32.totalorder %s7610_s28, 0 }
   0x5   : > { %s36_s8 = sadd.s32 1, %s7598_s25  ;;  %p5413_p5 = scmp.ge.s32.totalorder %s7610_s28, 2 }
   0x6   : > { %s8855_s29 = smov (%p31_p0, %s29_s29), 0  ;;  %p45_p3 = por %p44_p2, %p43_p1 }
   0x7   : > { %s33_s30 = ssub.s32 %s7606_s27, %s8855_s29  ;;  %241 = sbr.rel (%p5413_p5) target bundleno = 53 (0x35), region = 40 }
   0x8   : > { %p34_p4 = scmp.eq.s32.totalorder %s33_s30, 0 }
   0xa   : > { %s7688_s9 = scalar_select %p34_p4, %s7598_s25, %s36_s8  }
   0xc   : > { %244 = sbr.rel (!%p45_p3) target bundleno = 53 (0x35), region = 44  ;;  %s246_s10 = sand.u32 (%p45_p3), 1, %s7598_s25  }
   0xd   : > { %s7526_s11 = smul.u32 (%p45_p3), 72, %s7606_s27 }
   0xe   : > { %s7525_s12 = smul.u32 (%p45_p3), 288, %s246_s10 }
   0xf   : > { %s7696_s15 = scalar_lea.vmem (%p45_p3), %s8838_s0, %s7526_s11 }
  0x10   : > { %v268_v0 = vld [vmem:[%s7696_s15] sm:$0xff] (%p45_p3)   ;;  %v272_v1 = vld [vmem:[%s7696_s15 + $0x8] sm:$0xff] (%p45_p3)   ;;  %v276_v2 = vld [vmem:[%s7696_s15 + $0x10] sm:$0xff] (%p45_p3)   ;;  %s7701_s16 = scalar_lea.vmem (%p45_p3), [#allocation3], %s7525_s12 }
  0x11   : > { %269 = vst [vmem:[%s7701_s16] sm:$0xff] %v268_v0   ;;  %v280_v3 = vld [vmem:[%s7696_s15 + $0x18] sm:$0xff]   ;;  %v284_v4 = vld [vmem:[%s7696_s15 + $0x20] sm:$0xff]   ;;  %v288_v5 = vld [vmem:[%s7696_s15 + $0x28] sm:$0xff]  }
  0x12   : > { %273 = vst [vmem:[%s7701_s16 + $0x8] sm:$0xff] %v272_v1   ;;  %v292_v6 = vld [vmem:[%s7696_s15 + $0x30] sm:$0xff]   ;;  %v296_v7 = vld [vmem:[%s7696_s15 + $0x38] sm:$0xff]   ;;  %v300_v8 = vld [vmem:[%s7696_s15 + $0x40] sm:$0xff]  }
  0x13   : > { %277 = vst [vmem:[%s7701_s16 + $0x10] sm:$0xff] %v276_v2   ;;  %v304_v9 = vld [vmem:[%s7696_s15 + $0x90] sm:$0xff]   ;;  %v308_v10 = vld [vmem:[%s7696_s15 + $0x98] sm:$0xff]   ;;  %v312_v11 = vld [vmem:[%s7696_s15 + $0xa0] sm:$0xff]  }
  0x14   : > { %281 = vst [vmem:[%s7701_s16 + $0x18] sm:$0xff] %v280_v3   ;;  %v316_v12 = vld [vmem:[%s7696_s15 + $0xa8] sm:$0xff]   ;;  %v320_v13 = vld [vmem:[%s7696_s15 + $0xb0] sm:$0xff]   ;;  %v324_v14 = vld [vmem:[%s7696_s15 + $0xb8] sm:$0xff]  }
  0x15   : > { %285 = vst [vmem:[%s7701_s16 + $0x20] sm:$0xff] %v284_v4   ;;  %v328_v15 = vld [vmem:[%s7696_s15 + $0xc0] sm:$0xff]   ;;  %v332_v16 = vld [vmem:[%s7696_s15 + $0xc8] sm:$0xff]   ;;  %v336_v17 = vld [vmem:[%s7696_s15 + $0xd0] sm:$0xff]  }
  0x16   : > { %289 = vst [vmem:[%s7701_s16 + $0x28] sm:$0xff] %v288_v5   ;;  %v340_v18 = vld [vmem:[%s7696_s15 + $0x120] sm:$0xff]   ;;  %v344_v19 = vld [vmem:[%s7696_s15 + $0x128] sm:$0xff]   ;;  %v348_v20 = vld [vmem:[%s7696_s15 + $0x130] sm:$0xff]  }
  0x17   : > { %293 = vst [vmem:[%s7701_s16 + $0x30] sm:$0xff] %v292_v6   ;;  %v352_v21 = vld [vmem:[%s7696_s15 + $0x138] sm:$0xff]   ;;  %v356_v22 = vld [vmem:[%s7696_s15 + $0x140] sm:$0xff]   ;;  %v360_v23 = vld [vmem:[%s7696_s15 + $0x148] sm:$0xff]  }
  0x18   : > { %297 = vst [vmem:[%s7701_s16 + $0x38] sm:$0xff] %v296_v7   ;;  %v364_v24 = vld [vmem:[%s7696_s15 + $0x150] sm:$0xff]   ;;  %v368_v25 = vld [vmem:[%s7696_s15 + $0x158] sm:$0xff]   ;;  %v372_v26 = vld [vmem:[%s7696_s15 + $0x160] sm:$0xff]  }
  0x19   : > { %301 = vst [vmem:[%s7701_s16 + $0x40] sm:$0xff] %v300_v8   ;;  %v376_v27 = vld [vmem:[%s7696_s15 + $0x1b0] sm:$0xff]   ;;  %v380_v28 = vld [vmem:[%s7696_s15 + $0x1b8] sm:$0xff]   ;;  %v384_v29 = vld [vmem:[%s7696_s15 + $0x1c0] sm:$0xff]  }
  0x1a   : > { %305 = vst [vmem:[%s7701_s16 + $0x48] sm:$0xff] %v304_v9   ;;  %v388_v30 = vld [vmem:[%s7696_s15 + $0x1c8] sm:$0xff]   ;;  %v392_v31 = vld [vmem:[%s7696_s15 + $0x1d0] sm:$0xff]   ;;  %v396_v32 = vld [vmem:[%s7696_s15 + $0x1d8] sm:$0xff]  }
  0x1b   : > { %309 = vst [vmem:[%s7701_s16 + $0x50] sm:$0xff] %v308_v10   ;;  %v400_v33 = vld [vmem:[%s7696_s15 + $0x1e0] sm:$0xff]   ;;  %v404_v34 = vld [vmem:[%s7696_s15 + $0x1e8] sm:$0xff]   ;;  %v408_v35 = vld [vmem:[%s7696_s15 + $0x1f0] sm:$0xff]  }
  0x1c   : > { %313 = vst [vmem:[%s7701_s16 + $0x58] sm:$0xff] %v312_v11  }
  0x1d   : > { %317 = vst [vmem:[%s7701_s16 + $0x60] sm:$0xff] %v316_v12  }
  0x1e   : > { %321 = vst [vmem:[%s7701_s16 + $0x68] sm:$0xff] %v320_v13  }
  0x1f   : > { %325 = vst [vmem:[%s7701_s16 + $0x70] sm:$0xff] %v324_v14  }
  0x20   : > { %329 = vst [vmem:[%s7701_s16 + $0x78] sm:$0xff] %v328_v15  }
  0x21   : > { %333 = vst [vmem:[%s7701_s16 + $0x80] sm:$0xff] %v332_v16  }
  0x22   : > { %337 = vst [vmem:[%s7701_s16 + $0x88] sm:$0xff] %v336_v17  }
  0x23   : > { %341 = vst [vmem:[%s7701_s16 + $0x90] sm:$0xff] %v340_v18  }
  0x24   : > { %345 = vst [vmem:[%s7701_s16 + $0x98] sm:$0xff] %v344_v19  }
  0x25   : > { %349 = vst [vmem:[%s7701_s16 + $0xa0] sm:$0xff] %v348_v20  }
  0x26   : > { %353 = vst [vmem:[%s7701_s16 + $0xa8] sm:$0xff] %v352_v21  }
  0x27   : > { %357 = vst [vmem:[%s7701_s16 + $0xb0] sm:$0xff] %v356_v22  }
  0x28   : > { %361 = vst [vmem:[%s7701_s16 + $0xb8] sm:$0xff] %v360_v23  }
  0x29   : > { %365 = vst [vmem:[%s7701_s16 + $0xc0] sm:$0xff] %v364_v24  }
  0x2a   : > { %369 = vst [vmem:[%s7701_s16 + $0xc8] sm:$0xff] %v368_v25  }
  0x2b   : > { %373 = vst [vmem:[%s7701_s16 + $0xd0] sm:$0xff] %v372_v26  }
  0x2c   : > { %377 = vst [vmem:[%s7701_s16 + $0xd8] sm:$0xff] %v376_v27  }
  0x2d   : > { %381 = vst [vmem:[%s7701_s16 + $0xe0] sm:$0xff] %v380_v28  }
  0x2e   : > { %385 = vst [vmem:[%s7701_s16 + $0xe8] sm:$0xff] %v384_v29  }
  0x2f   : > { %389 = vst [vmem:[%s7701_s16 + $0xf0] sm:$0xff] %v388_v30  }
  0x30   : > { %393 = vst [vmem:[%s7701_s16 + $0xf8] sm:$0xff] %v392_v31  }
  0x31   : > { %397 = vst [vmem:[%s7701_s16 + $0x100] sm:$0xff] %v396_v32  }
  0x32   : > { %401 = vst [vmem:[%s7701_s16 + $0x108] sm:$0xff] %v400_v33  }
  0x33   : > { %405 = vst [vmem:[%s7701_s16 + $0x110] sm:$0xff] %v404_v34  }
  0x34   : > { %409 = vst [vmem:[%s7701_s16 + $0x118] sm:$0xff] %v408_v35  }
  0x35 PF: > { %p5415_p6 = scmp.ge.s32.totalorder %s7610_s28, 1  ;;  %p578_p7 = scmp.lt.s32.totalorder %s7610_s28, 3 }
  0x37   : > { %p579_p8 = pnand %p5415_p6, %p578_p7 }
  0x38   : > { %s585_s23 = sand.u32 (!%p579_p8), 1, %s7594_s24   ;;  %p621_p9 = scmp.lt.s32.totalorder (!%p579_p8), %s7602_s26, 1 }
  0x39   : > { %582 = sbr.rel (%p579_p8) target bundleno = 682 (0x2aa), region = 85 }
  0x3a   : > { %s7527_s30 = smul.u32 (!%p579_p8), 288, %s585_s23 }
  0x3c   : > { %s7802_s20 = scalar_lea.vmem (!%p579_p8), [#allocation3], %s7527_s30 }
  0x3e   : > { %v7199_v36 = vld [vmem:[%s8839_s1 + $0xf8] sm:$0xff]  ;;  %v7198_v39 = vld [vmem:[%s8839_s1 + $0xf0] sm:$0xff]  ;;  %v7197_v42 = vld [vmem:[%s8839_s1 + $0xe8] sm:$0xff]  ;;  %vm2131_vm0 = vcmask 1043456   ;;  %vm2132_vm1 = vsmask.f32 7938 }
  0x3f   : > { %v7207_v37 = vld [vmem:[%s8839_s1 + $0x138] sm:$0xff]  ;;  %1217 = vmatpush.bf16.msra.mxu0 %v7199_v36  ;;  %7501 = vmatpush.bf16.msra.mxu3 %v7199_v36  ;;  %v7206_v40 = vld [vmem:[%s8839_s1 + $0x130] sm:$0xff]  ;;  %v7205_v43 = vld [vmem:[%s8839_s1 + $0x128] sm:$0xff]  ;;  %vm2137_vm2 = vcmask 1040384   ;;  %vm2138_vm3 = vsmask.f32 256 }
  0x40   : > { %v7215_v38 = vld [vmem:[%s8839_s1 + $0x178] sm:$0xff]  ;;  %1246 = vmatpush.bf16.msra.mxu1 %v7207_v37  ;;  %v7214_v41 = vld [vmem:[%s8839_s1 + $0x170] sm:$0xff]  ;;  %v7213_v44 = vld [vmem:[%s8839_s1 + $0x168] sm:$0xff]  ;;  %s8857_s26 = smov (!%p621_p9, %s7602_s26), 1 }
  0x41   : > { %1275 = vmatpush.bf16.msra.mxu2 %v7215_v38  ;;  %v7805_v45 = vld [vmem:[%s7802_s20 + $0x90] sm:$0xf]  ;;  %v7808_v46 = vld [vmem:[%s7802_s20 + $0x98] sm:$0xf]  ;;  %v5442_v47 = vld [vmem:[%s7802_s20 + $0x94] sm:$0x1] }
  0x42   : > { %v5443_v48 = vld [vmem:[%s7802_s20 + $0x9c] sm:$0x1]  ;;  %v896_v49 = vunpack.c.l.b16 %v7805_v45  ;;  %v897_v50 = vunpack.c.l.b16 %v5442_v47  ;;  %v898_v51 = vunpack.c.l.b16 %v7808_v46  ;;  %v7196_v52 = vld [vmem:[%s8839_s1 + $0xe0] sm:$0xff]  ;;  %v7195_v58 = vld [vmem:[%s8839_s1 + $0xd8] sm:$0xff]  ;;  %s7159_s30 = sshll.u32 %s8857_s26, 5 }
  0x43   : > { %1218 = vmatpush.bf16.msra.mxu0 %v7198_v39  ;;  %7502 = vmatpush.bf16.msra.mxu3 %v7198_v39  ;;  %v899_v53 = vunpack.c.l.b16 %v5443_v48  ;;  %v7204_v54 = vld [vmem:[%s8839_s1 + $0x120] sm:$0xff]  ;;  %v7203_v61 = vld [vmem:[%s8839_s1 + $0x118] sm:$0xff]  ;;  %v7194_v63 = vld [vmem:[%s8839_s1 + $0xd0] sm:$0xff]  ;;  %s8797_s11 = scalar_lea.vmem %s8845_s7, %s7159_s30 }
  0x44   : > { %1247 = vmatpush.bf16.msra.mxu1 %v7206_v40  ;;  %v7212_v55 = vld [vmem:[%s8839_s1 + $0x160] sm:$0xff]  ;;  %v912_v56 = vpack.c.b16 %v897_v50, %v896_v49  ;;  %v7211_v62 = vld [vmem:[%s8839_s1 + $0x158] sm:$0xff]  ;;  %v7202_v0 = vld [vmem:[%s8839_s1 + $0x110] sm:$0xff]  ;;  %v1049_v34 = vpack.c.b16 %v898_v51, %v896_v49 }
  0x45   : > { %1276 = vmatpush.bf16.msra.mxu2 %v7214_v41  ;;  %v913_v57 = vpack.c.b16 %v899_v53, %v898_v51  ;;  %v7210_v1 = vld [vmem:[%s8839_s1 + $0x150] sm:$0xff]  ;;  %v7849_v7 = vld [vmem:[%s7802_s20 + $0xa8] sm:$0xf]  ;;  %v5445_v9 = vld [vmem:[%s7802_s20 + $0xac] sm:$0x1] }
  0x46   : > { %v923_v59 = vshll.u32 %v912_v56, 16  ;;  %v921_v2 = vshrl.u32 %v912_v56, 16  ;;  %v7846_v4 = vld [vmem:[%s7802_s20 + $0xa0] sm:$0xf]  ;;  %v5444_v8 = vld [vmem:[%s7802_s20 + $0xa4] sm:$0x1]  ;;  %v902_v11 = vunpack.c.l.b16 %v7849_v7  ;;  %v903_v18 = vunpack.c.l.b16 %v5445_v9  ;;  %vm8323_vm4 = vmand %vm2131_vm0, %vm2132_vm1 }
  0x47   : > { %1219 = vmatpush.bf16.msra.mxu0 %v7197_v42  ;;  %7503 = vmatpush.bf16.msra.mxu3 %v7197_v42  ;;  %v930_v60 = vshll.u32 %v913_v57, 16  ;;  %v928_v3 = vshrl.u32 %v913_v57, 16  ;;  %v900_v10 = vunpack.c.l.b16 %v7846_v4  ;;  %v7193_v12 = vld [vmem:[%s8839_s1 + $0xc8] sm:$0xff]  ;;  %v7859_v13 = vld [vmem:[%s7802_s20 + $0xb0] sm:$0xf]  ;;  %v901_v17 = vunpack.c.l.b16 %v5444_v8  ;;  %v7171_v32 = vld [vmem:[%s8839_s1 + $0x38] sm:$0xff] }
  0x48   : > { %1248 = vmatpush.bf16.msra.mxu1 %v7205_v43  ;;  %v925_v5 = vrot.slane %v923_v59, 1  ;;  %v7862_v14 = vld [vmem:[%s7802_s20 + $0xb8] sm:$0xf]  ;;  %v904_v21 = vunpack.c.l.b16 %v7859_v13  ;;  %v7192_v23 = vld [vmem:[%s8839_s1 + $0xc0] sm:$0xff]  ;;  %v915_v28 = vpack.c.b16 %v903_v18, %v902_v11  ;;  %v7188_v31 = vld [vmem:[%s7802_s20 + $0xdc] sm:$0xf0] }
  0x49   : > { %1277 = vmatpush.bf16.msra.mxu2 %v7213_v44  ;;  %v932_v6 = vrot.slane %v930_v60, 1  ;;  %v7201_v19 = vld [vmem:[%s8839_s1 + $0x108] sm:$0xff]  ;;  %v906_v22 = vunpack.c.l.b16 %v7862_v14  ;;  %v7200_v24 = vld [vmem:[%s8839_s1 + $0x100] sm:$0xff]  ;;  %v914_v27 = vpack.c.b16 %v901_v17, %v900_v10  ;;  %v7179_v33 = vld [vmem:[%s8839_s1 + $0x78] sm:$0xff]  ;;  %v1052_v14 = vpack.c.b16 %v902_v11, %v900_v10 }
  0x4a   : > { %v926_v15 = vor.u32 %v925_v5, %v921_v2  ;;  %v7209_v20 = vld [vmem:[%s8839_s1 + $0x148] sm:$0xff]  ;;  %v7208_v29 = vld [vmem:[%s8839_s1 + $0x140] sm:$0xff]  ;;  %v944_v39 = vshll.u32 %v915_v28, 16  ;;  %v7170_v40 = vld [vmem:[%s8839_s1 + $0x30] sm:$0xff]  ;;  %v942_v45 = vshrl.u32 %v915_v28, 16 }
  0x4b   : > { %1220 = vmatpush.bf16.msra.mxu0 %v7196_v52  ;;  %7504 = vmatpush.bf16.msra.mxu3 %v7196_v52  ;;  %v933_v16 = vor.u32 %v932_v6, %v928_v3  ;;  %v5500_v30 = vld [vmem:[%s7802_s20 + $0xd8] sm:$0xf]  ;;  %v1055_v35 = vpack.c.b16 %v906_v22, %v904_v21  ;;  %v937_v38 = vshll.u32 %v914_v27, 16  ;;  %v7178_v41 = vld [vmem:[%s8839_s1 + $0x70] sm:$0xff]  ;;  %v7187_v42 = vld [vmem:[%s8839_s1 + $0xb8] sm:$0xff]  ;;  %v935_v43 = vshrl.u32 %v914_v27, 16 }
  0x4c   : > { %1249 = vmatpush.bf16.msra.mxu1 %v7204_v54  ;;  %v985_v25 = vunpack.c.l.b16 %v926_v15  ;;  %v5501_v36 = vor.u32 %v7188_v31, %v5500_v30  ;;  %v946_v46 = vrot.slane %v944_v39, 1  ;;  %v7227_v47 = vld [vmem:[%s8839_s1 + $0x1b8] sm:$0xff]  ;;  %v5446_v48 = vld [vmem:[%s7802_s20 + $0xb4] sm:$0x1]  ;;  %v5447_v49 = vld [vmem:[%s7802_s20 + $0xbc] sm:$0x1] }
  0x4d   : > { %1278 = vmatpush.bf16.msra.mxu2 %v7212_v55  ;;  %v987_v26 = vunpack.c.l.b16 %v933_v16  ;;  %v939_v44 = vrot.slane %v937_v38, 1  ;;  %v7186_v50 = vld [vmem:[%s8839_s1 + $0xb0] sm:$0xff]  ;;  %v7169_v51 = vld [vmem:[%s8839_s1 + $0x28] sm:$0xff]  ;;  %v905_v54 = vunpack.c.l.b16 %v5446_v48  ;;  %v907_v55 = vunpack.c.l.b16 %v5447_v49  ;;  %v7931_v57 = vld [vmem:[%s7802_s20 + $0xc8] sm:$0xf] }
  0x4e   : > { %v7177_v52 = vld [vmem:[%s8839_s1 + $0x68] sm:$0xff]  ;;  %v7226_v53 = vld [vmem:[%s8839_s1 + $0x1b0] sm:$0xff]  ;;  %v947_v59 = vor.u32 %v946_v46, %v942_v45  ;;  %v5504_v6 = vld [vmem:[%s7802_s20 + $0xe8] sm:$0xf] }
  0x4f   : > { %1221 = vmatpush.bf16.msra.mxu0 %v7195_v58  ;;  %7505 = vmatpush.bf16.msra.mxu3 %v7195_v58  ;;  %v1051_v37 = vpack.c.b16 %v987_v26, %v985_v25  ;;  %v7928_v56 = vld [vmem:[%s7802_s20 + $0xc0] sm:$0xf]  ;;  %v940_v58 = vor.u32 %v939_v44, %v935_v43  ;;  %v7185_v60 = vld [vmem:[%s8839_s1 + $0xa8] sm:$0xff]  ;;  %v917_v2 = vpack.c.b16 %v907_v55, %v906_v22  ;;  %v7189_v8 = vld [vmem:[%s7802_s20 + $0xec] sm:$0xf0] }
  0x50   : > { %1250 = vmatpush.bf16.msra.mxu1 %v7203_v61  ;;  %v7168_v61 = vld [vmem:[%s8839_s1 + $0x20] sm:$0xff]  ;;  %v991_v5 = vunpack.c.l.b16 %v947_v59  ;;  %v7175_v13 = vld [vmem:[%s8839_s1 + $0x58] sm:$0xff]  ;;  %v5505_v16 = vor.u32 %v7189_v8, %v5504_v6  ;;  %v7166_v4 = vld [vmem:[%s8839_s1 + $0x10] sm:$0xff] }
  0x51   : > { %1279 = vmatpush.bf16.msra.mxu2 %v7211_v62  ;;  %v7176_v62 = vld [vmem:[%s8839_s1 + $0x60] sm:$0xff]  ;;  %v989_v3 = vunpack.c.l.b16 %v940_v58  ;;  %v7174_v7 = vld [vmem:[%s8839_s1 + $0x50] sm:$0xff]  ;;  %v7183_v10 = vld [vmem:[%s8839_s1 + $0x98] sm:$0xff] }
  0x52   : > { %v7184_v9 = vld [vmem:[%s8839_s1 + $0xa0] sm:$0xff]  ;;  %v5449_v25 = vld [vmem:[%s7802_s20 + $0xcc] sm:$0x1]  ;;  %v7182_v26 = vld [vmem:[%s8839_s1 + $0x90] sm:$0xff] }
  0x53   : > { %1222 = vmatpush.bf16.msra.mxu0 %v7194_v63  ;;  %7506 = vmatpush.bf16.msra.mxu3 %v7194_v63  ;;  %v908_v63 = vunpack.c.l.b16 %v7928_v56  ;;  %v1054_v17 = vpack.c.b16 %v991_v5, %v989_v3  ;;  %v7165_v27 = vld [vmem:[%s8839_s1 + $0x8] sm:$0xff]  ;;  %v911_v31 = vunpack.c.l.b16 %v5449_v25  ;;  %v7172_v38 = vld [vmem:[%s8839_s1 + $0x40] sm:$0xff]  ;;  %v7234_v58 = vld [vmem:[%s8839_s1 + $0x1f0] sm:$0xff] }
  0x54   : > { %1251 = vmatpush.bf16.msra.mxu1 %v7202_v0  ;;  %v910_v0 = vunpack.c.l.b16 %v7931_v57  ;;  %v7173_v28 = vld [vmem:[%s8839_s1 + $0x48] sm:$0xff]  ;;  %v7160_v48 = vld [vmem:[%s7802_s20 + $0x4c] sm:$0xf0]  ;;  %v7242_v59 = vld [vmem:[%s8839_s1 + $0x230] sm:$0xff] }
  0x55   : > { %1280 = vmatpush.bf16.msra.mxu2 %v7210_v1  ;;  %v916_v1 = vpack.c.b16 %v905_v54, %v904_v21  ;;  %v956_v21 = vshrl.u32 %v917_v2, 16  ;;  %v5508_v49 = vld [vmem:[%s7802_s20 + $0xf8] sm:$0xf]  ;;  %v7222_v6 = vld [vmem:[%s8839_s1 + $0x190] sm:$0xff]  ;;  %v7239_v25 = vld [vmem:[%s8839_s1 + $0x218] sm:$0xff] }
  0x56   : > { %v1058_v15 = vpack.c.b16 %v910_v0, %v908_v63  ;;  %v919_v44 = vpack.c.b16 %v911_v31, %v910_v0  ;;  %v7233_v3 = vld [vmem:[%s8839_s1 + $0x1e8] sm:$0xff]  ;;  %vm8334_vm5 = vmand %vm2137_vm2, %vm2138_vm3 }
  0x57   : > { %1223 = vmatpush.bf16.msra.mxu0 %v7193_v12  ;;  %7507 = vmatpush.bf16.msra.mxu3 %v7193_v12  ;;  %v7167_v12 = vld [vmem:[%s8839_s1 + $0x18] sm:$0xff]  ;;  %v951_v18 = vshll.u32 %v916_v1, 16  ;;  %v949_v11 = vshrl.u32 %v916_v1, 16  ;;  %v7241_v5 = vld [vmem:[%s8839_s1 + $0x228] sm:$0xff] }
  0x58   : > { %1252 = vmatpush.bf16.msra.mxu1 %v7201_v19  ;;  %v958_v19 = vshll.u32 %v917_v2, 16  ;;  %v972_v57 = vshll.u32 %v919_v44, 16  ;;  %v7223_v1 = vld [vmem:[%s8839_s1 + $0x198] sm:$0xff] }
  0x59   : > { %1281 = vmatpush.bf16.msra.mxu2 %v7209_v20  ;;  %v953_v20 = vrot.slane %v951_v18, 1  ;;  %v675_v2 = vld [vmem:[%s7802_s20 + $0xc] sm:$0x1] }
  0x5a   : > { %v960_v22 = vrot.slane %v958_v19, 1  ;;  %v974_v0 = vrot.slane %v972_v57, 1 }
  0x5b   : > { %1224 = vmatpush.bf16.msra.mxu0 %v7192_v23  ;;  %7508 = vmatpush.bf16.msra.mxu3 %v7192_v23  ;;  %v7225_v23 = vld [vmem:[%s8839_s1 + $0x1a8] sm:$0xff] }
  0x5c   : > { %1253 = vmatpush.bf16.msra.mxu1 %v7200_v24  ;;  %v5448_v24 = vld [vmem:[%s7802_s20 + $0xc4] sm:$0x1] }
  0x5d   : > { %1282 = vmatpush.bf16.msra.mxu2 %v7208_v29  ;;  %v7224_v29 = vld [vmem:[%s8839_s1 + $0x1a0] sm:$0xff]  ;;  %v909_v30 = vunpack.c.l.b16 %v5448_v24  ;;  %v7231_v24 = vld [vmem:[%s8839_s1 + $0x1d8] sm:$0xff] }
  0x5e   : > { %1225 = vmatmul.bf16.vlgmr.msra.gmra.mxu0 %v1049_v34  ;;  %1235 = vmatmul.bf16.vlgmr.msra.gmra.mxu3 %v1055_v35  ;;  %v7994_v34 = vld [vmem:[%s7802_s20] sm:$0xf]  ;;  %v7997_v35 = vld [vmem:[%s7802_s20 + $0x8] sm:$0xf] }
  0x5f   : > { %1472 = vmatpush.bf16.msrb.mxu3 %v7171_v32  ;;  %1501 = vmatpush.bf16.msrb.mxu0 %v7179_v33  ;;  %v954_v32 = vor.u32 %v953_v20, %v949_v11  ;;  %v961_v33 = vor.u32 %v960_v22, %v956_v21  ;;  %v698_v39 = vunpack.c.l.b16 %v7994_v34  ;;  %v918_v43 = vpack.c.b16 %v909_v30, %v908_v63  ;;  %v5616_v21 = vld [vmem:[%s7802_s20 + $0x58] sm:$0xf]  ;;  %v7161_v22 = vld [vmem:[%s7802_s20 + $0x5c] sm:$0xf0] }
  0x60   : > { %1254 = vmatmul.bf16.vlgmr.msra.gmra.mxu1 %v5501_v36  ;;  %1283 = vmatmul.bf16.vlgmr.msra.gmra.mxu2 %v1051_v37  ;;  %v7181_v36 = vld [vmem:[%s8839_s1 + $0x88] sm:$0xff]  ;;  %v7164_v37 = vld [vmem:[%s8839_s1] sm:$0xff]  ;;  %v970_v63 = vshrl.u32 %v919_v44, 16 }
  0x61   : > { %1530 = vmatpush.bf16.msrb.mxu1 %v7187_v42  ;;  %1927 = vmatpush.bf16.msrb.mxu2 %v7227_v47  ;;  %v7243_v42 = vld [vmem:[%s8839_s1 + $0x238] sm:$0xff]  ;;  %v993_v45 = vunpack.c.l.b16 %v954_v32  ;;  %v995_v46 = vunpack.c.l.b16 %v961_v33  ;;  %v965_v56 = vshll.u32 %v918_v43, 16  ;;  %v7230_v32 = vld [vmem:[%s8839_s1 + $0x1d0] sm:$0xff]  ;;  %v676_v33 = vld [vmem:[%s7802_s20 + $0x14] sm:$0x1] }
  0x62   : > { %v5612_v47 = vld [vmem:[%s7802_s20 + $0x48] sm:$0xf]  ;;  %v7221_v34 = vld [vmem:[%s8839_s1 + $0x188] sm:$0xff]  ;;  %v703_v44 = vunpack.c.l.b16 %v676_v33 }
  0x63   : > { %1473 = vmatpush.bf16.msrb.mxu3 %v7170_v40  ;;  %1502 = vmatpush.bf16.msrb.mxu0 %v7178_v41  ;;  %v700_v40 = vunpack.c.l.b16 %v7997_v35  ;;  %v7235_v41 = vld [vmem:[%s8839_s1 + $0x1f8] sm:$0xff]  ;;  %v1057_v55 = vpack.c.b16 %v995_v46, %v993_v45  ;;  %v659_v46 = vld [vmem:[%s7802_s20 + $0x20] sm:$0xf] }
  0x65   : > { %1531 = vmatpush.bf16.msrb.mxu1 %v7186_v50  ;;  %1928 = vmatpush.bf16.msrb.mxu2 %v7226_v53  ;;  %v7190_v50 = vld [vmem:[%s7802_s20 + $0xfc] sm:$0xf0]  ;;  %v5613_v53 = vor.u32 %v7160_v48, %v5612_v47  ;;  %v660_v47 = vld [vmem:[%s7802_s20 + $0x28] sm:$0xf] }
  0x66   : > { %v5509_v54 = vor.u32 %v7190_v50, %v5508_v49  ;;  %v7228_v50 = vld [vmem:[%s8839_s1 + $0x1c0] sm:$0xff] }
  0x67   : > { %1474 = vmatpush.bf16.msrb.mxu3 %v7169_v51  ;;  %1503 = vmatpush.bf16.msrb.mxu0 %v7177_v52  ;;  %v7180_v51 = vld [vmem:[%s8839_s1 + $0x80] sm:$0xff]  ;;  %v1304_v52 = vpack.c.b16 %v700_v40, %v698_v39 }
  0x69   : > { %1532 = vmatpush.bf16.msrb.mxu1 %v7185_v60  ;;  %1929 = vmatpush.bf16.msrb.mxu2 %v7225_v23  ;;  %v674_v60 = vld [vmem:[%s7802_s20 + $0x4] sm:$0x1]  ;;  %v7191_v23 = vld [vmem:[%s7802_s20 + $0x10c] sm:$0xf0] }
  0x6a   : > { %v699_v8 = vunpack.c.l.b16 %v674_v60 }
  0x6b   : > { %1475 = vmatpush.bf16.msrb.mxu3 %v7168_v61  ;;  %1504 = vmatpush.bf16.msrb.mxu0 %v7176_v62  ;;  %v963_v61 = vshrl.u32 %v918_v43, 16  ;;  %v967_v62 = vrot.slane %v965_v56, 1  ;;  %v7237_v43 = vld [vmem:[%s8839_s1 + $0x208] sm:$0xff]  ;;  %v5723_v56 = vld [vmem:[%s7802_s20 + $0x10] sm:$0xf] }
  0x6d   : > { %1533 = vmatpush.bf16.msrb.mxu1 %v7184_v9  ;;  %1930 = vmatpush.bf16.msrb.mxu2 %v7224_v29  ;;  %v701_v9 = vunpack.c.l.b16 %v675_v2 }
  0x6e   : > { %1230 = vmatmul.bf16.gmra.mxu0 %v1052_v14  ;;  %1240 = vmatmul.bf16.gmra.mxu3 %v1058_v15  ;;  %v657_v14 = vld [vmem:[%s7802_s20 + $0x10] sm:$0xf]  ;;  %v8049_v15 = vld [vmem:[%s7802_s20 + $0x18] sm:$0xf] }
  0x6f   : > { %1476 = vmatpush.bf16.msrb.mxu3 %v7167_v12  ;;  %1505 = vmatpush.bf16.msrb.mxu0 %v7175_v13  ;;  %v968_v12 = vor.u32 %v967_v62, %v963_v61  ;;  %v975_v13 = vor.u32 %v974_v0, %v970_v63  ;;  %v702_v18 = vunpack.c.l.b16 %v657_v14  ;;  %v704_v19 = vunpack.c.l.b16 %v8049_v15  ;;  %v5738_v14 = vld [vmem:[%s7802_s20 + $0xc] sm:$0x1]  ;;  %v5739_v15 = vld [vmem:[%s7802_s20 + $0x14] sm:$0x1] }
  0x70   : > { %1259 = vmatmul.bf16.gmra.mxu1 %v5505_v16  ;;  %1288 = vmatmul.bf16.gmra.mxu2 %v1054_v17  ;;  %v7232_v16 = vld [vmem:[%s8839_s1 + $0x1e0] sm:$0xff]  ;;  %v1608_v63 = vunpack.c.l.b16 %v5723_v56 }
  0x71   : > { %1534 = vmatpush.bf16.msrb.mxu1 %v7183_v10  ;;  %1931 = vmatpush.bf16.msrb.mxu2 %v7223_v1  ;;  %v7240_v17 = vld [vmem:[%s8839_s1 + $0x220] sm:$0xff]  ;;  %v5512_v10 = vld [vmem:[%s7802_s20 + $0x108] sm:$0xf]  ;;  %v997_v11 = vunpack.c.l.b16 %v968_v12  ;;  %v999_v20 = vunpack.c.l.b16 %v975_v13 }
  0x73   : > { %1477 = vmatpush.bf16.msrb.mxu3 %v7166_v4  ;;  %1506 = vmatpush.bf16.msrb.mxu0 %v7174_v7  ;;  %v714_v4 = vpack.c.b16 %v699_v8, %v698_v39  ;;  %v715_v7 = vpack.c.b16 %v701_v9, %v700_v40  ;;  %v1060_v29 = vpack.c.b16 %v999_v20, %v997_v11  ;;  %v7238_v39 = vld [vmem:[%s8839_s1 + $0x210] sm:$0xff]  ;;  %v677_v40 = vld [vmem:[%s7802_s20 + $0x1c] sm:$0x1]  ;;  %v662_v11 = vld [vmem:[%s7802_s20 + $0x38] sm:$0xf] }
  0x74   : > { %v705_v45 = vunpack.c.l.b16 %v677_v40 }
  0x75   : > { %1535 = vmatpush.bf16.msrb.mxu1 %v7182_v26  ;;  %1932 = vmatpush.bf16.msrb.mxu2 %v7222_v6  ;;  %v1307_v26 = vpack.c.b16 %v704_v19, %v702_v18  ;;  %v725_v30 = vshll.u32 %v714_v4, 16  ;;  %v732_v31 = vshll.u32 %v715_v7, 16  ;;  %v723_v35 = vshrl.u32 %v714_v4, 16 }
  0x76   : > { %v717_v57 = vpack.c.b16 %v705_v45, %v704_v19  ;;  %v1609_v19 = vunpack.c.l.b16 %v5739_v15  ;;  %v7216_v15 = vld [vmem:[%s7802_s20 + $0x54] sm:$0xf0] }
  0x77   : > { %1478 = vmatpush.bf16.msrb.mxu3 %v7165_v27  ;;  %1507 = vmatpush.bf16.msrb.mxu0 %v7173_v28  ;;  %v5617_v27 = vor.u32 %v7161_v22, %v5616_v21  ;;  %v5513_v28 = vor.u32 %v7191_v23, %v5512_v10  ;;  %v661_v10 = vld [vmem:[%s7802_s20 + $0x30] sm:$0xf]  ;;  %v712_v23 = vunpack.c.l.b16 %v662_v11 }
  0x78   : > { %v744_v12 = vshrl.u32 %v717_v57, 16  ;;  %v710_v22 = vunpack.c.l.b16 %v661_v10 }
  0x79   : > { %1536 = vmatpush.bf16.msrb.mxu1 %v7181_v36  ;;  %v727_v36 = vrot.slane %v725_v30, 1  ;;  %1933 = vmatpush.bf16.msrb.mxu2 %v7221_v34  ;;  %v5624_v30 = vld [vmem:[%s7802_s20 + $0x78] sm:$0xf] }
  0x7b   : > { %1479 = vmatpush.bf16.msrb.mxu3 %v7164_v37  ;;  %1508 = vmatpush.bf16.msrb.mxu0 %v7172_v38  ;;  %v730_v37 = vshrl.u32 %v715_v7, 16  ;;  %v734_v38 = vrot.slane %v732_v31, 1  ;;  %v728_v48 = vor.u32 %v727_v36, %v723_v35  ;;  %v7163_v31 = vld [vmem:[%s7802_s20 + $0x7c] sm:$0xf0]  ;;  %v1313_v36 = vpack.c.b16 %v712_v23, %v710_v22 }
  0x7d   : > { %1537 = vmatpush.bf16.msrb.mxu1 %v7180_v51  ;;  %v735_v49 = vor.u32 %v734_v38, %v730_v37  ;;  %v7236_v51 = vld [vmem:[%s8839_s1 + $0x200] sm:$0xff]  ;;  %v787_v60 = vunpack.c.l.b16 %v728_v48  ;;  %v5625_v37 = vor.u32 %v7163_v31, %v5624_v30  ;;  %v5742_v30 = vld [vmem:[%s7802_s20 + $0x2c] sm:$0x1] }
  0x7e   : > { %1480 = vmatmul.bf16.vlgmr.msrb.gmra.mxu3 %v1304_v52  ;;  %1509 = vmatmul.bf16.vlgmr.msrb.gmra.mxu0 %v5613_v53  ;;  %v716_v52 = vpack.c.b16 %v703_v44, %v702_v18  ;;  %v706_v53 = vunpack.c.l.b16 %v659_v46  ;;  %v1607_v18 = vunpack.c.l.b16 %v5738_v14  ;;  %v5796_v14 = vld [vmem:[%s7802_s20 + $0x50] sm:$0xf]  ;;  %v5743_v31 = vld [vmem:[%s7802_s20 + $0x34] sm:$0x1] }
  0x7f   : > { %1956 = vmatpush.bf16.msra.mxu3 %v7235_v41  ;;  %1985 = vmatpush.bf16.msra.mxu0 %v7243_v42  ;;  %v7229_v41 = vld [vmem:[%s8839_s1 + $0x1c8] sm:$0xff]  ;;  %v7220_v42 = vld [vmem:[%s8839_s1 + $0x180] sm:$0xff]  ;;  %v789_v61 = vunpack.c.l.b16 %v735_v49 }
  0x80   : > { %1264 = vmatmul.bf16.gmra.mxu1 %v5509_v54  ;;  %1293 = vmatmul.bf16.gmra.mxu2 %v1057_v55  ;;  %v708_v54 = vunpack.c.l.b16 %v660_v47  ;;  %v5722_v55 = vld [vmem:[%s7802_s20 + $0x8] sm:$0xf]  ;;  %v739_v2 = vshll.u32 %v716_v52, 16  ;;  %v737_v8 = vshrl.u32 %v716_v52, 16  ;;  %v5740_v52 = vld [vmem:[%s7802_s20 + $0x1c] sm:$0x1] }
  0x81   : > { %1934 = vmatpush.bf16.msrb.mxu2 %v7220_v42  ;;  %v1606_v62 = vunpack.c.l.b16 %v5722_v55  ;;  %v681_v55 = vld [vmem:[%s7802_s20 + $0x3c] sm:$0x1] }
  0x82   : > { %v1310_v0 = vpack.c.b16 %v708_v54, %v706_v53  ;;  %v741_v9 = vrot.slane %v739_v2, 1 }
  0x83   : > { %1957 = vmatpush.bf16.msra.mxu3 %v7234_v58  ;;  %1986 = vmatpush.bf16.msra.mxu0 %v7242_v59  ;;  %v5620_v58 = vld [vmem:[%s7802_s20 + $0x68] sm:$0xf]  ;;  %v7162_v59 = vld [vmem:[%s7802_s20 + $0x6c] sm:$0xf0]  ;;  %v1759_v6 = vpack.c.b16 %v1608_v63, %v1606_v62 }
  0x84   : > { %v5621_v1 = vor.u32 %v7162_v59, %v5620_v58  ;;  %v742_v20 = vor.u32 %v741_v9, %v737_v8  ;;  %v1611_v58 = vunpack.c.l.b16 %v5740_v52 }
  0x87   : > { %1958 = vmatpush.bf16.msra.mxu3 %v7233_v3  ;;  %1987 = vmatpush.bf16.msra.mxu0 %v7241_v5  ;;  %v1306_v3 = vpack.c.b16 %v789_v61, %v787_v60  ;;  %v746_v5 = vshll.u32 %v717_v57, 16  ;;  %v713_v61 = vunpack.c.l.b16 %v681_v55 }
  0x89   : > { %v748_v13 = vrot.slane %v746_v5, 1  ;;  %v5726_v5 = vld [vmem:[%s7802_s20 + $0x28] sm:$0xf]  ;;  %v721_v9 = vpack.c.b16 %v713_v61, %v712_v23  ;;  %v5745_v61 = vld [vmem:[%s7802_s20 + $0x44] sm:$0x1] }
  0x8b   : > { %1959 = vmatpush.bf16.msra.mxu3 %v7232_v16  ;;  %1988 = vmatpush.bf16.msra.mxu0 %v7240_v17  ;;  %v678_v16 = vld [vmem:[%s7802_s20 + $0x24] sm:$0x1]  ;;  %v679_v17 = vld [vmem:[%s7802_s20 + $0x2c] sm:$0x1]  ;;  %v749_v21 = vor.u32 %v748_v13, %v744_v12 }
  0x8c   : > { %v707_v4 = vunpack.c.l.b16 %v678_v16  ;;  %v709_v7 = vunpack.c.l.b16 %v679_v17  ;;  %v1614_v16 = vunpack.c.l.b16 %v5726_v5 }
  0x8d   : > { %v793_v33 = vunpack.c.l.b16 %v749_v21 }
  0x8e   : > { %1485 = vmatmul.bf16.gmra.mxu3 %v1307_v26  ;;  %1514 = vmatmul.bf16.gmra.mxu0 %v5617_v27  ;;  %v5724_v26 = vld [vmem:[%s7802_s20 + $0x18] sm:$0xf]  ;;  %v5725_v27 = vld [vmem:[%s7802_s20 + $0x20] sm:$0xf] }
  0x8f   : > { %1960 = vmatpush.bf16.msra.mxu3 %v7231_v24  ;;  %1989 = vmatpush.bf16.msra.mxu0 %v7239_v25  ;;  %v1622_v24 = vpack.c.b16 %v1607_v18, %v1606_v62  ;;  %v1623_v25 = vpack.c.b16 %v1609_v19, %v1608_v63  ;;  %v1610_v34 = vunpack.c.l.b16 %v5724_v26  ;;  %v1612_v35 = vunpack.c.l.b16 %v5725_v27 }
  0x90   : > { %1269 = vmatmul.bf16.gmra.mxu1 %v5513_v28  ;;  %1298 = vmatmul.bf16.gmra.mxu2 %v1060_v29  ;;  %v718_v28 = vpack.c.b16 %v707_v4, %v706_v53  ;;  %v719_v29 = vpack.c.b16 %v709_v7, %v708_v54  ;;  %v5741_v53 = vld [vmem:[%s7802_s20 + $0x24] sm:$0x1]  ;;  %v680_v54 = vld [vmem:[%s7802_s20 + $0x34] sm:$0x1]  ;;  %v5797_v18 = vor.u32 %v7216_v15, %v5796_v14 }
  0x91   : > { %v1633_v38 = vshll.u32 %v1622_v24, 16  ;;  %v1631_v46 = vshrl.u32 %v1622_v24, 16  ;;  %v1638_v48 = vshrl.u32 %v1623_v25, 16  ;;  %v1613_v59 = vunpack.c.l.b16 %v5741_v53 }
  0x92   : > { %v760_v42 = vshll.u32 %v719_v29, 16  ;;  %v751_v44 = vshrl.u32 %v718_v28, 16  ;;  %v758_v45 = vshrl.u32 %v719_v29, 16  ;;  %v711_v60 = vunpack.c.l.b16 %v680_v54 }
  0x93   : > { %1961 = vmatpush.bf16.msra.mxu3 %v7230_v32  ;;  %1990 = vmatpush.bf16.msra.mxu0 %v7238_v39  ;;  %v791_v32 = vunpack.c.l.b16 %v742_v20  ;;  %v1640_v39 = vshll.u32 %v1623_v25, 16  ;;  %v1635_v47 = vrot.slane %v1633_v38, 1  ;;  %v1624_v2 = vpack.c.b16 %v1611_v58, %v1610_v34 }
  0x94   : > { %v720_v8 = vpack.c.b16 %v711_v60, %v710_v22  ;;  %v774_v20 = vshll.u32 %v721_v9, 16  ;;  %v772_v25 = vshrl.u32 %v721_v9, 16  ;;  %v5744_v60 = vld [vmem:[%s7802_s20 + $0x3c] sm:$0x1]  ;;  %v7218_v9 = vld [vmem:[%s7802_s20 + $0x74] sm:$0xf0] }
  0x95   : > { %v1309_v40 = vpack.c.b16 %v793_v33, %v791_v32  ;;  %v1642_v49 = vrot.slane %v1640_v39, 1  ;;  %v1636_v56 = vor.u32 %v1635_v47, %v1631_v46  ;;  %v1647_v4 = vshll.u32 %v1624_v2, 16  ;;  %v5800_v46 = vld [vmem:[%s7802_s20 + $0x60] sm:$0xf]  ;;  %v7217_v47 = vld [vmem:[%s7802_s20 + $0x64] sm:$0xf0] }
  0x96   : > { %v767_v11 = vshll.u32 %v720_v8, 16  ;;  %v765_v24 = vshrl.u32 %v720_v8, 16  ;;  %v1645_v22 = vshrl.u32 %v1624_v2, 16  ;;  %v776_v29 = vrot.slane %v774_v20, 1  ;;  %v5804_v8 = vld [vmem:[%s7802_s20 + $0x70] sm:$0xf] }
  0x97   : > { %1962 = vmatpush.bf16.msra.mxu3 %v7229_v41  ;;  %1991 = vmatpush.bf16.msra.mxu0 %v7237_v43  ;;  %v753_v41 = vshll.u32 %v718_v28, 16  ;;  %v1762_v43 = vpack.c.b16 %v1612_v35, %v1610_v34  ;;  %v1643_v57 = vor.u32 %v1642_v49, %v1638_v48  ;;  %v1649_v23 = vrot.slane %v1647_v4, 1 }
  0x98   : > { %v769_v28 = vrot.slane %v767_v11, 1  ;;  %v1615_v34 = vunpack.c.l.b16 %v5742_v30 }
  0x99   : > { %v1650_v32 = vor.u32 %v1649_v23, %v1645_v22  ;;  %v5808_v23 = vld [vmem:[%s7802_s20 + $0x80] sm:$0xf] }
  0x9b   : > { %1963 = vmatpush.bf16.msra.mxu3 %v7228_v50  ;;  %1992 = vmatpush.bf16.msra.mxu0 %v7236_v51  ;;  %v755_v50 = vrot.slane %v753_v41, 1  ;;  %v762_v51 = vrot.slane %v760_v42, 1  ;;  %v1699_v38 = vunpack.c.l.b16 %v1650_v32  ;;  %v5728_v42 = vld [vmem:[%s7802_s20 + $0x38] sm:$0xf] }
  0x9c   : > { %v1618_v48 = vunpack.c.l.b16 %v5728_v42 }
  0x9d   : > { %v756_v62 = vor.u32 %v755_v50, %v751_v44  ;;  %v763_v63 = vor.u32 %v762_v51, %v758_v45  ;;  %v5801_v50 = vor.u32 %v7217_v47, %v5800_v46 }
  0x9e   : > { %1490 = vmatmul.bf16.gmra.mxu3 %v1310_v0  ;;  %1519 = vmatmul.bf16.gmra.mxu0 %v5621_v1  ;;  %v1695_v0 = vunpack.c.l.b16 %v1636_v56  ;;  %v1697_v1 = vunpack.c.l.b16 %v1643_v57 }
  0x9f   : > { %v795_v12 = vunpack.c.l.b16 %v756_v62  ;;  %v797_v13 = vunpack.c.l.b16 %v763_v63 }
  0xa0   : > { %1538 = vmatmul.bf16.vlgmr.msrb.gmra.mxu1 %v1306_v3  ;;  %1935 = vmatmul.bf16.vlgmr.msrb.gmra.mxu2 %v1759_v6  ;;  %v1625_v3 = vpack.c.b16 %v1613_v59, %v1612_v35  ;;  %v5727_v6 = vld [vmem:[%s7802_s20 + $0x30] sm:$0xf]  ;;  %v1761_v19 = vpack.c.b16 %v1697_v1, %v1695_v0  ;;  %v1617_v35 = vunpack.c.l.b16 %v5743_v31  ;;  %v1619_v0 = vunpack.c.l.b16 %v5744_v60 }
  0xa1   : > { %v1616_v17 = vunpack.c.l.b16 %v5727_v6  ;;  %v1312_v10 = vpack.c.b16 %v797_v13, %v795_v12  ;;  %v1621_v1 = vunpack.c.l.b16 %v5745_v61  ;;  %v5805_v12 = vor.u32 %v7218_v9, %v5804_v8  ;;  %v7401_v61 = vld [vmem:[%s8841_s3 + $0x38] sm:$0xff] }
  0xa2   : > { %v1654_v7 = vshll.u32 %v1625_v3, 16  ;;  %v1652_v26 = vshrl.u32 %v1625_v3, 16  ;;  %v1628_v5 = vpack.c.b16 %v1619_v0, %v1618_v48  ;;  %4549 = vmatpush.bf16.msrb.mxu0 %v7401_v61  ;;  %v7441_v8 = vld [vmem:[%s8841_s3 + $0x178] sm:$0xff] }
  0xa3   : > { %v1765_v21 = vpack.c.b16 %v1616_v17, %v1614_v16  ;;  %v1627_v41 = vpack.c.b16 %v1617_v35, %v1616_v17  ;;  %4352 = vmatpush.bf16.msrb.mxu3 %v7441_v8 }
  0xa4   : > { %v1656_v27 = vrot.slane %v1654_v7, 1  ;;  %v1675_v14 = vshll.u32 %v1628_v5, 16  ;;  %v1673_v17 = vshrl.u32 %v1628_v5, 16 }
  0xa5   : > { %v1668_v53 = vshll.u32 %v1627_v41, 16  ;;  %v1666_v58 = vshrl.u32 %v1627_v41, 16 }
  0xa6   : > { %v1657_v33 = vor.u32 %v1656_v27, %v1652_v26  ;;  %v7219_v26 = vld [vmem:[%s7802_s20 + $0x84] sm:$0xf0] }
  0xa7   : > { %v1670_v59 = vrot.slane %v1668_v53, 1 }
  0xa8   : > { %v1701_v39 = vunpack.c.l.b16 %v1657_v33 }
  0xa9   : > { %v1671_v63 = vor.u32 %v1670_v59, %v1666_v58  ;;  %v7612_v58 = vmov 0  }
  0xaa   : > { %v1764_v51 = vpack.c.b16 %v1701_v39, %v1699_v38  ;;  %634 = vst [vmem:[#allocation2 + $0x8] sm:$0xf] %v7612_v58 }
  0xab   : > { %v1705_v3 = vunpack.c.l.b16 %v1671_v63  ;;  %635 = vst [vmem:[#allocation2 + $0xc] sm:$0x1] %v7612_v58  ;;  %v7400_v63 = vld [vmem:[%s8841_s3 + $0x30] sm:$0xff] }
  0xac   : > { %632 = vst [vmem:[#allocation2] sm:$0xf] %v7612_v58  ;;  %4550 = vmatpush.bf16.msrb.mxu0 %v7400_v63 }
  0xad   : > { %633 = vst [vmem:[#allocation2 + $0x4] sm:$0x1] %v7612_v58 }
  0xae   : > { %1495 = vmatmul.bf16.gmra.mxu3 %v1313_v36  ;;  %1524 = vmatmul.bf16.gmra.mxu0 %v5625_v37  ;;  %v770_v36 = vor.u32 %v769_v28, %v765_v24  ;;  %v777_v37 = vor.u32 %v776_v29, %v772_v25  ;;  %v5809_v29 = vor.u32 %v7219_v26, %v5808_v23  ;;  %v7421_v23 = vld [vmem:[%s8841_s3 + $0xd8] sm:$0xff]  ;;  %v7395_v26 = vld [vmem:[%s8841_s3 + $0x8] sm:$0xff] }
  0xaf   : > { %636 = vst [vmem:[#allocation2 + $0x10] sm:$0xf] %v7612_v58 }
  0xb0   : > { %1543 = vmatmul.bf16.gmra.mxu1 %v1309_v40  ;;  %1940 = vmatmul.bf16.gmra.mxu2 %v1762_v43  ;;  %v1626_v40 = vpack.c.b16 %v1615_v34, %v1614_v16  ;;  %v5729_v43 = vld [vmem:[%s7802_s20 + $0x40] sm:$0xf]  ;;  %v799_v44 = vunpack.c.l.b16 %v770_v36  ;;  %v801_v45 = vunpack.c.l.b16 %v777_v37  ;;  %637 = vst [vmem:[#allocation2 + $0x14] sm:$0x1] %v7612_v58 }
  0xb1   : > { %v1620_v49 = vunpack.c.l.b16 %v5729_v43  ;;  %638 = vst [vmem:[#allocation2 + $0x18] sm:$0xf] %v7612_v58 }
  0xb2   : > { %v1661_v52 = vshll.u32 %v1626_v40, 16  ;;  %v1315_v54 = vpack.c.b16 %v801_v45, %v799_v44  ;;  %v1659_v56 = vshrl.u32 %v1626_v40, 16  ;;  %639 = vst [vmem:[#allocation2 + $0x1c] sm:$0x1] %v7612_v58 }
  0xb3   : > { %v1768_v55 = vpack.c.b16 %v1620_v49, %v1618_v48  ;;  %v1629_v6 = vpack.c.b16 %v1621_v1, %v1620_v49  ;;  %640 = vst [vmem:[#allocation2 + $0x20] sm:$0xf] %v7612_v58 }
  0xb4   : > { %v1663_v57 = vrot.slane %v1661_v52, 1  ;;  %641 = vst [vmem:[#allocation2 + $0x24] sm:$0x1] %v7612_v58 }
  0xb5   : > { %v1682_v15 = vshll.u32 %v1629_v6, 16  ;;  %642 = vst [vmem:[#allocation2 + $0x28] sm:$0xf] %v7612_v58 }
  0xb6   : > { %v1664_v62 = vor.u32 %v1663_v57, %v1659_v56  ;;  %v7432_v56 = vld [vmem:[%s8841_s3 + $0x130] sm:$0xff]  ;;  %643 = vst [vmem:[#allocation2 + $0x2c] sm:$0x1] %v7612_v58 }
  0xb7   : > { %v1684_v4 = vrot.slane %v1682_v15, 1  ;;  %v7424_v57 = vld [vmem:[%s8841_s3 + $0xf0] sm:$0xff]  ;;  %644 = vst [vmem:[#allocation2 + $0x30] sm:$0xf] %v7612_v58 }
  0xb8   : > { %v1703_v2 = vunpack.c.l.b16 %v1664_v62  ;;  %645 = vst [vmem:[#allocation2 + $0x34] sm:$0x1] %v7612_v58 }
  0xb9   : > { %646 = vst [vmem:[#allocation2 + $0x38] sm:$0xf] %v7612_v58 }
  0xba   : > { %v1767_v13 = vpack.c.b16 %v1705_v3, %v1703_v2  ;;  %v7399_v2 = vld [vmem:[%s8841_s3 + $0x28] sm:$0xff]  ;;  %647 = vst [vmem:[#allocation2 + $0x3c] sm:$0x1] %v7612_v58 }
  0xbb   : > { %4551 = vmatpush.bf16.msrb.mxu0 %v7399_v2  ;;  %648 = vst [vmem:[#allocation2 + $0x40] sm:$0xf] %v7612_v58 }
  0xbc   : > { %649 = vst [vmem:[#allocation2 + $0x44] sm:$0x1] %v7612_v58 }
  0xbd   : > { %650 = vst [vmem:[#allocation2 + $0x48] sm:$0xf] %v7612_v58 }
  0xbe   : > { %1964 = vmatmul.bf16.vlgmr.msra.gmra.mxu3 %v5797_v18  ;;  %1993 = vmatmul.bf16.vlgmr.msra.gmra.mxu0 %v1761_v19  ;;  %v1677_v18 = vrot.slane %v1675_v14, 1  ;;  %v1680_v19 = vshrl.u32 %v1629_v6, 16  ;;  %v7398_v6 = vld [vmem:[%s8841_s3 + $0x20] sm:$0xff]  ;;  %651 = vst [vmem:[#allocation2 + $0x4c] sm:$0x1] %v7612_v58  ;;  %v7397_v14 = vld [vmem:[%s8841_s3 + $0x18] sm:$0xff] }
  0xbf   : > { %4552 = vmatpush.bf16.msrb.mxu0 %v7398_v6  ;;  %v7430_v58 = vld [vmem:[%s8841_s3 + $0x120] sm:$0xff] }
  0xc0   : > { %1548 = vmatmul.bf16.gmra.mxu1 %v1312_v10  ;;  %1945 = vmatmul.bf16.gmra.mxu2 %v1765_v21  ;;  %v1678_v11 = vor.u32 %v1677_v18, %v1673_v17  ;;  %v1685_v20 = vor.u32 %v1684_v4, %v1680_v19  ;;  %v7440_v18 = vld [vmem:[%s8841_s3 + $0x170] sm:$0xff]  ;;  %v7422_v19 = vld [vmem:[%s8841_s3 + $0xe0] sm:$0xff] }
  0xc1   : > { %4353 = vmatpush.bf16.msrb.mxu3 %v7440_v18  ;;  %v7396_v4 = vld [vmem:[%s8841_s3 + $0x10] sm:$0xff] }
  0xc2   : > { %v1707_v25 = vunpack.c.l.b16 %v1678_v11  ;;  %v1709_v22 = vunpack.c.l.b16 %v1685_v20  ;;  %v7431_v11 = vld [vmem:[%s8841_s3 + $0x128] sm:$0xff] }
  0xc3   : > { %4553 = vmatpush.bf16.msrb.mxu0 %v7397_v14  ;;  %v7439_v20 = vld [vmem:[%s8841_s3 + $0x168] sm:$0xff] }
  0xc4   : > { %v1770_v30 = vpack.c.b16 %v1709_v22, %v1707_v25 }
  0xc5   : > { %4354 = vmatpush.bf16.msrb.mxu3 %v7439_v20  ;;  %v7428_v20 = vld [vmem:[%s8841_s3 + $0x110] sm:$0xff] }
  0xc7   : > { %4554 = vmatpush.bf16.msrb.mxu0 %v7396_v4 }
  0xcb   : > { %4555 = vmatpush.bf16.msrb.mxu0 %v7395_v26 }
  0xce   : > { %1969 = vmatmul.bf16.gmra.mxu3 %v5801_v50  ;;  %1998 = vmatmul.bf16.gmra.mxu0 %v1764_v51  ;;  %v7433_v50 = vld [vmem:[%s8841_s3 + $0x138] sm:$0xff] }
  0xcf   : > { %v7425_v51 = vld [vmem:[%s8841_s3 + $0xf8] sm:$0xff]  ;;  %4323 = vmatpush.bf16.msra.mxu2 %v7433_v50 }
  0xd0   : > { %1553 = vmatmul.bf16.gmra.mxu1 %v1315_v54  ;;  %1950 = vmatmul.bf16.gmra.mxu2 %v1768_v55 }
  0xd1   : > { %4294 = vmatpush.bf16.msra.mxu1 %v7425_v51  ;;  %v7420_v51 = vld [vmem:[%s8841_s3 + $0xd0] sm:$0xff] }
  0xd3   : > { %4324 = vmatpush.bf16.msra.mxu2 %v7432_v56  ;;  %v7394_v56 = vld [vmem:[%s8841_s3] sm:$0xff] }
  0xd4   : > { %4556 = vmatpush.bf16.msrb.mxu0 %v7394_v56 }
  0xd5   : > { %4295 = vmatpush.bf16.msra.mxu1 %v7424_v57 }
  0xd7   : > { %4325 = vmatpush.bf16.msra.mxu2 %v7431_v11 }
  0xdb   : > { %v8128_v16 = vpop.f32.mrf.mxu0  ;;  %4326 = vmatpush.bf16.msra.mxu2 %v7430_v58  ;;  %v7434_v58 = vld [vmem:[%s8841_s3 + $0x140] sm:$0xff] }
  0xdd   : > { %v8130_v7 = vpop.f32.mrf.mxu1 }
  0xde   : > { %1974 = vmatmul.bf16.gmra.mxu3 %v5805_v12  ;;  %2003 = vmatmul.bf16.gmra.mxu0 %v1767_v13  ;;  %v7423_v13 = vld [vmem:[%s8841_s3 + $0xe8] sm:$0xff]  ;;  %v1256_v25 = vadd.f32 %v8130_v7, %v8128_v16  ;;  %v7438_v16 = vld [vmem:[%s8841_s3 + $0x160] sm:$0xff] }
  0xdf   : > { %4296 = vmatpush.bf16.msra.mxu1 %v7423_v13  ;;  %4355 = vmatpush.bf16.msrb.mxu3 %v7438_v16  ;;  %v7429_v13 = vld [vmem:[%s8841_s3 + $0x118] sm:$0xff] }
  0xe0   : > { %4327 = vmatpush.bf16.msra.mxu2 %v7429_v13  ;;  %v7442_v13 = vld [vmem:[%s8841_s3 + $0x180] sm:$0xff] }
  0xe1   : > { %v8132_v10 = vpop.f32.mrf.mxu3 }
  0xe3   : > { %v8134_v21 = vpop.f32.mrf.mxu0  ;;  %v8136_v24 = vpop.f32.mrf.mxu2  ;;  %4297 = vmatpush.bf16.msra.mxu1 %v7422_v19 }
  0xe4   : > { %v1285_v7 = vadd.f32 %v8136_v24, %v1256_v25  ;;  %v7437_v24 = vld [vmem:[%s8841_s3 + $0x158] sm:$0xff]  ;;  %4328 = vmatpush.bf16.msra.mxu2 %v7428_v20 }
  0xe5   : > { %v8142_v28 = vpop.f32.mrf.mxu1  ;;  %4356 = vmatpush.bf16.msrb.mxu3 %v7437_v24 }
  0xe6   : > { %v1258_v63 = vadd.f32 %v8142_v28, %v8134_v21  ;;  %v8296_v21 = vld [vmem:[%s8840_s2] ss:$0 sm:$0xff]  ;;  %v7436_v28 = vld [vmem:[%s8841_s3 + $0x150] sm:$0xff] }
  0xe7   : > { %4298 = vmatpush.bf16.msra.mxu1 %v7421_v23 }
  0xe9   : > { %v8140_v27 = vpop.f32.mrf.mxu3  ;;  %4357 = vmatpush.bf16.msrb.mxu3 %v7436_v28 }
  0xeb   : > { %v8144_v31 = vpop.f32.mrf.mxu0  ;;  %v8146_v32 = vpop.f32.mrf.mxu2  ;;  %4299 = vmatpush.bf16.msra.mxu1 %v7420_v51 }
  0xec   : > { %v1287_v14 = vadd.f32 %v8146_v32, %v1258_v63  ;;  %v7418_v32 = vld [vmem:[%s8841_s3 + $0xc0] sm:$0xff] }
  0xed   : > { %v8152_v35 = vpop.f32.mrf.mxu1 }
  0xee   : > { %1979 = vmatmul.bf16.gmra.mxu3 %v5809_v29  ;;  %2008 = vmatmul.bf16.gmra.mxu0 %v1770_v30 }
  0xf1   : > { %v8148_v33 = vpop.f32.mrf.mxu3 }
  0xf3   : > { %v8150_v34 = vpop.f32.mrf.mxu0  ;;  %v8154_v36 = vpop.f32.mrf.mxu2 }
  0xf5   : > { %v8160_v39 = vpop.f32.mrf.mxu1 }
  0xf9   : > { %v8156_v37 = vpop.f32.mrf.mxu3 }
  0xfb   : > { %v8158_v38 = vpop.f32.mrf.mxu0  ;;  %v8164_v41 = vpop.f32.mrf.mxu2 }
  0xfd   : > { %v8168_v43 = vpop.f32.mrf.mxu1 }
 0x101   : > { %v8162_v40 = vpop.f32.mrf.mxu3 }
 0x102   : > { %v1482_v57 = vadd.f32 %v8162_v40, %v1285_v7  ;;  %v7419_v40 = vld [vmem:[%s8841_s3 + $0xc8] sm:$0xff] }
 0x103   : > { %v8166_v42 = vpop.f32.mrf.mxu0  ;;  %v8174_v46 = vpop.f32.mrf.mxu2  ;;  %4300 = vmatpush.bf16.msra.mxu1 %v7419_v40 }
 0x104   : > { %v1511_v2 = vadd.f32 %v8158_v38, %v1482_v57  ;;  %v7427_v57 = vld [vmem:[%s8841_s3 + $0x108] sm:$0xff] }
 0x105   : > { %v8178_v48 = vpop.f32.mrf.mxu1  ;;  %4329 = vmatpush.bf16.msra.mxu2 %v7427_v57 }
 0x107   : > { %4301 = vmatpush.bf16.msra.mxu1 %v7418_v32 }
 0x109   : > { %v8170_v44 = vpop.f32.mrf.mxu3 }
 0x10a   : > { %v1484_v38 = vadd.f32 %v8170_v44, %v1287_v14  ;;  %v7435_v44 = vld [vmem:[%s8841_s3 + $0x148] sm:$0xff] }
 0x10b   : > { %v8172_v45 = vpop.f32.mrf.mxu0  ;;  %v8188_v52 = vpop.f32.mrf.mxu2  ;;  %4358 = vmatpush.bf16.msrb.mxu3 %v7435_v44  ;;  %v2140_v14 = vld [vmem:[#allocation2 + $0xc] sm:$0x1] }
 0x10c   : > { %v1513_v26 = vadd.f32 %v8166_v42, %v1484_v38 }
 0x10d   : > { %v8194_v55 = vpop.f32.mrf.mxu1 }
 0x10f   : > { %4359 = vmatpush.bf16.msrb.mxu3 %v7434_v58 }
 0x111   : > { %v8176_v47 = vpop.f32.mrf.mxu3 }
 0x113   : > { %v8180_v49 = vpop.f32.mrf.mxu0  ;;  %v8202_v59 = vpop.f32.mrf.mxu2 }
 0x115   : > { %v8214_v0 = vpop.f32.mrf.mxu1 }
 0x119   : > { %v8190_v53 = vpop.f32.mrf.mxu3 }
 0x11b   : > { %v8192_v54 = vpop.f32.mrf.mxu0  ;;  %v8221_v3 = vpop.f32.mrf.mxu2 }
 0x11d   : > { %v1539_v9 = vpop.f32.mrf.mxu1 }
 0x11e   : > { %v1540_v18 = vadd.f32 %v1539_v9, %v1511_v2  ;;  %v1261_v9 = vadd.f32 %v8152_v35, %v8144_v31 }
 0x120   : > { %v1290_v31 = vadd.f32 %v8154_v36, %v1261_v9 }
 0x121   : > { %v8204_v60 = vpop.f32.mrf.mxu3 }
 0x122   : > { %v1487_v24 = vadd.f32 %v8176_v47, %v1290_v31  ;;  %v7426_v47 = vld [vmem:[%s8841_s3 + $0x100] sm:$0xff] }
 0x123   : > { %v8209_v62 = vpop.f32.mrf.mxu0  ;;  %v1936_v17 = vpop.f32.mrf.mxu2  ;;  %4330 = vmatpush.bf16.msra.mxu2 %v7426_v47 }
 0x124   : > { %v1516_v40 = vadd.f32 %v8172_v45, %v1487_v24 }
 0x125   : > { %v1541_v29 = vpop.f32.mrf.mxu1 }
 0x126   : > { %v1542_v7 = vadd.f32 %v1541_v29, %v1513_v26 }
 0x129   : > { %v8216_v1 = vpop.f32.mrf.mxu3 }
 0x12b   : > { %v8223_v5 = vpop.f32.mrf.mxu0  ;;  %v1938_v50 = vpop.f32.mrf.mxu2 }
 0x12d   : > { %v1544_v19 = vpop.f32.mrf.mxu1 }
 0x12e   : > { %v1545_v20 = vadd.f32 %v1544_v19, %v1516_v40  ;;  %v8345_v19 = vld [vmem:[#allocation2] sm:$0xf] }
 0x131   : > { %v8231_v12 = vpop.f32.mrf.mxu3 }
 0x133   : > { %v8239_v15 = vpop.f32.mrf.mxu0  ;;  %v1941_v11 = vpop.f32.mrf.mxu2 }
 0x135   : > { %v1546_v42 = vpop.f32.mrf.mxu1 }
 0x139   : > { %v8258_v22 = vpop.f32.mrf.mxu3 }
 0x13b   : > { %v1994_v30 = vpop.f32.mrf.mxu0 }
 0x141   : > { %v1965_v61 = vpop.f32.mrf.mxu3 }
 0x142   : > { %v1966_v6 = vadd.f32 %v1965_v61, %v1936_v17 }
 0x143   : > { %v1996_v8 = vpop.f32.mrf.mxu0 }
 0x144   : > { %v1995_v4 = vadd.f32 %v1994_v30, %v1966_v6  ;;  %v1263_v6 = vadd.f32 %v8160_v39, %v8150_v34 }
 0x146   : > { %v2014_v17 = vadd.f32 %v1995_v4, %v1540_v18  ;;  %v1943_v18 = vpop.f32.mrf.mxu2  ;;  %v1292_v9 = vadd.f32 %v8164_v41, %v1263_v6 }
 0x148   : > { %v2026_v25 = vadd.f32 %v8296_v21, %v2014_v17 }
 0x149   : > { %v1967_v23 = vpop.f32.mrf.mxu3 }
 0x14a   : > { %v2034_v30 = vmax.f32 %v2026_v25, 0.0  ;;  %v1968_v16 = vadd.f32 %v1967_v23, %v1938_v50  ;;  %v1489_v23 = vadd.f32 %v8190_v53, %v1292_v9 }
 0x14b   : > { %v1999_v35 = vpop.f32.mrf.mxu0 }
 0x14c   : > { %v2042_v51 = vpack.c.bf16 %v2034_v30, %v2034_v30  ;;  %v1997_v56 = vadd.f32 %v1996_v8, %v1968_v16  ;;  %v2134_v8 = vld [vmem:[#allocation2 + $0x8] sm:$0xf] }
 0x14e   : > { %v2051_v50 = vshrl.u32 %v2042_v51, 16  ;;  %v2015_v36 = vadd.f32 %v1997_v56, %v1542_v7  ;;  %v2054_v61 = vshll.u32 %v2042_v51, 16  ;;  %v1266_v7 = vadd.f32 %v8168_v43, %v8132_v10  ;;  %v2143_v56 = vld [vmem:[#allocation2 + $0x10] sm:$0xf] }
 0x14f   : > { %v1518_v51 = vadd.f32 %v8180_v49, %v1489_v23 }
 0x150   : > { %v2053_v29 = vrot.slane %v2051_v50, 7  ;;  %v2027_v2 = vadd.f32 %v8296_v21, %v2015_v36  ;;  %v1295_v36 = vadd.f32 %v8174_v46, %v1266_v7 }
 0x151   : > { %v1970_v4 = vpop.f32.mrf.mxu3 }
 0x152   : > { %v2056_v28 = vor.u32 %v2054_v61, %v2053_v29  ;;  %v2057_v38 = vrot.slane %v2053_v29, 4  ;;  %v2035_v17 = vmax.f32 %v2027_v2, 0.0  ;;  %v1971_v32 = vadd.f32 %v1970_v4, %v1941_v11  ;;  %v1549_v11 = vpop.f32.mrf.mxu1  ;;  %v1946_v61 = vpop.f32.mrf.mxu2 }
 0x153   : > { %v2001_v25 = vpop.f32.mrf.mxu0  ;;  %v1547_v29 = vadd.f32 %v1546_v42, %v1518_v51  ;;  %v3789_v2 = vunpack.c.l.b16 %v8345_v19 }
 0x154   : > { %v2135_v34 = vsel %vm8323_vm4, %v2056_v28, %v2134_v8  ;;  %v2141_v39 = vsel %vm8334_vm5, %v2057_v38, %v2140_v14  ;;  %v2043_v45 = vpack.c.bf16 %v2035_v17, %v2035_v17  ;;  %v2000_v44 = vadd.f32 %v1999_v35, %v1971_v32  ;;  %v2146_v35 = vld [vmem:[#allocation2 + $0x14] sm:$0x1] }
 0x155   : > { %2136 = vst [vmem:[#allocation2 + $0x8] sm:$0xf] %v2135_v34  ;;  %v1492_v8 = vadd.f32 %v8204_v60, %v1295_v36  ;;  %v1268_v38 = vadd.f32 %v8178_v48, %v8140_v27 }
 0x156   : > { %2142 = vst [vmem:[#allocation2 + $0xc] sm:$0x1] %v2141_v39  ;;  %v2059_v26 = vshrl.u32 %v2043_v45, 16  ;;  %v2016_v30 = vadd.f32 %v2000_v44, %v1545_v20  ;;  %v2062_v31 = vshll.u32 %v2043_v45, 16  ;;  %v2149_v39 = vld [vmem:[#allocation2 + $0x18] sm:$0xf] }
 0x157   : > { %v1521_v34 = vadd.f32 %v8192_v54, %v1492_v8  ;;  %v2152_v45 = vld [vmem:[#allocation2 + $0x1c] sm:$0x1] }
 0x158   : > { %v2061_v16 = vrot.slane %v2059_v26, 7  ;;  %v2028_v41 = vadd.f32 %v8296_v21, %v2016_v30 }
 0x159   : > { %v1972_v57 = vpop.f32.mrf.mxu3  ;;  %v1550_v7 = vadd.f32 %v1549_v11, %v1521_v34 }
 0x15a   : > { %v2064_v53 = vor.u32 %v2062_v31, %v2061_v16  ;;  %v2065_v58 = vrot.slane %v2061_v16, 4  ;;  %v2036_v24 = vmax.f32 %v2028_v41, 0.0  ;;  %v1973_v50 = vadd.f32 %v1972_v57, %v1943_v18  ;;  %v1551_v27 = vpop.f32.mrf.mxu1 }
 0x15b   : > { %v2004_v14 = vpop.f32.mrf.mxu0  ;;  %v1271_v31 = vadd.f32 %v8194_v55, %v8148_v33 }
 0x15c   : > { %v2144_v47 = vsel %vm8323_vm4, %v2064_v53, %v2143_v56  ;;  %v2147_v10 = vsel %vm8334_vm5, %v2065_v58, %v2146_v35  ;;  %v2044_v43 = vpack.c.bf16 %v2036_v24, %v2036_v24  ;;  %v2002_v49 = vadd.f32 %v2001_v25, %v1973_v50  ;;  %v8356_v6 = vld [vmem:[#allocation2 + $0x8] sm:$0xf]  ;;  %v1948_v53 = vpop.f32.mrf.mxu2 }
 0x15d   : > { %v3941_v40 = vld [vmem:[#allocation2 + $0x8] sm:$0xf]  ;;  %2145 = vst [vmem:[#allocation2 + $0x10] sm:$0xf] %v2144_v47  ;;  %v3791_v46 = vunpack.c.l.b16 %v8356_v6  ;;  %v3942_v28 = vld [vmem:[#allocation2 + $0xc] sm:$0x1]  ;;  %v1297_v25 = vadd.f32 %v8188_v52, %v1268_v38  ;;  %v1300_v57 = vadd.f32 %v8202_v59, %v1271_v31 }
 0x15e   : > { %v3973_v42 = vunpack.c.l.b16 %v3941_v40  ;;  %2148 = vst [vmem:[#allocation2 + $0x14] sm:$0x1] %v2147_v10  ;;  %v2067_v18 = vshrl.u32 %v2044_v43, 16  ;;  %v2017_v4 = vadd.f32 %v2002_v49, %v1547_v29  ;;  %v3974_v32 = vunpack.c.l.b16 %v3942_v28  ;;  %v7417_v59 = vld [vmem:[%s8841_s3 + $0xb8] sm:$0xff] }
 0x15f   : > { %v4381_v17 = vpack.c.b16 %v3791_v46, %v3789_v2  ;;  %v2070_v60 = vshll.u32 %v2044_v43, 16  ;;  %v1494_v41 = vadd.f32 %v8216_v1, %v1297_v25  ;;  %v8378_v11 = vadd.f32 %v8231_v12, %v1300_v57  ;;  %v7409_v10 = vld [vmem:[%s8841_s3 + $0x78] sm:$0xff]  ;;  %4607 = vmatpush.bf16.msrb.mxu2 %v7417_v59  ;;  %v7456_v25 = vld [vmem:[%s8841_s3 + $0x1f0] sm:$0xff] }
 0x160   : > { %v2069_v9 = vrot.slane %v2067_v18, 7  ;;  %v2029_v20 = vadd.f32 %v8296_v21, %v2017_v4  ;;  %v3989_v23 = vpack.c.b16 %v3974_v32, %v3973_v42  ;;  %v7457_v43 = vld [vmem:[%s8841_s3 + $0x1f8] sm:$0xff]  ;;  %v2158_v18 = vld [vmem:[#allocation2 + $0x24] sm:$0x1]  ;;  %4578 = vmatpush.bf16.msrb.mxu1 %v7409_v10  ;;  %v2161_v10 = vld [vmem:[#allocation2 + $0x28] sm:$0xf] }
 0x161   : > { %v1975_v44 = vpop.f32.mrf.mxu3  ;;  %4557 = vmatmul.bf16.vlgmr.msrb.gmra.mxu0 %v4381_v17  ;;  %v1523_v36 = vadd.f32 %v8209_v62, %v1494_v41  ;;  %v1526_v59 = vadd.f32 %v8223_v5, %v8378_v11  ;;  %v7407_v5 = vld [vmem:[%s8841_s3 + $0x68] sm:$0xff]  ;;  %v7449_v11 = vld [vmem:[%s8841_s3 + $0x1b8] sm:$0xff] }
 0x162   : > { %v2072_v48 = vor.u32 %v2070_v60, %v2069_v9  ;;  %v2073_v26 = vrot.slane %v2069_v9, 4  ;;  %v2037_v30 = vmax.f32 %v2029_v20, 0.0  ;;  %v1976_v16 = vadd.f32 %v1975_v44, %v1946_v61  ;;  %5019 = vmatpush.bf16.msra.mxu0 %v7457_v43  ;;  %v2164_v43 = vld [vmem:[#allocation2 + $0x2c] sm:$0x1]  ;;  %4990 = vmatpush.bf16.msra.mxu3 %v7449_v11  ;;  %v7477_v6 = vld [vmem:[%s8843_s5 + $0x38] sm:$0xff] }
 0x163   : > { %v4053_v50 = vrot.slane %v3989_v23, 1  ;;  %v2006_v29 = vpop.f32.mrf.mxu0  ;;  %v4000_v47 = vshll.u32 %v3989_v23, 16  ;;  %v3998_v38 = vshrl.u32 %v3989_v23, 16 }
 0x164   : > { %v2150_v52 = vsel %vm8323_vm4, %v2072_v48, %v2149_v39  ;;  %v2153_v54 = vsel %vm8334_vm5, %v2073_v26, %v2152_v45  ;;  %v2045_v51 = vpack.c.bf16 %v2037_v30, %v2037_v30  ;;  %v2005_v56 = vadd.f32 %v2004_v14, %v1976_v16  ;;  %v3943_v35 = vld [vmem:[#allocation2 + $0x10] sm:$0xf]  ;;  %v1951_v57 = vpop.f32.mrf.mxu2 }
 0x165   : > { %2151 = vst [vmem:[#allocation2 + $0x18] sm:$0xf] %v2150_v52  ;;  %v3944_v58 = vld [vmem:[#allocation2 + $0x14] sm:$0x1]  ;;  %v3975_v24 = vunpack.c.l.b16 %v3943_v35  ;;  %v8391_v8 = vld [vmem:[#allocation2 + $0x10] sm:$0xf]  ;;  %v1552_v14 = vadd.f32 %v1551_v27, %v1523_v36  ;;  %v4062_v28 = vunpack.c.l.b16 %v4053_v50  ;;  %v1554_v27 = vpop.f32.mrf.mxu1 }
 0x166   : > { %2154 = vst [vmem:[#allocation2 + $0x1c] sm:$0x1] %v2153_v54  ;;  %v2075_v33 = vshrl.u32 %v2045_v51, 16  ;;  %v2018_v55 = vadd.f32 %v2005_v56, %v1550_v7  ;;  %v3976_v1 = vunpack.c.l.b16 %v3944_v58  ;;  %v2078_v12 = vshll.u32 %v2045_v51, 16  ;;  %5020 = vmatpush.bf16.msra.mxu0 %v7456_v25 }
 0x167   : > { %v4126_v61 = vpack.c.b16 %v3975_v24, %v3973_v42  ;;  %v2155_v42 = vld [vmem:[#allocation2 + $0x20] sm:$0xf]  ;;  %v4002_v17 = vrot.slane %v4000_v47, 1  ;;  %v3793_v39 = vunpack.c.l.b16 %v8391_v8  ;;  %v1273_v51 = vadd.f32 %v8214_v0, %v8156_v37  ;;  %v7408_v37 = vld [vmem:[%s8841_s3 + $0x70] sm:$0xff] }
 0x168   : > { %v2077_v49 = vrot.slane %v2075_v33, 7  ;;  %v2030_v40 = vadd.f32 %v8296_v21, %v2018_v55  ;;  %v3990_v62 = vpack.c.b16 %v3976_v1, %v3975_v24  ;;  %v7416_v55 = vld [vmem:[%s8841_s3 + $0xb0] sm:$0xff]  ;;  %4579 = vmatpush.bf16.msrb.mxu1 %v7408_v37 }
 0x169   : > { %v1977_v4 = vpop.f32.mrf.mxu3  ;;  %4302 = vmatmul.bf16.vlgmr.msra.gmra.mxu1 %v4126_v61  ;;  %v4003_v45 = vor.u32 %v4002_v17, %v3998_v38  ;;  %v7455_v61 = vld [vmem:[%s8841_s3 + $0x1e8] sm:$0xff]  ;;  %v1302_v47 = vadd.f32 %v8221_v3, %v1273_v51  ;;  %4608 = vmatpush.bf16.msrb.mxu2 %v7416_v55  ;;  %v1555_v38 = vadd.f32 %v1554_v27, %v1526_v59  ;;  %v7414_v27 = vld [vmem:[%s8841_s3 + $0xa0] sm:$0xff] }
 0x16a   : > { %v2080_v32 = vor.u32 %v2078_v12, %v2077_v49  ;;  %v2081_v9 = vrot.slane %v2077_v49, 4  ;;  %v2038_v60 = vmax.f32 %v2030_v40, 0.0  ;;  %v1978_v20 = vadd.f32 %v1977_v4, %v1948_v53  ;;  %v7415_v3 = vld [vmem:[%s8841_s3 + $0xa8] sm:$0xff]  ;;  %5021 = vmatpush.bf16.msra.mxu0 %v7455_v61 }
 0x16b   : > { %v4054_v34 = vrot.slane %v3990_v62, 1  ;;  %v4007_v44 = vshll.u32 %v3990_v62, 16  ;;  %v4005_v52 = vshrl.u32 %v3990_v62, 16  ;;  %v2009_v49 = vpop.f32.mrf.mxu0  ;;  %v4061_v40 = vunpack.c.l.b16 %v4003_v45  ;;  %v7447_v61 = vld [vmem:[%s8841_s3 + $0x1a8] sm:$0xff] }
 0x16c   : > { %v2156_v23 = vsel %vm8323_vm4, %v2080_v32, %v2155_v42  ;;  %v2159_v48 = vsel %vm8334_vm5, %v2081_v9, %v2158_v18  ;;  %v2046_v26 = vpack.c.bf16 %v2038_v60, %v2038_v60  ;;  %v2007_v30 = vadd.f32 %v2006_v29, %v1978_v20  ;;  %v8401_v16 = vld [vmem:[#allocation2 + $0x18] sm:$0xf]  ;;  %v7454_v9 = vld [vmem:[%s8841_s3 + $0x1e0] sm:$0xff]  ;;  %4580 = vmatpush.bf16.msrb.mxu1 %v7407_v5 }
 0x16d   : > { %v8403_v31 = vld [vmem:[#allocation2 + $0x18] sm:$0xf]  ;;  %2157 = vst [vmem:[#allocation2 + $0x20] sm:$0xf] %v2156_v23  ;;  %v4064_v41 = vunpack.c.l.b16 %v4054_v34  ;;  %v3795_v7 = vunpack.c.l.b16 %v8401_v16  ;;  %v4009_v54 = vrot.slane %v4007_v44, 1  ;;  %v1556_v23 = vpop.f32.mrf.mxu1  ;;  %4609 = vmatpush.bf16.msrb.mxu2 %v7415_v3  ;;  %v7475_v16 = vld [vmem:[%s8843_s5 + $0x28] sm:$0xff] }
 0x16e   : > { %2160 = vst [vmem:[#allocation2 + $0x24] sm:$0x1] %v2159_v48  ;;  %v2083_v56 = vshrl.u32 %v2046_v26, 16  ;;  %v2019_v35 = vadd.f32 %v2007_v30, %v1552_v14  ;;  %v3946_v50 = vld [vmem:[#allocation2 + $0x1c] sm:$0x1]  ;;  %v3977_v33 = vunpack.c.l.b16 %v8403_v31  ;;  %v2086_v1 = vshll.u32 %v2046_v26, 16  ;;  %5022 = vmatpush.bf16.msra.mxu0 %v7454_v9 }
 0x16f   : > { %v4128_v53 = vpack.c.b16 %v4064_v41, %v4062_v28  ;;  %v4384_v58 = vpack.c.b16 %v3795_v7, %v3793_v39  ;;  %v4010_v24 = vor.u32 %v4009_v54, %v4005_v52  ;;  %v3978_v29 = vunpack.c.l.b16 %v3946_v50  ;;  %v7406_v41 = vld [vmem:[%s8841_s3 + $0x60] sm:$0xff] }
 0x170   : > { %v2085_v0 = vrot.slane %v2083_v56, 7  ;;  %v2031_v36 = vadd.f32 %v8296_v21, %v2019_v35  ;;  %v1499_v28 = vadd.f32 %v8258_v22, %v1302_v47  ;;  %v7453_v35 = vld [vmem:[%s8841_s3 + $0x1d8] sm:$0xff]  ;;  %4581 = vmatpush.bf16.msrb.mxu1 %v7406_v41  ;;  %v7404_v41 = vld [vmem:[%s8841_s3 + $0x50] sm:$0xff] }
 0x171   : > { %4360 = vmatmul.bf16.vlgmr.msrb.gmra.mxu3 %v4128_v53  ;;  %v1980_v12 = vpop.f32.mrf.mxu3  ;;  %4562 = vmatmul.bf16.gmra.mxu0 %v4384_v58  ;;  %v4063_v62 = vunpack.c.l.b16 %v4010_v24  ;;  %v3991_v32 = vpack.c.b16 %v3978_v29, %v3977_v33  ;;  %v2167_v24 = vld [vmem:[#allocation2 + $0x30] sm:$0xf] }
 0x172   : > { %v2088_v14 = vor.u32 %v2086_v1, %v2085_v0  ;;  %v2089_v42 = vrot.slane %v2085_v0, 4  ;;  %v2039_v18 = vmax.f32 %v2031_v36, 0.0  ;;  %v1981_v4 = vadd.f32 %v1980_v12, %v1951_v57  ;;  %v7448_v57 = vld [vmem:[%s8841_s3 + $0x1b0] sm:$0xff]  ;;  %4610 = vmatpush.bf16.msrb.mxu2 %v7414_v27  ;;  %v7405_v12 = vld [vmem:[%s8841_s3 + $0x58] sm:$0xff]  ;;  %5023 = vmatpush.bf16.msra.mxu0 %v7453_v35 }
 0x173   : > { %v4127_v17 = vpack.c.b16 %v4063_v62, %v4061_v40  ;;  %v1528_v52 = vadd.f32 %v8239_v15, %v1499_v28  ;;  %v4055_v51 = vrot.slane %v3991_v32, 1  ;;  %v4014_v56 = vshll.u32 %v3991_v32, 16  ;;  %v2170_v15 = vld [vmem:[#allocation2 + $0x34] sm:$0x1]  ;;  %4991 = vmatpush.bf16.msra.mxu3 %v7448_v57  ;;  %v2011_v40 = vpop.f32.mrf.mxu0  ;;  %v2176_v57 = vld [vmem:[#allocation2 + $0x3c] sm:$0x1] }
 0x174   : > { %v2162_v60 = vsel %vm8323_vm4, %v2088_v14, %v2161_v10  ;;  %v2165_v20 = vsel %vm8334_vm5, %v2089_v42, %v2164_v43  ;;  %v2047_v25 = vpack.c.bf16 %v2039_v18, %v2039_v18  ;;  %v2010_v34 = vadd.f32 %v2009_v49, %v1981_v4  ;;  %v3947_v45 = vld [vmem:[#allocation2 + $0x20] sm:$0xf]  ;;  %v7413_v49 = vld [vmem:[%s8841_s3 + $0x98] sm:$0xff]  ;;  %v7452_v4 = vld [vmem:[%s8841_s3 + $0x1d0] sm:$0xff]  ;;  %4582 = vmatpush.bf16.msrb.mxu1 %v7405_v12 }
 0x175   : > { %2163 = vst [vmem:[#allocation2 + $0x28] sm:$0xf] %v2162_v60  ;;  %4331 = vmatmul.bf16.vlgmr.msra.gmra.mxu2 %v4127_v17  ;;  %v3948_v22 = vld [vmem:[#allocation2 + $0x24] sm:$0x1]  ;;  %v3979_v44 = vunpack.c.l.b16 %v3947_v45  ;;  %v8446_v31 = vld [vmem:[#allocation2 + $0x20] sm:$0xf]  ;;  %v1557_v37 = vadd.f32 %v1556_v23, %v1528_v52  ;;  %v4066_v14 = vunpack.c.l.b16 %v4055_v51 }
 0x176   : > { %2166 = vst [vmem:[#allocation2 + $0x2c] sm:$0x1] %v2165_v20  ;;  %v2091_v48 = vshrl.u32 %v2047_v25, 16  ;;  %v2020_v26 = vadd.f32 %v2010_v34, %v1555_v38  ;;  %v3980_v30 = vunpack.c.l.b16 %v3948_v22  ;;  %v2094_v58 = vshll.u32 %v2047_v25, 16  ;;  %v7412_v25 = vld [vmem:[%s8841_s3 + $0x90] sm:$0xff]  ;;  %4611 = vmatpush.bf16.msrb.mxu2 %v7413_v49  ;;  %5024 = vmatpush.bf16.msra.mxu0 %v7452_v4 }
 0x177   : > { %v4129_v54 = vpack.c.b16 %v3979_v44, %v3977_v33  ;;  %v1953_v33 = vpop.f32.mrf.mxu2  ;;  %v3797_v1 = vunpack.c.l.b16 %v8446_v31  ;;  %v4012_v36 = vshrl.u32 %v3991_v32, 16  ;;  %v4016_v29 = vrot.slane %v4014_v56, 1  ;;  %4992 = vmatpush.bf16.msra.mxu3 %v7447_v61  ;;  %v2173_v51 = vld [vmem:[#allocation2 + $0x38] sm:$0xf]  ;;  %v4640_v61 = vld [vmem:[#allocation2 + $0x1c] sm:$0x1] }
 0x178   : > { %v2093_v53 = vrot.slane %v2091_v48, 7  ;;  %v2032_v50 = vadd.f32 %v8296_v21, %v2020_v26  ;;  %v3992_v55 = vpack.c.b16 %v3980_v30, %v3979_v44  ;;  %v7446_v44 = vld [vmem:[%s8841_s3 + $0x1a0] sm:$0xff]  ;;  %v7451_v30 = vld [vmem:[%s8841_s3 + $0x1c8] sm:$0xff]  ;;  %4583 = vmatpush.bf16.msrb.mxu1 %v7404_v41 }
 0x179   : > { %v1982_v0 = vpop.f32.mrf.mxu3  ;;  %4307 = vmatmul.bf16.gmra.mxu1 %v4129_v54  ;;  %v4017_v42 = vor.u32 %v4016_v29, %v4012_v36  ;;  %v7450_v29 = vld [vmem:[%s8841_s3 + $0x1c0] sm:$0xff] }
 0x17a   : > { %v2096_v47 = vor.u32 %v2094_v58, %v2093_v53  ;;  %v2097_v59 = vrot.slane %v2093_v53, 4  ;;  %v2040_v10 = vmax.f32 %v2032_v50, 0.0  ;;  %v1983_v43 = vadd.f32 %v1982_v0, %v1953_v33  ;;  %v4638_v50 = vld [vmem:[#allocation2 + $0x14] sm:$0x1]  ;;  %4612 = vmatpush.bf16.msrb.mxu2 %v7412_v25  ;;  %v7445_v33 = vld [vmem:[%s8841_s3 + $0x198] sm:$0xff]  ;;  %5025 = vmatpush.bf16.msra.mxu0 %v7451_v30  ;;  %v7410_v30 = vld [vmem:[%s8841_s3 + $0x80] sm:$0xff] }
 0x17b   : > { %v4056_v62 = vrot.slane %v3992_v55, 1  ;;  %v4021_v18 = vshll.u32 %v3992_v55, 16  ;;  %v4019_v60 = vshrl.u32 %v3992_v55, 16  ;;  %v4065_v53 = vunpack.c.l.b16 %v4017_v42  ;;  %4993 = vmatpush.bf16.msra.mxu3 %v7446_v44  ;;  %v8504_v0 = vld [vmem:[#allocation2 + $0x18] sm:$0xf] }
 0x17c   : > { %v2168_v3 = vsel %vm8323_vm4, %v2096_v47, %v2167_v24  ;;  %v2171_v5 = vsel %vm8334_vm5, %v2097_v59, %v2170_v15  ;;  %v2048_v11 = vpack.c.bf16 %v2040_v10, %v2040_v10  ;;  %v2012_v28 = vadd.f32 %v2011_v40, %v1983_v43  ;;  %v8476_v38 = vld [vmem:[#allocation2 + $0x28] sm:$0xf]  ;;  %v8499_v24 = vld [vmem:[#allocation2 + $0x10] sm:$0xf]  ;;  %v8518_v12 = vld [vmem:[#allocation2 + $0x4] sm:$0x1] }
 0x17d   : > { %v8478_v17 = vld [vmem:[#allocation2 + $0x28] sm:$0xf]  ;;  %2169 = vst [vmem:[#allocation2 + $0x30] sm:$0xf] %v2168_v3  ;;  %v4068_v32 = vunpack.c.l.b16 %v4056_v62  ;;  %v3799_v9 = vunpack.c.l.b16 %v8476_v38  ;;  %v4023_v20 = vrot.slane %v4021_v18, 1  ;;  %v4670_v42 = vunpack.c.l.b16 %v4638_v50 }
 0x17e   : > { %2172 = vst [vmem:[#allocation2 + $0x34] sm:$0x1] %v2171_v5  ;;  %v2099_v34 = vshrl.u32 %v2048_v11, 16  ;;  %v2021_v45 = vadd.f32 %v2012_v28, %v1557_v37  ;;  %v3950_v22 = vld [vmem:[#allocation2 + $0x2c] sm:$0x1]  ;;  %v3981_v26 = vunpack.c.l.b16 %v8478_v17  ;;  %v2102_v54 = vshll.u32 %v2048_v11, 16  ;;  %5026 = vmatpush.bf16.msra.mxu0 %v7450_v29 }
 0x17f   : > { %v4131_v27 = vpack.c.b16 %v4068_v32, %v4066_v14  ;;  %v4387_v23 = vpack.c.b16 %v3799_v9, %v3797_v1  ;;  %v4024_v48 = vor.u32 %v4023_v20, %v4019_v60  ;;  %v3982_v35 = vunpack.c.l.b16 %v3950_v22  ;;  %v7403_v47 = vld [vmem:[%s8841_s3 + $0x48] sm:$0xff]  ;;  %4994 = vmatpush.bf16.msra.mxu3 %v7445_v33  ;;  %v7444_v28 = vld [vmem:[%s8841_s3 + $0x190] sm:$0xff]  ;;  %v7402_v20 = vld [vmem:[%s8841_s3 + $0x40] sm:$0xff] }
 0x180   : > { %v2101_v52 = vrot.slane %v2099_v34, 7  ;;  %v2033_v56 = vadd.f32 %v8296_v21, %v2021_v45  ;;  %v4669_v14 = vunpack.c.l.b16 %v8499_v24  ;;  %v4671_v3 = vunpack.c.l.b16 %v8504_v0  ;;  %v7411_v11 = vld [vmem:[%s8841_s3 + $0x88] sm:$0xff]  ;;  %4584 = vmatpush.bf16.msrb.mxu1 %v7403_v47 }
 0x181   : > { %4365 = vmatmul.bf16.gmra.mxu3 %v4131_v27  ;;  %4567 = vmatmul.bf16.gmra.mxu0 %v4387_v23  ;;  %v4067_v58 = vunpack.c.l.b16 %v4024_v48  ;;  %v8506_v36 = vpack.c.b16 %v3982_v35, %v3981_v26  ;;  %v4672_v5 = vunpack.c.l.b16 %v4640_v61  ;;  %v3790_v44 = vunpack.c.l.b16 %v8518_v12  ;;  %v2179_v27 = vld [vmem:[#allocation2 + $0x40] sm:$0xf]  ;;  %v2182_v23 = vld [vmem:[#allocation2 + $0x44] sm:$0x1]  ;;  %v3760_v35 = vld [vmem:[#allocation2 + $0xc] sm:$0x1] }
 0x182   : > { %v2104_v55 = vor.u32 %v2102_v54, %v2101_v52  ;;  %v2105_v37 = vrot.slane %v2101_v52, 4  ;;  %v2041_v15 = vmax.f32 %v2033_v56, 0.0  ;;  %4613 = vmatpush.bf16.msrb.mxu2 %v7411_v11  ;;  %v7443_v56 = vld [vmem:[%s8841_s3 + $0x188] sm:$0xff] }
 0x183   : > { %v4130_v21 = vpack.c.b16 %v4067_v58, %v4065_v53  ;;  %v4057_v32 = vrot.slane %v8506_v36, 1  ;;  %v4028_v60 = vshll.u32 %v8506_v36, 16  ;;  %4995 = vmatpush.bf16.msra.mxu3 %v7444_v28  ;;  %v4026_v58 = vshrl.u32 %v8506_v36, 16 }
 0x184   : > { %v2174_v59 = vsel %vm8323_vm4, %v2104_v55, %v2173_v51  ;;  %v2177_v10 = vsel %vm8334_vm5, %v2105_v37, %v2176_v57  ;;  %v2049_v43 = vpack.c.bf16 %v2041_v15, %v2041_v15  ;;  %v3951_v49 = vld [vmem:[#allocation2 + $0x30] sm:$0xf]  ;;  %v8545_v51 = vpack.c.b16 %v4672_v5, %v4671_v3  ;;  %4585 = vmatpush.bf16.msrb.mxu1 %v7402_v20 }
 0x185   : > { %2175 = vst [vmem:[#allocation2 + $0x38] sm:$0xf] %v2174_v59  ;;  %4336 = vmatmul.bf16.gmra.mxu2 %v4130_v21  ;;  %v3952_v40 = vld [vmem:[#allocation2 + $0x34] sm:$0x1]  ;;  %v3983_v62 = vunpack.c.l.b16 %v3951_v49  ;;  %v8533_v22 = vld [vmem:[#allocation2 + $0x30] sm:$0xf]  ;;  %v4070_v57 = vunpack.c.l.b16 %v4057_v32 }
 0x186   : > { %2178 = vst [vmem:[#allocation2 + $0x3c] sm:$0x1] %v2177_v10  ;;  %v2107_v18 = vshrl.u32 %v2049_v43, 16  ;;  %v3984_v4 = vunpack.c.l.b16 %v3952_v40  ;;  %v2110_v34 = vshll.u32 %v2049_v43, 16  ;;  %v4030_v48 = vrot.slane %v4028_v60, 1  ;;  %4614 = vmatpush.bf16.msrb.mxu2 %v7410_v30 }
 0x187   : > { %v4132_v17 = vpack.c.b16 %v3983_v62, %v3981_v26  ;;  %v8538_v26 = vpack.c.b16 %v4670_v42, %v4669_v14  ;;  %v3801_v53 = vunpack.c.l.b16 %v8533_v22  ;;  %v3792_v10 = vunpack.c.l.b16 %v3760_v35  ;;  %4996 = vmatpush.bf16.msra.mxu3 %v7443_v56  ;;  %v8576_v60 = vld [vmem:[#allocation2 + $0x28] sm:$0xf]  ;;  %v7470_v22 = vld [vmem:[%s8843_s5] sm:$0xff] }
 0x188   : > { %v2109_v25 = vrot.slane %v2107_v18, 7  ;;  %v3994_v45 = vpack.c.b16 %v3984_v4, %v3983_v62  ;;  %v4031_v47 = vor.u32 %v4030_v48, %v4026_v58  ;;  %v4703_v49 = vshll.u32 %v8545_v51, 16 }
 0x189   : > { %4312 = vmatmul.bf16.gmra.mxu1 %v4132_v17  ;;  %v8569_v42 = vpack.c.b16 %v3790_v44, %v3789_v2  ;;  %v4696_v11 = vshll.u32 %v8538_v26, 16  ;;  %v8574_v28 = vpack.c.b16 %v3792_v10, %v3791_v46  ;;  %v4701_v19 = vshrl.u32 %v8545_v51, 16  ;;  %v7465_v46 = vld [vmem:[%s8841_s3 + $0x238] sm:$0xff] }
 0x18a   : > { %v2112_v41 = vor.u32 %v2110_v34, %v2109_v25  ;;  %v2113_v52 = vrot.slane %v2109_v25, 4  ;;  %v4058_v54 = vrot.slane %v3994_v45, 1  ;;  %v4035_v50 = vshll.u32 %v3994_v45, 16  ;;  %v4644_v25 = vld [vmem:[#allocation2 + $0x2c] sm:$0x1]  ;;  %5197 = vmatpush.bf16.msra.mxu2 %v7477_v6  ;;  %7509 = vmatpush.bf16.msra.mxu1 %v7465_v46 }
 0x18b   : > { %v4033_v21 = vshrl.u32 %v3994_v45, 16  ;;  %v4069_v18 = vunpack.c.l.b16 %v4031_v47  ;;  %v4705_v17 = vrot.slane %v4703_v49, 1  ;;  %4997 = vmatpush.bf16.msra.mxu3 %v7442_v13  ;;  %v3816_v34 = vshll.u32 %v8569_v42, 16  ;;  %5048 = vmatpush.bf16.msrb.mxu0 %v7465_v46  ;;  %v7476_v47 = vld [vmem:[%s8843_s5 + $0x30] sm:$0xff]  ;;  %v3764_v49 = vld [vmem:[#allocation2 + $0x1c] sm:$0x1] }
 0x18c   : > { %v2180_v55 = vsel %vm8323_vm4, %v2112_v41, %v2179_v27  ;;  %v2183_v37 = vsel %vm8334_vm5, %v2113_v52, %v2182_v23  ;;  %v4072_v15 = vunpack.c.l.b16 %v4058_v54  ;;  %v8556_v33 = vld [vmem:[#allocation2 + $0x38] sm:$0xf]  ;;  %v4037_v59 = vrot.slane %v4035_v50, 1  ;;  %v8588_v52 = vld [vmem:[#allocation2 + $0x20] sm:$0xf] }
 0x18d   : > { %v3953_v29 = vld [vmem:[#allocation2 + $0x38] sm:$0xf]  ;;  %2181 = vst [vmem:[#allocation2 + $0x40] sm:$0xf] %v2180_v55  ;;  %v3803_v61 = vunpack.c.l.b16 %v8556_v33  ;;  %v3954_v63 = vld [vmem:[#allocation2 + $0x3c] sm:$0x1]  ;;  %v4706_v41 = vor.u32 %v4705_v17, %v4701_v19  ;;  %v4676_v58 = vunpack.c.l.b16 %v4644_v25 }
 0x18e   : > { %v3985_v36 = vunpack.c.l.b16 %v3953_v29  ;;  %2184 = vst [vmem:[#allocation2 + $0x44] sm:$0x1] %v2183_v37  ;;  %v4134_v43 = vpack.c.b16 %v4072_v15, %v4070_v57  ;;  %v4038_v40 = vor.u32 %v4037_v59, %v4033_v21  ;;  %v3986_v62 = vunpack.c.l.b16 %v3954_v63  ;;  %v4642_v54 = vld [vmem:[#allocation2 + $0x24] sm:$0x1]  ;;  %v7464_v59 = vld [vmem:[%s8841_s3 + $0x230] sm:$0xff]  ;;  %5198 = vmatpush.bf16.msra.mxu2 %v7476_v47 }
 0x18f   : > { %v4390_v12 = vpack.c.b16 %v3803_v61, %v3801_v53  ;;  %v4698_v27 = vrot.slane %v4696_v11, 1  ;;  %v3823_v23 = vshll.u32 %v8574_v28, 16  ;;  %v4694_v30 = vshrl.u32 %v8538_v26, 16  ;;  %7517 = vmatpush.bf16.msrb.mxu3 %v7477_v6  ;;  %7510 = vmatpush.bf16.msra.mxu1 %v7464_v59 }
 0x190   : > { %v4071_v4 = vunpack.c.l.b16 %v4038_v40  ;;  %v3995_v5 = vpack.c.b16 %v3986_v62, %v3985_v36  ;;  %v4675_v57 = vunpack.c.l.b16 %v8576_v60  ;;  %v3814_v37 = vshrl.u32 %v8569_v42, 16  ;;  %5049 = vmatpush.bf16.msrb.mxu0 %v7464_v59  ;;  %v8628_v59 = vld [vmem:[#allocation2 + $0x30] sm:$0xf] }
 0x191   : > { %4370 = vmatmul.bf16.gmra.mxu3 %v4134_v43  ;;  %4572 = vmatmul.bf16.gmra.mxu0 %v4390_v12  ;;  %v4699_v15 = vor.u32 %v4698_v27, %v4694_v30  ;;  %v4673_v21 = vunpack.c.l.b16 %v8588_v52  ;;  %v4674_v29 = vunpack.c.l.b16 %v4642_v54  ;;  %v3818_v63 = vrot.slane %v3816_v34, 1 }
 0x192   : > { %v4133_v32 = vpack.c.b16 %v4071_v4, %v4069_v18  ;;  %v4042_v2 = vshll.u32 %v3995_v5, 16  ;;  %v4059_v35 = vrot.slane %v3995_v5, 1  ;;  %v4040_v10 = vshrl.u32 %v3995_v5, 16  ;;  %5199 = vmatpush.bf16.msra.mxu2 %v7475_v16 }
 0x193   : > { %v4759_v12 = vunpack.c.l.b16 %v4706_v41  ;;  %v3825_v40 = vrot.slane %v3823_v23, 1  ;;  %v8601_v62 = vpack.c.b16 %v4676_v58, %v4675_v57  ;;  %7518 = vmatpush.bf16.msrb.mxu3 %v7476_v47  ;;  %v3821_v5 = vshrl.u32 %v8574_v28, 16 }
 0x194   : > { %v3955_v20 = vld [vmem:[#allocation2 + $0x40] sm:$0xf]  ;;  %v4044_v55 = vrot.slane %v4042_v2, 1  ;;  %v4074_v13 = vunpack.c.l.b16 %v4059_v35  ;;  %v8606_v19 = vpack.c.b16 %v4674_v29, %v4673_v21  ;;  %v3796_v2 = vunpack.c.l.b16 %v3764_v49 }
 0x195   : > { %4341 = vmatmul.bf16.gmra.mxu2 %v4133_v32  ;;  %v3956_v45 = vld [vmem:[#allocation2 + $0x44] sm:$0x1]  ;;  %v3987_v44 = vunpack.c.l.b16 %v3955_v20  ;;  %v3762_v32 = vld [vmem:[#allocation2 + $0x14] sm:$0x1]  ;;  %v4757_v20 = vunpack.c.l.b16 %v4699_v15  ;;  %v3826_v27 = vor.u32 %v3825_v40, %v3821_v5  ;;  %v4717_v6 = vshll.u32 %v8601_v62, 16 }
 0x196   : > { %v3988_v48 = vunpack.c.l.b16 %v3956_v45  ;;  %v4045_v4 = vor.u32 %v4044_v55, %v4040_v10  ;;  %v3794_v46 = vunpack.c.l.b16 %v3762_v32  ;;  %v4710_v30 = vshll.u32 %v8606_v19, 16  ;;  %v4648_v55 = vld [vmem:[#allocation2 + $0x3c] sm:$0x1] }
 0x197   : > { %v4135_v56 = vpack.c.b16 %v3987_v44, %v3985_v36  ;;  %v4823_v45 = vpack.c.b16 %v4759_v12, %v4757_v20  ;;  %v8612_v41 = vpack.c.b16 %v3796_v2, %v3795_v7  ;;  %v3879_v35 = vunpack.c.l.b16 %v3826_v27  ;;  %v7463_v7 = vld [vmem:[%s8841_s3 + $0x228] sm:$0xff]  ;;  %7519 = vmatpush.bf16.msrb.mxu3 %v7475_v16  ;;  %v7461_v16 = vld [vmem:[%s8841_s3 + $0x218] sm:$0xff] }
 0x198   : > { %v3996_v50 = vpack.c.b16 %v3988_v48, %v3987_v44  ;;  %v3819_v44 = vor.u32 %v3818_v63, %v3814_v37  ;;  %v4073_v23 = vunpack.c.l.b16 %v4045_v4  ;;  %v4719_v58 = vrot.slane %v4717_v6, 1  ;;  %7511 = vmatpush.bf16.msra.mxu1 %v7463_v7  ;;  %5050 = vmatpush.bf16.msrb.mxu0 %v7463_v7  ;;  %v7462_v4 = vld [vmem:[%s8841_s3 + $0x220] sm:$0xff] }
 0x199   : > { %4317 = vmatmul.bf16.gmra.mxu1 %v4135_v56  ;;  %v8618_v37 = vpack.c.b16 %v3794_v46, %v3793_v39  ;;  %v4712_v15 = vrot.slane %v4710_v30, 1  ;;  %v4715_v29 = vshrl.u32 %v8601_v62, 16  ;;  %v3837_v47 = vshll.u32 %v8612_v41, 16 }
 0x19a   : > { %v4060_v36 = vrot.slane %v3996_v50, 1  ;;  %v4049_v43 = vshll.u32 %v3996_v50, 16  ;;  %v4047_v11 = vshrl.u32 %v3996_v50, 16  ;;  %v3877_v56 = vunpack.c.l.b16 %v3819_v44  ;;  %v8614_v50 = vld [vmem:[#allocation2 + $0x38] sm:$0xf] }
 0x19b   : > { %v4679_v8 = vunpack.c.l.b16 %v8614_v50  ;;  %v4680_v39 = vunpack.c.l.b16 %v4648_v55  ;;  %v4720_v63 = vor.u32 %v4719_v58, %v4715_v29  ;;  %v3830_v49 = vshll.u32 %v8618_v37, 16 }
 0x19c   : > { %v4076_v18 = vunpack.c.l.b16 %v4060_v36  ;;  %v4051_v17 = vrot.slane %v4049_v43, 1  ;;  %v4646_v36 = vld [vmem:[#allocation2 + $0x34] sm:$0x1]  ;;  %v4382_v10 = vpack.c.b16 %v3879_v35, %v3877_v56  ;;  %v4708_v43 = vshrl.u32 %v8606_v19, 16  ;;  %7512 = vmatpush.bf16.msra.mxu1 %v7462_v4  ;;  %5051 = vmatpush.bf16.msrb.mxu0 %v7462_v4 }
 0x19d   : > { %v4677_v12 = vunpack.c.l.b16 %v8628_v59  ;;  %v4678_v40 = vunpack.c.l.b16 %v4646_v36  ;;  %v3839_v5 = vrot.slane %v3837_v47, 1  ;;  %v8643_v32 = vpack.c.b16 %v4680_v39, %v4679_v8  ;;  %v8674_v47 = vld [vmem:[#allocation2 + $0x40] sm:$0xf]  ;;  %v4650_v39 = vld [vmem:[#allocation2 + $0x44] sm:$0x1] }
 0x19e   : > { %v4137_v25 = vpack.c.b16 %v4076_v18, %v4074_v13  ;;  %v4052_v34 = vor.u32 %v4051_v17, %v4047_v11  ;;  %v4713_v13 = vor.u32 %v4712_v15, %v4708_v43  ;;  %v7474_v18 = vld [vmem:[%s8843_s5 + $0x20] sm:$0xff]  ;;  %v4749_v11 = vrot.slane %v8538_v26, 1  ;;  %v3768_v17 = vld [vmem:[#allocation2 + $0x2c] sm:$0x1] }
 0x19f   : > { %v4750_v20 = vrot.slane %v8545_v51, 1  ;;  %v4763_v2 = vunpack.c.l.b16 %v4720_v63  ;;  %5200 = vmatpush.bf16.msra.mxu2 %v7474_v18  ;;  %v3835_v44 = vshrl.u32 %v8612_v41, 16  ;;  %7520 = vmatpush.bf16.msrb.mxu3 %v7474_v18  ;;  %v3800_v6 = vunpack.c.l.b16 %v3768_v17  ;;  %v4652_v43 = vld [vmem:[#allocation2 + $0x4c] sm:$0x1] }
 0x1a0   : > { %v4075_v48 = vunpack.c.l.b16 %v4052_v34  ;;  %v3870_v34 = vrot.slane %v8574_v28, 1  ;;  %v8649_v26 = vunpack.c.l.b16 %v4749_v11  ;;  %v4761_v46 = vunpack.c.l.b16 %v4713_v13  ;;  %5052 = vmatpush.bf16.msrb.mxu0 %v7461_v16  ;;  %7513 = vmatpush.bf16.msra.mxu1 %v7461_v16 }
 0x1a1   : > { %4375 = vmatmul.bf16.gmra.mxu3 %v4137_v25  ;;  %5027 = vmatmul.bf16.vlgmr.msra.gmra.mxu0 %v4823_v45  ;;  %v3869_v25 = vrot.slane %v8569_v42, 1  ;;  %v3832_v45 = vrot.slane %v3830_v49, 1  ;;  %v8651_v27 = vunpack.c.l.b16 %v4750_v20  ;;  %v8655_v51 = vpack.c.b16 %v4678_v40, %v4677_v12  ;;  %v3766_v42 = vld [vmem:[#allocation2 + $0x24] sm:$0x1]  ;;  %v7460_v49 = vld [vmem:[%s8841_s3 + $0x210] sm:$0xff] }
 0x1a2   : > { %v4136_v54 = vpack.c.b16 %v4075_v48, %v4073_v23  ;;  %v3828_v28 = vshrl.u32 %v8618_v37, 16  ;;  %v3840_v23 = vor.u32 %v3839_v5, %v3835_v44  ;;  %v4731_v48 = vshll.u32 %v8643_v32, 16 }
 0x1a3   : > { %v4824_v30 = vpack.c.b16 %v8651_v27, %v8649_v26  ;;  %v4826_v56 = vpack.c.b16 %v4763_v2, %v4761_v46  ;;  %v3878_v35 = vunpack.c.l.b16 %v3869_v25  ;;  %v3880_v58 = vunpack.c.l.b16 %v3870_v34  ;;  %v7459_v2 = vld [vmem:[%s8841_s3 + $0x208] sm:$0xff]  ;;  %v7472_v25 = vld [vmem:[%s8843_s5 + $0x10] sm:$0xff] }
 0x1a4   : > { %v3833_v55 = vor.u32 %v3832_v45, %v3828_v28  ;;  %v3798_v15 = vunpack.c.l.b16 %v3766_v42  ;;  %v4724_v29 = vshll.u32 %v8655_v51, 16  ;;  %v8671_v7 = vpack.c.b16 %v3800_v6, %v3799_v9  ;;  %v7473_v9 = vld [vmem:[%s8843_s5 + $0x18] sm:$0xff]  ;;  %5053 = vmatpush.bf16.msrb.mxu0 %v7460_v49  ;;  %7514 = vmatpush.bf16.msra.mxu1 %v7460_v49  ;;  %v7471_v49 = vld [vmem:[%s8843_s5 + $0x8] sm:$0xff]  ;;  %v7466_v27 = vld [vmem:[%s7802_s20 + $0xdc] sm:$0xf0] }
 0x1a5   : > { %4346 = vmatmul.bf16.gmra.mxu2 %v4136_v54  ;;  %v4822_v54 = vpack.c.b16 %v4671_v3, %v4669_v14  ;;  %v3883_v24 = vunpack.c.l.b16 %v3840_v23  ;;  %v4733_v0 = vrot.slane %v4731_v48, 1  ;;  %v4383_v14 = vpack.c.b16 %v3880_v58, %v3878_v35  ;;  %7521 = vmatpush.bf16.msrb.mxu3 %v7473_v9  ;;  %v3772_v45 = vld [vmem:[#allocation2 + $0x3c] sm:$0x1]  ;;  %v7111_v26 = vld [vmem:[%s7802_s20 + $0xd8] sm:$0xf] }
 0x1a6   : > { %v4729_v3 = vshrl.u32 %v8643_v32, 16  ;;  %v3881_v36 = vunpack.c.l.b16 %v3833_v55  ;;  %v8680_v63 = vpack.c.b16 %v3798_v15, %v3797_v1  ;;  %v4726_v38 = vrot.slane %v4724_v29, 1  ;;  %5201 = vmatpush.bf16.msra.mxu2 %v7473_v9 }
 0x1a7   : > { %v4722_v40 = vshrl.u32 %v8655_v51, 16  ;;  %v3851_v4 = vshll.u32 %v8671_v7, 16  ;;  %v4681_v31 = vunpack.c.l.b16 %v8674_v47  ;;  %v4682_v1 = vunpack.c.l.b16 %v4650_v39 }
 0x1a8   : > { %v4385_v13 = vpack.c.b16 %v3883_v24, %v3881_v36  ;;  %v4734_v18 = vor.u32 %v4733_v0, %v4729_v3  ;;  %v4684_v17 = vunpack.c.l.b16 %v4652_v43  ;;  %v3844_v20 = vshll.u32 %v8680_v63, 16  ;;  %5054 = vmatpush.bf16.msrb.mxu0 %v7459_v2  ;;  %7515 = vmatpush.bf16.msra.mxu1 %v7459_v2 }
 0x1a9   : > { %4586 = vmatmul.bf16.vlgmr.msrb.gmra.mxu1 %v4382_v10  ;;  %v8676_v10 = vld [vmem:[#allocation2 + $0x48] sm:$0xf]  ;;  %v4727_v5 = vor.u32 %v4726_v38, %v4722_v40  ;;  %v3872_v34 = vrot.slane %v8612_v41, 1  ;;  %v3853_v6 = vrot.slane %v3851_v4, 1  ;;  %v8702_v46 = vpack.c.b16 %v4682_v1, %v4681_v31  ;;  %7522 = vmatpush.bf16.msrb.mxu3 %v7472_v25 }
 0x1aa   : > { %v4683_v11 = vunpack.c.l.b16 %v8676_v10  ;;  %v4767_v44 = vunpack.c.l.b16 %v4734_v18  ;;  %5202 = vmatpush.bf16.msra.mxu2 %v7472_v25  ;;  %v3871_v28 = vrot.slane %v8618_v37, 1  ;;  %v3846_v48 = vrot.slane %v3844_v20, 1  ;;  %v7458_v37 = vld [vmem:[%s8841_s3 + $0x200] sm:$0xff] }
 0x1ab   : > { %v4765_v23 = vunpack.c.l.b16 %v4727_v5  ;;  %v3849_v41 = vshrl.u32 %v8671_v7, 16  ;;  %v4825_v35 = vpack.c.b16 %v4675_v57, %v4673_v21  ;;  %v3884_v58 = vunpack.c.l.b16 %v3872_v34 }
 0x1ac   : > { %v8706_v42 = vpack.c.b16 %v4684_v17, %v4683_v11  ;;  %v3842_v55 = vshrl.u32 %v8680_v63, 16  ;;  %v4738_v16 = vshll.u32 %v8702_v46, 16  ;;  %v3882_v0 = vunpack.c.l.b16 %v3871_v28  ;;  %5055 = vmatpush.bf16.msrb.mxu0 %v7458_v37  ;;  %7516 = vmatpush.bf16.msra.mxu1 %v7458_v37 }
 0x1ad   : > { %v4829_v15 = vpack.c.b16 %v4767_v44, %v4765_v23  ;;  %v3854_v29 = vor.u32 %v3853_v6, %v3849_v41  ;;  %v4736_v9 = vshrl.u32 %v8702_v46, 16  ;;  %7523 = vmatpush.bf16.msrb.mxu3 %v7471_v49  ;;  %v3874_v1 = vrot.slane %v8671_v7, 1 }
 0x1ae   : > { %v4745_v24 = vshll.u32 %v8706_v42, 16  ;;  %v3847_v60 = vor.u32 %v3846_v48, %v3842_v55  ;;  %v4386_v21 = vpack.c.b16 %v3884_v58, %v3882_v0  ;;  %v4740_v3 = vrot.slane %v4738_v16, 1  ;;  %5203 = vmatpush.bf16.msra.mxu2 %v7471_v49  ;;  %v7115_v49 = vld [vmem:[%s7802_s20 + $0xe8] sm:$0xf] }
 0x1af   : > { %v4743_v36 = vshrl.u32 %v8706_v42, 16  ;;  %v3873_v5 = vrot.slane %v8680_v63, 1  ;;  %v4828_v25 = vpack.c.b16 %v4679_v8, %v4677_v12  ;;  %v4831_v50 = vpack.c.b16 %v4683_v11, %v4681_v31 }
 0x1b0   : > { %v4747_v39 = vrot.slane %v4745_v24, 1  ;;  %v3885_v38 = vunpack.c.l.b16 %v3847_v60  ;;  %v4741_v33 = vor.u32 %v4740_v3, %v4736_v9  ;;  %v4752_v12 = vrot.slane %v8601_v62, 1  ;;  %v7469_v62 = vld [vmem:[%s7802_s20 + $0x10c] sm:$0xf0] }
 0x1b1   : > { %4998 = vmatmul.bf16.vlgmr.msra.gmra.mxu3 %v4822_v54  ;;  %5032 = vmatmul.bf16.gmra.mxu0 %v4826_v56  ;;  %v3770_v54 = vld [vmem:[#allocation2 + $0x34] sm:$0x1]  ;;  %v3804_v56 = vunpack.c.l.b16 %v3772_v45  ;;  %v3888_v45 = vunpack.c.l.b16 %v3874_v1  ;;  %v3886_v28 = vunpack.c.l.b16 %v3873_v5  ;;  %v4751_v58 = vrot.slane %v8606_v19, 1 }
 0x1b2   : > { %v3802_v52 = vunpack.c.l.b16 %v3770_v54  ;;  %5204 = vmatpush.bf16.msra.mxu2 %v7470_v22  ;;  %7524 = vmatpush.bf16.msrb.mxu3 %v7470_v22  ;;  %v4764_v47 = vunpack.c.l.b16 %v4752_v12  ;;  %v7112_v0 = vor.u32 %v7466_v27, %v7111_v26  ;;  %v4753_v19 = vrot.slane %v8655_v51, 1 }
 0x1b3   : > { %v3812_v57 = vpack.c.b16 %v3804_v56, %v3803_v61  ;;  %v4748_v61 = vor.u32 %v4747_v39, %v4743_v36  ;;  %v4389_v23 = vpack.c.b16 %v3888_v45, %v3886_v28  ;;  %v4762_v10 = vunpack.c.l.b16 %v4751_v58  ;;  %v7468_v28 = vld [vmem:[%s7802_s20 + $0xfc] sm:$0xf0] }
 0x1b4   : > { %v3811_v43 = vpack.c.b16 %v3802_v52, %v3801_v53  ;;  %v4769_v53 = vunpack.c.l.b16 %v4741_v33  ;;  %v4755_v51 = vrot.slane %v8702_v46, 1  ;;  %v4756_v33 = vrot.slane %v8706_v42, 1 }
 0x1b5   : > { %4615 = vmatmul.bf16.vlgmr.msrb.gmra.mxu2 %v4383_v14  ;;  %v3887_v14 = vunpack.c.l.b16 %v3854_v29  ;;  %v3865_v40 = vshll.u32 %v3812_v57, 16  ;;  %v4771_v4 = vunpack.c.l.b16 %v4748_v61  ;;  %v3863_v2 = vshrl.u32 %v3812_v57, 16 }
 0x1b6   : > { %v3858_v18 = vshll.u32 %v3811_v43, 16  ;;  %v3856_v44 = vshrl.u32 %v3811_v43, 16  ;;  %v3876_v54 = vrot.slane %v3812_v57, 1  ;;  %v3875_v56 = vrot.slane %v3811_v43, 1 }
 0x1b7   : > { %v3867_v17 = vrot.slane %v3865_v40, 1  ;;  %v4832_v34 = vpack.c.b16 %v4771_v4, %v4769_v53  ;;  %v4827_v11 = vpack.c.b16 %v4764_v47, %v4762_v10  ;;  %v4766_v57 = vunpack.c.l.b16 %v4753_v19 }
 0x1b8   : > { %v3860_v20 = vrot.slane %v3858_v18, 1  ;;  %v3892_v8 = vunpack.c.l.b16 %v3876_v54  ;;  %v4770_v53 = vunpack.c.l.b16 %v4755_v51  ;;  %v4772_v4 = vunpack.c.l.b16 %v4756_v33 }
 0x1b9   : > { %4591 = vmatmul.bf16.gmra.mxu1 %v4385_v13  ;;  %v4388_v13 = vpack.c.b16 %v3887_v14, %v3885_v38  ;;  %v3868_v6 = vor.u32 %v3867_v17, %v3863_v2 }
 0x1ba   : > { %v3861_v7 = vor.u32 %v3860_v20, %v3856_v44  ;;  %v4833_v20 = vpack.c.b16 %v4772_v4, %v4770_v53 }
 0x1bb   : > { %v3891_v48 = vunpack.c.l.b16 %v3868_v6  ;;  %v7119_v6 = vld [vmem:[%s7802_s20 + $0xf8] sm:$0xf] }
 0x1bc   : > { %v3889_v41 = vunpack.c.l.b16 %v3861_v7 }
 0x1be   : > { %v4391_v63 = vpack.c.b16 %v3891_v48, %v3889_v41  ;;  %v7120_v48 = vor.u32 %v7468_v28, %v7119_v6 }
 0x1c1   : > { %5003 = vmatmul.bf16.gmra.mxu3 %v4825_v35  ;;  %5037 = vmatmul.bf16.gmra.mxu0 %v4829_v15  ;;  %v3890_v35 = vunpack.c.l.b16 %v3875_v56  ;;  %v7123_v15 = vld [vmem:[%s7802_s20 + $0x108] sm:$0xf] }
 0x1c2   : > { %v7124_v29 = vor.u32 %v7469_v62, %v7123_v15 }
 0x1c3   : > { %v4392_v55 = vpack.c.b16 %v3892_v8, %v3890_v35 }
 0x1c5   : > { %4620 = vmatmul.bf16.gmra.mxu2 %v4386_v21 }
 0x1c9   : > { %4596 = vmatmul.bf16.gmra.mxu1 %v4388_v13  ;;  %v7467_v13 = vld [vmem:[%s7802_s20 + $0xec] sm:$0xf0] }
 0x1ca   : > { %v7116_v18 = vor.u32 %v7467_v13, %v7115_v49 }
 0x1d1   : > { %5008 = vmatmul.bf16.gmra.mxu3 %v4828_v25  ;;  %5042 = vmatmul.bf16.gmra.mxu0 %v4832_v34 }
 0x1d5   : > { %4625 = vmatmul.bf16.gmra.mxu2 %v4389_v23 }
 0x1d9   : > { %4601 = vmatmul.bf16.gmra.mxu1 %v4391_v63 }
 0x1de   : > { %v4558_v59 = vpop.f32.mrf.mxu0 }
 0x1e1   : > { %5013 = vmatmul.bf16.gmra.mxu3 %v4831_v50  ;;  %5056 = vmatmul.bf16.vlgmr.msrb.gmra.mxu0 %v4824_v30  ;;  %v4754_v30 = vrot.slane %v8643_v32, 1 }
 0x1e3   : > { %v4768_v52 = vunpack.c.l.b16 %v4754_v30 }
 0x1e5   : > { %4630 = vmatmul.bf16.gmra.mxu2 %v4392_v55  ;;  %v4830_v3 = vpack.c.b16 %v4768_v52, %v4766_v57 }
 0x1e6   : > { %v4303_v37 = vpop.f32.mrf.mxu1  ;;  %v4560_v31 = vpop.f32.mrf.mxu0 }
 0x1e9   : > { %5061 = vmatmul.bf16.vlgmr.msra.gmra.mxu1 %v4827_v11 }
 0x1ee   : > { %v4305_v16 = vpop.f32.mrf.mxu1  ;;  %v4563_v24 = vpop.f32.mrf.mxu0 }
 0x1f1   : > { %5220 = vmatmul.bf16.vlgmr.msrb.gmra.mxu3 %v7124_v29 }
 0x1f4   : > { %v4361_v60 = vpop.f32.mrf.mxu3 }
 0x1f5   : > { %5205 = vmatmul.bf16.vlgmr.msra.gmra.mxu2 %v7112_v0 }
 0x1f6   : > { %v4308_v21 = vpop.f32.mrf.mxu1  ;;  %v4565_v14 = vpop.f32.mrf.mxu0 }
 0x1f8   : > { %v4332_v36 = vpop.f32.mrf.mxu2 }
 0x1f9   : > { %v4333_v39 = vadd.f32 %v4332_v36, %v4303_v37  ;;  %5066 = vmatmul.bf16.gmra.mxu1 %v4830_v3 }
 0x1fb   : > { %v4362_v43 = vadd.f32 %v4361_v60, %v4333_v39 }
 0x1fc   : > { %v4363_v38 = vpop.f32.mrf.mxu3 }
 0x1fd   : > { %v4559_v46 = vadd.f32 %v4558_v59, %v4362_v43 }
 0x1fe   : > { %v4310_v9 = vpop.f32.mrf.mxu1  ;;  %v4568_v32 = vpop.f32.mrf.mxu0 }
 0x200   : > { %v4334_v61 = vpop.f32.mrf.mxu2 }
 0x201   : > { %v4335_v40 = vadd.f32 %v4334_v61, %v4305_v16 }
 0x203   : > { %v4364_v22 = vadd.f32 %v4363_v38, %v4335_v40 }
 0x204   : > { %v4366_v1 = vpop.f32.mrf.mxu3 }
 0x205   : > { %5210 = vmatmul.bf16.gmra.mxu2 %v7116_v18  ;;  %v4561_v63 = vadd.f32 %v4560_v31, %v4364_v22 }
 0x206   : > { %v4313_v17 = vpop.f32.mrf.mxu1  ;;  %v4570_v5 = vpop.f32.mrf.mxu0 }
 0x208   : > { %v4337_v2 = vpop.f32.mrf.mxu2 }
 0x209   : > { %v4338_v25 = vadd.f32 %v4337_v2, %v4308_v21  ;;  %5071 = vmatmul.bf16.gmra.mxu1 %v4833_v20 }
 0x20b   : > { %v4367_v34 = vadd.f32 %v4366_v1, %v4338_v25 }
 0x20c   : > { %v4368_v45 = vpop.f32.mrf.mxu3 }
 0x20d   : > { %v4564_v56 = vadd.f32 %v4563_v24, %v4367_v34 }
 0x20e   : > { %v4315_v42 = vpop.f32.mrf.mxu1  ;;  %v4573_v44 = vpop.f32.mrf.mxu0 }
 0x210   : > { %v4339_v7 = vpop.f32.mrf.mxu2 }
 0x211   : > { %v4340_v23 = vadd.f32 %v4339_v7, %v4310_v9 }
 0x213   : > { %v4369_v41 = vadd.f32 %v4368_v45, %v4340_v23 }
 0x214   : > { %v4371_v54 = vpop.f32.mrf.mxu3 }
 0x215   : > { %5215 = vmatmul.bf16.gmra.mxu2 %v7120_v48  ;;  %v4566_v59 = vadd.f32 %v4565_v14, %v4369_v41 }
 0x216   : > { %v4318_v50 = vpop.f32.mrf.mxu1  ;;  %v4575_v8 = vpop.f32.mrf.mxu0 }
 0x218   : > { %v4342_v12 = vpop.f32.mrf.mxu2 }
 0x219   : > { %v4343_v35 = vadd.f32 %v4342_v12, %v4313_v17 }
 0x21b   : > { %v4372_v58 = vadd.f32 %v4371_v54, %v4343_v35 }
 0x21c   : > { %v4373_v55 = vpop.f32.mrf.mxu3 }
 0x21d   : > { %v4569_v29 = vadd.f32 %v4568_v32, %v4372_v58 }
 0x21e   : > { %v4320_v47 = vpop.f32.mrf.mxu1  ;;  %v5028_v10 = vpop.f32.mrf.mxu0 }
 0x220   : > { %v4344_v37 = vpop.f32.mrf.mxu2 }
 0x221   : > { %v4345_v11 = vadd.f32 %v4344_v37, %v4315_v42 }
 0x223   : > { %v4374_v15 = vadd.f32 %v4373_v55, %v4345_v11 }
 0x224   : > { %v4376_v62 = vpop.f32.mrf.mxu3 }
 0x225   : > { %v4571_v19 = vadd.f32 %v4570_v5, %v4374_v15 }
 0x226   : > { %v4587_v16 = vpop.f32.mrf.mxu1  ;;  %v5030_v26 = vpop.f32.mrf.mxu0 }
 0x227   : > { %v4588_v31 = vadd.f32 %v4587_v16, %v4559_v46 }
 0x228   : > { %v4347_v27 = vpop.f32.mrf.mxu2 }
 0x229   : > { %v4348_v30 = vadd.f32 %v4347_v27, %v4318_v50  ;;  %v8780_v27 = vld [vmem:[%s8844_s6] ss:$0 sm:$0xff] }
 0x22b   : > { %v4377_v24 = vadd.f32 %v4376_v62, %v4348_v30 }
 0x22c   : > { %v4378_v0 = vpop.f32.mrf.mxu3 }
 0x22d   : > { %v8759_v39 = vadd.f32 %v4573_v44, %v4377_v24  ;;  %v8785_v24 = vld [vmem:[%s8842_s4] ss:$0 sm:$0xff] }
 0x22e   : > { %v4589_v52 = vpop.f32.mrf.mxu1  ;;  %v5033_v60 = vpop.f32.mrf.mxu0 }
 0x22f   : > { %v4590_v57 = vadd.f32 %v4589_v52, %v4561_v63 }
 0x230   : > { %v4349_v21 = vpop.f32.mrf.mxu2 }
 0x231   : > { %v4350_v14 = vadd.f32 %v4349_v21, %v4320_v47 }
 0x233   : > { %v4379_v3 = vadd.f32 %v4378_v0, %v4350_v14 }
 0x234   : > { %v4999_v36 = vpop.f32.mrf.mxu3 }
 0x235   : > { %v8763_v13 = vadd.f32 %v4575_v8, %v4379_v3  ;;  %v5029_v28 = vadd.f32 %v5028_v10, %v4999_v36 }
 0x236   : > { %v4592_v43 = vpop.f32.mrf.mxu1  ;;  %v8761_v38 = vpop.f32.mrf.mxu0 }
 0x237   : > { %v4593_v9 = vadd.f32 %v4592_v43, %v4564_v56 }
 0x238   : > { %v4616_v32 = vpop.f32.mrf.mxu2 }
 0x239   : > { %v4617_v49 = vadd.f32 %v4616_v32, %v4588_v31 }
 0x23c   : > { %v5001_v61 = vpop.f32.mrf.mxu3 }
 0x23d   : > { %v5031_v15 = vadd.f32 %v5030_v26, %v5001_v61 }
 0x23e   : > { %v4594_v51 = vpop.f32.mrf.mxu1  ;;  %v5038_v33 = vpop.f32.mrf.mxu0 }
 0x23f   : > { %v8765_v40 = vadd.f32 %v4594_v51, %v4566_v59 }
 0x240   : > { %v4618_v18 = vpop.f32.mrf.mxu2 }
 0x241   : > { %v4619_v30 = vadd.f32 %v4618_v18, %v4590_v57 }
 0x244   : > { %v5004_v17 = vpop.f32.mrf.mxu3 }
 0x245   : > { %v5034_v56 = vadd.f32 %v5033_v60, %v5004_v17 }
 0x246   : > { %v4597_v22 = vpop.f32.mrf.mxu1  ;;  %v8767_v53 = vpop.f32.mrf.mxu0 }
 0x247   : > { %v4598_v4 = vadd.f32 %v4597_v22, %v4569_v29 }
 0x248   : > { %v4621_v1 = vpop.f32.mrf.mxu2 }
 0x249   : > { %v4622_v5 = vadd.f32 %v4621_v1, %v4593_v9 }
 0x24c   : > { %v5006_v46 = vpop.f32.mrf.mxu3 }
 0x24d   : > { %v5036_v51 = vadd.f32 %v8761_v38, %v5006_v46 }
 0x24e   : > { %v4599_v20 = vpop.f32.mrf.mxu1  ;;  %v5043_v2 = vpop.f32.mrf.mxu0 }
 0x24f   : > { %v8769_v25 = vadd.f32 %v4599_v20, %v4571_v19 }
 0x250   : > { %v4623_v34 = vpop.f32.mrf.mxu2 }
 0x254   : > { %v5009_v7 = vpop.f32.mrf.mxu3 }
 0x255   : > { %v5039_v37 = vadd.f32 %v5038_v33, %v5009_v7 }
 0x256   : > { %v4602_v45 = vpop.f32.mrf.mxu1  ;;  %v5045_v42 = vpop.f32.mrf.mxu0 }
 0x257   : > { %v4603_v61 = vadd.f32 %v4602_v45, %v8759_v39 }
 0x258   : > { %v4626_v44 = vpop.f32.mrf.mxu2 }
 0x259   : > { %v4627_v6 = vadd.f32 %v4626_v44, %v4598_v4 }
 0x25c   : > { %v8773_v12 = vpop.f32.mrf.mxu3 }
 0x25e   : > { %v4604_v23 = vpop.f32.mrf.mxu1  ;;  %v5057_v48 = vpop.f32.mrf.mxu0 }
 0x25f   : > { %v5058_v41 = vadd.f32 %v5057_v48, %v5029_v28  ;;  %v4605_v38 = vadd.f32 %v4604_v23, %v8763_v13 }
 0x260   : > { %v8771_v63 = vpop.f32.mrf.mxu2 }
 0x261   : > { %v5077_v54 = vadd.f32 %v5058_v41, %v4617_v49 }
 0x263   : > { %v5089_v60 = vadd.f32 %v8785_v24, %v5077_v54 }
 0x264   : > { %v5014_v47 = vpop.f32.mrf.mxu3 }
 0x265   : > { %v5044_v9 = vadd.f32 %v5043_v2, %v5014_v47 }
 0x266   : > { %v5062_v50 = vpop.f32.mrf.mxu1  ;;  %v5059_v10 = vpop.f32.mrf.mxu0 }
 0x267   : > { %v5063_v8 = vadd.f32 %v5062_v50, %v5034_v56  ;;  %v5060_v16 = vadd.f32 %v5059_v10, %v5031_v15 }
 0x268   : > { %v4631_v35 = vpop.f32.mrf.mxu2 }
 0x269   : > { %v5079_v58 = vadd.f32 %v5063_v8, %v4622_v5  ;;  %v5078_v19 = vadd.f32 %v5060_v16, %v4619_v30  ;;  %v4632_v17 = vadd.f32 %v4631_v35, %v4603_v61  ;;  %v4624_v5 = vadd.f32 %v4623_v34, %v8765_v40 }
 0x26b   : > { %v5090_v3 = vadd.f32 %v8785_v24, %v5078_v19 }
 0x26c   : > { %v5016_v0 = vpop.f32.mrf.mxu3 }
 0x26d   : > { %v5046_v46 = vadd.f32 %v5045_v42, %v5016_v0 }
 0x26e   : > { %v5064_v55 = vpop.f32.mrf.mxu1 }
 0x26f   : > { %v5065_v4 = vadd.f32 %v5064_v55, %v5036_v51 }
 0x270   : > { %v4633_v59 = vpop.f32.mrf.mxu2 }
 0x271   : > { %v5080_v2 = vadd.f32 %v5065_v4, %v4624_v5  ;;  %v4634_v39 = vadd.f32 %v4633_v59, %v4605_v38  ;;  %v5041_v59 = vadd.f32 %v8767_v53, %v8773_v12 }
 0x273   : > { %v5092_v54 = vadd.f32 %v8785_v24, %v5080_v2 }
 0x274   : > { %v5221_v43 = vpop.f32.mrf.mxu3 }
 0x275   : > { %v5222_v48 = vadd.f32 %v8780_v27, %v5221_v43 }
 0x276   : > { %v5067_v11 = vpop.f32.mrf.mxu1 }
 0x277   : > { %v5068_v62 = vadd.f32 %v5067_v11, %v5039_v37 }
 0x278   : > { %v5206_v29 = vpop.f32.mrf.mxu2 }
 0x279   : > { %v8775_v31 = vadd.f32 %v5068_v62, %v4627_v6  ;;  %v5207_v26 = vadd.f32 %v8780_v27, %v5206_v29  ;;  %v5091_v6 = vadd.f32 %v8785_v24, %v5079_v58  ;;  %v4629_v29 = vadd.f32 %v8771_v63, %v8769_v25 }
 0x27b   : > { %v5226_v14 = vadd.f32 %v5207_v26, %v5089_v60  ;;  %v5093_v0 = vadd.f32 %v8785_v24, %v8775_v31 }
 0x27c   : > { %v5223_v7 = vpop.f32.mrf.mxu3 }
 0x27d   : > { %v5234_v32 = vmax.f32 %v5226_v14, 0.0  ;;  %v5224_v42 = vadd.f32 %v8780_v27, %v5223_v7 }
 0x27e   : > { %v5069_v52 = vpop.f32.mrf.mxu1 }
 0x27f   : > { %v5070_v15 = vadd.f32 %v5069_v52, %v5041_v59 }
 0x280   : > { %v5208_v21 = vpop.f32.mrf.mxu2 }
 0x281   : > { %v5209_v57 = vadd.f32 %v8780_v27, %v5208_v21  ;;  %v5082_v16 = vadd.f32 %v5070_v15, %v4629_v29 }
 0x283   : > { %v5227_v36 = vadd.f32 %v5209_v57, %v5090_v3  ;;  %v5094_v12 = vadd.f32 %v8785_v24, %v5082_v16 }
 0x285   : > { %v5235_v49 = vmax.f32 %v5227_v36, 0.0 }
 0x286   : > { %v5072_v33 = vpop.f32.mrf.mxu1 }
 0x287   : > { %v7481_v18 = vpack.c.bf16 %v5235_v49, %v5234_v32  ;;  %v5073_v22 = vadd.f32 %v5072_v33, %v5044_v9 }
 0x288   : > { %v5211_v1 = vpop.f32.mrf.mxu2 }
 0x289   : > { %7482 = vst [vmem:[%s8797_s11] sm:$0xff] %v7481_v18   ;;  %v5083_v20 = vadd.f32 %v5073_v22, %v4632_v17  ;;  %v5212_v44 = vadd.f32 %v8780_v27, %v5211_v1 }
 0x28b   : > { %v5095_v45 = vadd.f32 %v8785_v24, %v5083_v20  ;;  %v5228_v34 = vadd.f32 %v5212_v44, %v5091_v6 }
 0x28d   : > { %v5232_v23 = vadd.f32 %v5222_v48, %v5095_v45  ;;  %v5236_v35 = vmax.f32 %v5228_v34, 0.0 }
 0x28e   : > { %v5074_v28 = vpop.f32.mrf.mxu1 }
 0x28f   : > { %v5075_v41 = vadd.f32 %v5074_v28, %v5046_v46  ;;  %v5240_v47 = vmax.f32 %v5232_v23, 0.0 }
 0x290   : > { %v5213_v40 = vpop.f32.mrf.mxu2 }
 0x291   : > { %v5084_v56 = vadd.f32 %v5075_v41, %v4634_v39  ;;  %v5214_v13 = vadd.f32 %v8780_v27, %v5213_v40 }
 0x293   : > { %v5229_v50 = vadd.f32 %v5214_v13, %v5092_v54  ;;  %v5096_v8 = vadd.f32 %v8785_v24, %v5084_v56 }
 0x295   : > { %v5237_v58 = vmax.f32 %v5229_v50, 0.0  ;;  %v5233_v55 = vadd.f32 %v5224_v42, %v5096_v8 }
 0x297   : > { %v7486_v37 = vpack.c.bf16 %v5237_v58, %v5236_v35  ;;  %v5241_v10 = vmax.f32 %v5233_v55, 0.0 }
 0x298   : > { %v5216_v11 = vpop.f32.mrf.mxu2 }
 0x299   : > { %7498 = vst [vmem:[%s8797_s11 + $0x8] sm:$0xff] %v7486_v37   ;;  %v7496_v62 = vpack.c.bf16 %v5241_v10, %v5240_v47  ;;  %v5217_v30 = vadd.f32 %v8780_v27, %v5216_v11 }
 0x29b   : > { %7500 = vst [vmem:[%s8797_s11 + $0x18] sm:$0xff] %v7496_v62   ;;  %v5230_v53 = vadd.f32 %v5217_v30, %v5093_v0 }
 0x29d   : > { %v5238_v60 = vmax.f32 %v5230_v53, 0.0 }
 0x2a0   : > { %v5218_v19 = vpop.f32.mrf.mxu2 }
 0x2a1   : > { %v5219_v26 = vadd.f32 %v8780_v27, %v5218_v19 }
 0x2a3   : > { %v5231_v52 = vadd.f32 %v5219_v26, %v5094_v12 }
 0x2a5   : > { %v5239_v21 = vmax.f32 %v5231_v52, 0.0 }
 0x2a7   : > { %v7491_v14 = vpack.c.bf16 %v5239_v21, %v5238_v60 }
 0x2a9   : > { %7499 = vst [vmem:[%s8797_s11 + $0x10] sm:$0xff] %v7491_v14  }
 0x2aa PF: > { %s17_s28 = sadd.s32 1, %s7610_s28   ;;  %s8850_s24 = smov %s7598_s25 }
 0x2ab   : > { %p14_p10 = scmp.ge.s32.totalorder %s17_s28, 4   ;;  %s8851_s25 = smov %s7688_s9 }
 0x2ac   : > { %s8852_s26 = smov %s7606_s27  ;;  %s8853_s27 = smov %s8855_s29 }
 0x2ad   :  { %16 = sbr.rel (!%p14_p10) target bundleno = 3 (0x3), region = 155 }

</bundles_post_ra>
